<compile_context>
chip_gen: v7x
topology: tpu7x:2x2x1
jax: 0.10.0
libtpu: 0.0.40
codegen_flags: <defaults>
</compile_context>

<pallas_src>
import jax
import jax.numpy as jnp
from jax.experimental import pallas as pl
from jax.experimental.pallas import tpu as pltpu

EMBED_DIM = 32
NUM_HEADS = 4
HEAD_DIM = EMBED_DIM // NUM_HEADS
FFN_DIM = 128
SCALING = HEAD_DIM ** (-0.5)
LN_EPS = 1e-5
_INV_SQRT2 = 0.7071067811865476


# ----------------------------- in-kernel helpers -----------------------------

def _erf(z):
    """Abramowitz & Stegun 7.1.26 polynomial erf (|err| <= 1.5e-7).

    Uses only exp/mul/add/select so it lowers cleanly in Mosaic while matching
    PyTorch's exact (erf-based) F.gelu far below fp32 test tolerance.
    """
    a1, a2, a3, a4, a5 = (0.254829592, -0.284496736, 1.421413741,
                          -1.453152027, 1.061405429)
    p = 0.3275911
    az = jnp.abs(z)
    t = 1.0 / (1.0 + p * az)
    poly = ((((a5 * t + a4) * t + a3) * t + a2) * t + a1) * t
    y = 1.0 - poly * jnp.exp(-az * az)
    return jnp.where(z >= 0, y, -y)


def _gelu(x):
    return 0.5 * x * (1.0 + _erf(x * _INV_SQRT2))


def _layer_norm(x, gamma, beta):
    mean = jnp.mean(x, axis=-1, keepdims=True)
    xc = x - mean
    var = jnp.mean(xc * xc, axis=-1, keepdims=True)
    return xc * jax.lax.rsqrt(var + LN_EPS) * gamma + beta


def _softmax_rows(scores):
    scores = scores - jnp.max(scores, axis=-1, keepdims=True)
    e = jnp.exp(scores)
    denom = jnp.sum(e, axis=-1, keepdims=True)
    return e * pl.reciprocal(denom, approx=True)


def _multi_head_attention(q, k, v):
    """q: (Tq, E) pre-scaled; k, v: (Tk, E). Returns (ctx (Tq, E), [probs_h])."""
    ctx_heads, prob_heads = [], []
    for h in range(NUM_HEADS):
        sl = slice(h * HEAD_DIM, (h + 1) * HEAD_DIM)
        qh, kh, vh = q[:, sl], k[:, sl], v[:, sl]
        scores = jax.lax.dot_general(            # q @ k^T without an explicit .T
            qh, kh, (((1,), (1,)), ((), ())),
            preferred_element_type=jnp.float32)
        probs = _softmax_rows(scores)
        ctx_heads.append(jnp.dot(probs, vh, preferred_element_type=jnp.float32))
        prob_heads.append(probs)
    return jnp.concatenate(ctx_heads, axis=-1), prob_heads


# --------------------------------- kernel ------------------------------------

def _decoder_layer_kernel(x_ref, enc_ref,
                          sa_wqkv_ref, sa_bqkv_ref, sa_wo_ref, sa_bo_ref,
                          ca_wq_ref, ca_bq_ref, ca_wkv_ref, ca_bkv_ref,
                          ca_wo_ref, ca_bo_ref,
                          fc1_w_ref, fc1_b_ref, fc2_w_ref, fc2_b_ref,
                          ln_g_ref, ln_b_ref,
                          out_ref, attn_w_ref):
    E = EMBED_DIM
    T, B, _ = x_ref.shape

    x_all = x_ref[...]            # (T, B, E)  - kept in the module's native layout
    enc_all = enc_ref[...]        # (S, B, E)

    sa_wqkv = sa_wqkv_ref[...]; sa_bqkv = sa_bqkv_ref[...]
    sa_wo = sa_wo_ref[...];     sa_bo = sa_bo_ref[...]
    ca_wq = ca_wq_ref[...];     ca_bq = ca_bq_ref[...]
    ca_wkv = ca_wkv_ref[...];   ca_bkv = ca_bkv_ref[...]
    ca_wo = ca_wo_ref[...];     ca_bo = ca_bo_ref[...]
    fc1_w = fc1_w_ref[...];     fc1_b = fc1_b_ref[...]
    fc2_w = fc2_w_ref[...];     fc2_b = fc2_b_ref[...]
    ln_g = ln_g_ref[...];       ln_b = ln_b_ref[...]

    for b in range(B):                                   # tiny static batch: unrolled
        x_b = x_all[:, b, :]                             # (T, E)
        enc_b = enc_all[:, b, :]                         # (S, E)

        # --- self-attention + add & norm ---
        qkv = jnp.dot(x_b, sa_wqkv, preferred_element_type=jnp.float32) + sa_bqkv
        q = qkv[:, :E] * SCALING
        ctx, probs = _multi_head_attention(q, qkv[:, E:2 * E], qkv[:, 2 * E:])
        for h in range(NUM_HEADS):
            attn_w_ref[b, h] = probs[h]
        attn = jnp.dot(ctx, sa_wo, preferred_element_type=jnp.float32) + sa_bo
        h1 = _layer_norm(x_b + attn, ln_g[0:1, :], ln_b[0:1, :])

        # --- encoder-decoder attention + add & norm (static_kv, no mask) ---
        q2 = (jnp.dot(h1, ca_wq, preferred_element_type=jnp.float32) + ca_bq) * SCALING
        kv2 = jnp.dot(enc_b, ca_wkv, preferred_element_type=jnp.float32) + ca_bkv
        ctx2, _ = _multi_head_attention(q2, kv2[:, :E], kv2[:, E:])
        attn2 = jnp.dot(ctx2, ca_wo, preferred_element_type=jnp.float32) + ca_bo
        h2 = _layer_norm(h1 + attn2, ln_g[1:2, :], ln_b[1:2, :])

        # --- feed-forward + add & norm ---
        f = _gelu(jnp.dot(h2, fc1_w, preferred_element_type=jnp.float32) + fc1_b)
        f = jnp.dot(f, fc2_w, preferred_element_type=jnp.float32) + fc2_b
        y = _layer_norm(h2 + f, ln_g[2:3, :], ln_b[2:3, :])

        out_ref[:, b, :] = y                             # lane-dense (E = 32) store


# --------------------------------- wrapper ------------------------------------

def _full_block_spec(shape):
    ndim = len(shape)
    return pl.BlockSpec(shape, lambda i, _nd=ndim: (0,) * _nd)


def pack_params(p):
    """One-time host-side layout plumbing: transpose + fuse projection weights."""
    sa, ca = p["self_attn"], p["encoder_attn"]
    return {
        "sa_wqkv": jnp.concatenate([sa["wq"].T, sa["wk"].T, sa["wv"].T], axis=1),
        "sa_bqkv": jnp.concatenate([sa["bq"], sa["bk"], sa["bv"]])[None, :],
        "sa_wo": sa["wo"].T, "sa_bo": sa["bo"][None, :],
        "ca_wq": ca["wq"].T, "ca_bq": ca["bq"][None, :],
        "ca_wkv": jnp.concatenate([ca["wk"].T, ca["wv"].T], axis=1),
        "ca_bkv": jnp.concatenate([ca["bk"], ca["bv"]])[None, :],
        "ca_wo": ca["wo"].T, "ca_bo": ca["bo"][None, :],
        "fc1_w": p["fc1_w"].T, "fc1_b": p["fc1_b"][None, :],
        "fc2_w": p["fc2_w"].T, "fc2_b": p["fc2_b"][None, :],
        "ln_g": jnp.stack([p["ln1_g"], p["ln2_g"], p["ln3_g"]]),
        "ln_b": jnp.stack([p["ln1_b"], p["ln2_b"], p["ln3_b"]]),
    }


def decoder_layer_forward(x, encoder_hidden_states, packed):
    """x: (T, B, E); encoder_hidden_states: (S, B, E).
    Returns (out (T,B,E), self_attn_weights (B,H,T,T), layer_state placeholder)."""
    T, B, E = x.shape
    S = encoder_hidden_states.shape[0]
    H, hd, F = NUM_HEADS, HEAD_DIM, FFN_DIM
    assert E == EMBED_DIM

    args = (x, encoder_hidden_states,
            packed["sa_wqkv"], packed["sa_bqkv"], packed["sa_wo"], packed["sa_bo"],
            packed["ca_wq"], packed["ca_bq"], packed["ca_wkv"], packed["ca_bkv"],
            packed["ca_wo"], packed["ca_bo"],
            packed["fc1_w"], packed["fc1_b"], packed["fc2_w"], packed["fc2_b"],
            packed["ln_g"], packed["ln_b"])

    flops = B * (2 * T * E * 3 * E + 4 * H * T * T * hd + 2 * T * E * E   # self-attn
                 + 2 * T * E * E + 2 * S * E * 2 * E + 4 * H * T * S * hd
                 + 2 * T * E * E                                          # cross-attn
                 + 4 * T * E * F)                                         # FFN
    transcendentals = B * (H * T * T + H * T * S + T * F)
    bytes_accessed = sum(int(a.size) * 4 for a in args) + (T * B * E + B * H * T * T) * 4

    out, self_attn_weights = pl.pallas_call(
        _decoder_layer_kernel,
        grid=(1,),                                   # whole layer fits in VMEM: one step
        in_specs=[_full_block_spec(a.shape) for a in args],
        out_specs=(_full_block_spec((T, B, E)),
                   _full_block_spec((B, H, T, T))),
        out_shape=(jax.ShapeDtypeStruct((T, B, E), jnp.float32),
                   jax.ShapeDtypeStruct((B, H, T, T), jnp.float32)),
        compiler_params=pltpu.CompilerParams(dimension_semantics=("arbitrary",)),
        cost_estimate=pl.CostEstimate(flops=flops,
                                      transcendentals=transcendentals,
                                      bytes_accessed=bytes_accessed),
    )(*args)

    # TODO(synk): layer_state (prev_key / prev_value KV cache) is not produced.
    return out, self_attn_weights, {}


# ------------------------------ pure-JAX reference ----------------------------

def _reference(x, enc, p):
    """Mirror of DecoderLayer.forward (eval mode, no masks, no cache)."""
    T, B, E = x.shape
    S = enc.shape[0]
    H, hd = NUM_HEADS, HEAD_DIM

    def attention(query, key, a):
        Lq, Lk = query.shape[0], key.shape[0]
        q = (query @ a["wq"].T + a["bq"]) * SCALING
        k = key @ a["wk"].T + a["bk"]
        v = key @ a["wv"].T + a["bv"]

        def shape(t, L):
            return jnp.swapaxes(t.reshape(L, B * H, hd), 0, 1)   # (B*H, L, hd)

        q, k, v = shape(q, Lq), shape(k, Lk), shape(v, Lk)
        w = jax.nn.softmax(jnp.einsum("bqd,bkd->bqk", q, k), axis=-1)
        o = jnp.einsum("bqk,bkd->bqd", w, v)
        o = jnp.swapaxes(o, 0, 1).reshape(Lq, B, E)
        o = o @ a["wo"].T + a["bo"]
        return o, w.reshape(B, H, Lq, Lk)

    def layer_norm(t, g, bb):
        m = jnp.mean(t, axis=-1, keepdims=True)
        v = jnp.mean((t - m) ** 2, axis=-1, keepdims=True)
        return (t - m) / jnp.sqrt(v + LN_EPS) * g + bb

    attn, self_w = attention(x, x, p["self_attn"])
    h1 = layer_norm(x + attn, p["ln1_g"], p["ln1_b"])
    attn2, _ = attention(h1, enc, p["encoder_attn"])
    h2 = layer_norm(h1 + attn2, p["ln2_g"], p["ln2_b"])
    f = jax.nn.gelu(h2 @ p["fc1_w"].T + p["fc1_b"], approximate=False)
    f = f @ p["fc2_w"].T + p["fc2_b"]
    y = layer_norm(h2 + f, p["ln3_g"], p["ln3_b"])
    return y, self_w


def init_params(key):
    E, F = EMBED_DIM, FFN_DIM
    keys = iter(jax.random.split(key, 26))

    def rnd(shape, scale=0.1):
        return jax.random.normal(next(keys), shape, jnp.float32) * scale

    def attn():
        return {"wq": rnd((E, E)), "wk": rnd((E, E)), "wv": rnd((E, E)),
                "wo": rnd((E, E)), "bq": rnd((E,)), "bk": rnd((E,)),
                "bv": rnd((E,)), "bo": rnd((E,))}

    return {
        "self_attn": attn(),
        "encoder_attn": attn(),
        "ln1_g": 1.0 + rnd((E,)), "ln1_b": rnd((E,)),
        "ln2_g": 1.0 + rnd((E,)), "ln2_b": rnd((E,)),
        "ln3_g": 1.0 + rnd((E,)), "ln3_b": rnd((E,)),
        "fc1_w": rnd((F, E)), "fc1_b": rnd((F,)),
        "fc2_w": rnd((E, F)), "fc2_b": rnd((E,)),
    }


if __name__ == "__main__":
    T, B, S = 8, 2, 16
    key = jax.random.PRNGKey(0)
    kp, kx, ke = jax.random.split(key, 3)

    params = init_params(kp)
    x = jax.random.normal(kx, (T, B, EMBED_DIM), jnp.float32)
    enc = jax.random.normal(ke, (S, B, EMBED_DIM), jnp.float32)

    packed = pack_params(params)
    out, self_w, _ = decoder_layer_forward(x, enc, packed)
    out, self_w = jax.block_until_ready((out, self_w))

    ref_out, ref_w = _reference(x, enc, params)

    assert out.shape == (T, B, EMBED_DIM)
    assert self_w.shape == (B, NUM_HEADS, T, T)
    assert jnp.allclose(out, ref_out, atol=2e-3, rtol=2e-3), \
        float(jnp.max(jnp.abs(out - ref_out)))
    assert jnp.allclose(self_w, ref_w, atol=2e-3, rtol=2e-3), \
        float(jnp.max(jnp.abs(self_w - ref_w)))

    print("KERNEL_OK")
</pallas_src>

<mosaic_0001>
module attributes {stable_mosaic.version = 11 : i64} {
  func.func @_decoder_layer_kernel(%arg0: i32, %arg1: memref<8x2x32xf32, #tpu.memory_space<vmem>>, %arg2: memref<16x2x32xf32, #tpu.memory_space<vmem>>, %arg3: memref<32x96xf32, #tpu.memory_space<vmem>>, %arg4: memref<1x96xf32, #tpu.memory_space<vmem>>, %arg5: memref<32x32xf32, #tpu.memory_space<vmem>>, %arg6: memref<1x32xf32, #tpu.memory_space<vmem>>, %arg7: memref<32x32xf32, #tpu.memory_space<vmem>>, %arg8: memref<1x32xf32, #tpu.memory_space<vmem>>, %arg9: memref<32x64xf32, #tpu.memory_space<vmem>>, %arg10: memref<1x64xf32, #tpu.memory_space<vmem>>, %arg11: memref<32x32xf32, #tpu.memory_space<vmem>>, %arg12: memref<1x32xf32, #tpu.memory_space<vmem>>, %arg13: memref<32x128xf32, #tpu.memory_space<vmem>>, %arg14: memref<1x128xf32, #tpu.memory_space<vmem>>, %arg15: memref<128x32xf32, #tpu.memory_space<vmem>>, %arg16: memref<1x32xf32, #tpu.memory_space<vmem>>, %arg17: memref<3x32xf32, #tpu.memory_space<vmem>>, %arg18: memref<3x32xf32, #tpu.memory_space<vmem>>, %arg19: memref<8x2x32xf32, #tpu.memory_space<vmem>>, %arg20: memref<2x4x8x8xf32, #tpu.memory_space<vmem>>) attributes {dimension_semantics = [#tpu.dimension_semantics<arbitrary>], iteration_bounds = array<i64: 1>, scalar_prefetch = 0 : i64, scratch_operands = 0 : i64, tpu.core_type = #tpu.core_type<tc>, window_params = [{pipeline_mode = #tpu.pipeline_mode<synchronous>, transform_indices = @transform_0, window_bounds = array<i64: 8, 2, 32>}, {pipeline_mode = #tpu.pipeline_mode<synchronous>, transform_indices = @transform_1, window_bounds = array<i64: 16, 2, 32>}, {pipeline_mode = #tpu.pipeline_mode<synchronous>, transform_indices = @transform_2, window_bounds = array<i64: 32, 96>}, {pipeline_mode = #tpu.pipeline_mode<synchronous>, transform_indices = @transform_3, window_bounds = array<i64: 1, 96>}, {pipeline_mode = #tpu.pipeline_mode<synchronous>, transform_indices = @transform_4, window_bounds = array<i64: 32, 32>}, {pipeline_mode = #tpu.pipeline_mode<synchronous>, transform_indices = @transform_5, window_bounds = array<i64: 1, 32>}, {pipeline_mode = #tpu.pipeline_mode<synchronous>, transform_indices = @transform_6, window_bounds = array<i64: 32, 32>}, {pipeline_mode = #tpu.pipeline_mode<synchronous>, transform_indices = @transform_7, window_bounds = array<i64: 1, 32>}, {pipeline_mode = #tpu.pipeline_mode<synchronous>, transform_indices = @transform_8, window_bounds = array<i64: 32, 64>}, {pipeline_mode = #tpu.pipeline_mode<synchronous>, transform_indices = @transform_9, window_bounds = array<i64: 1, 64>}, {pipeline_mode = #tpu.pipeline_mode<synchronous>, transform_indices = @transform_10, window_bounds = array<i64: 32, 32>}, {pipeline_mode = #tpu.pipeline_mode<synchronous>, transform_indices = @transform_11, window_bounds = array<i64: 1, 32>}, {pipeline_mode = #tpu.pipeline_mode<synchronous>, transform_indices = @transform_12, window_bounds = array<i64: 32, 128>}, {pipeline_mode = #tpu.pipeline_mode<synchronous>, transform_indices = @transform_13, window_bounds = array<i64: 1, 128>}, {pipeline_mode = #tpu.pipeline_mode<synchronous>, transform_indices = @transform_14, window_bounds = array<i64: 128, 32>}, {pipeline_mode = #tpu.pipeline_mode<synchronous>, transform_indices = @transform_15, window_bounds = array<i64: 1, 32>}, {pipeline_mode = #tpu.pipeline_mode<synchronous>, transform_indices = @transform_16, window_bounds = array<i64: 3, 32>}, {pipeline_mode = #tpu.pipeline_mode<synchronous>, transform_indices = @transform_17, window_bounds = array<i64: 3, 32>}, {pipeline_mode = #tpu.pipeline_mode<synchronous>, transform_indices = @transform_18, window_bounds = array<i64: 8, 2, 32>}, {pipeline_mode = #tpu.pipeline_mode<synchronous>, transform_indices = @transform_19, window_bounds = array<i64: 2, 4, 8, 8>}]} {
    %c0 = arith.constant 0 : index
    %c0_0 = arith.constant 0 : index
    %c0_1 = arith.constant 0 : index
    %0 = vector.load %arg1[%c0, %c0_0, %c0_1] : memref<8x2x32xf32, #tpu.memory_space<vmem>>, vector<8x2x32xf32>
    %c0_2 = arith.constant 0 : index
    %c0_3 = arith.constant 0 : index
    %c0_4 = arith.constant 0 : index
    %1 = vector.load %arg2[%c0_2, %c0_3, %c0_4] : memref<16x2x32xf32, #tpu.memory_space<vmem>>, vector<16x2x32xf32>
    %c0_5 = arith.constant 0 : index
    %c0_6 = arith.constant 0 : index
    %2 = vector.load %arg3[%c0_5, %c0_6] : memref<32x96xf32, #tpu.memory_space<vmem>>, vector<32x96xf32>
    %c0_7 = arith.constant 0 : index
    %c0_8 = arith.constant 0 : index
    %3 = vector.load %arg4[%c0_7, %c0_8] : memref<1x96xf32, #tpu.memory_space<vmem>>, vector<1x96xf32>
    %c0_9 = arith.constant 0 : index
    %c0_10 = arith.constant 0 : index
    %4 = vector.load %arg5[%c0_9, %c0_10] : memref<32x32xf32, #tpu.memory_space<vmem>>, vector<32x32xf32>
    %c0_11 = arith.constant 0 : index
    %c0_12 = arith.constant 0 : index
    %5 = vector.load %arg6[%c0_11, %c0_12] : memref<1x32xf32, #tpu.memory_space<vmem>>, vector<1x32xf32>
    %c0_13 = arith.constant 0 : index
    %c0_14 = arith.constant 0 : index
    %6 = vector.load %arg7[%c0_13, %c0_14] : memref<32x32xf32, #tpu.memory_space<vmem>>, vector<32x32xf32>
    %c0_15 = arith.constant 0 : index
    %c0_16 = arith.constant 0 : index
    %7 = vector.load %arg8[%c0_15, %c0_16] : memref<1x32xf32, #tpu.memory_space<vmem>>, vector<1x32xf32>
    %c0_17 = arith.constant 0 : index
    %c0_18 = arith.constant 0 : index
    %8 = vector.load %arg9[%c0_17, %c0_18] : memref<32x64xf32, #tpu.memory_space<vmem>>, vector<32x64xf32>
    %c0_19 = arith.constant 0 : index
    %c0_20 = arith.constant 0 : index
    %9 = vector.load %arg10[%c0_19, %c0_20] : memref<1x64xf32, #tpu.memory_space<vmem>>, vector<1x64xf32>
    %c0_21 = arith.constant 0 : index
    %c0_22 = arith.constant 0 : index
    %10 = vector.load %arg11[%c0_21, %c0_22] : memref<32x32xf32, #tpu.memory_space<vmem>>, vector<32x32xf32>
    %c0_23 = arith.constant 0 : index
    %c0_24 = arith.constant 0 : index
    %11 = vector.load %arg12[%c0_23, %c0_24] : memref<1x32xf32, #tpu.memory_space<vmem>>, vector<1x32xf32>
    %c0_25 = arith.constant 0 : index
    %c0_26 = arith.constant 0 : index
    %12 = vector.load %arg13[%c0_25, %c0_26] : memref<32x128xf32, #tpu.memory_space<vmem>>, vector<32x128xf32>
    %c0_27 = arith.constant 0 : index
    %c0_28 = arith.constant 0 : index
    %13 = vector.load %arg14[%c0_27, %c0_28] : memref<1x128xf32, #tpu.memory_space<vmem>>, vector<1x128xf32>
    %c0_29 = arith.constant 0 : index
    %c0_30 = arith.constant 0 : index
    %14 = vector.load %arg15[%c0_29, %c0_30] : memref<128x32xf32, #tpu.memory_space<vmem>>, vector<128x32xf32>
    %c0_31 = arith.constant 0 : index
    %c0_32 = arith.constant 0 : index
    %15 = vector.load %arg16[%c0_31, %c0_32] : memref<1x32xf32, #tpu.memory_space<vmem>>, vector<1x32xf32>
    %c0_33 = arith.constant 0 : index
    %c0_34 = arith.constant 0 : index
    %16 = vector.load %arg17[%c0_33, %c0_34] : memref<3x32xf32, #tpu.memory_space<vmem>>, vector<3x32xf32>
    %c0_35 = arith.constant 0 : index
    %c0_36 = arith.constant 0 : index
    %17 = vector.load %arg18[%c0_35, %c0_36] : memref<3x32xf32, #tpu.memory_space<vmem>>, vector<3x32xf32>
    %18 = vector.extract_strided_slice %0 {offsets = [0, 0, 0], sizes = [8, 1, 32], strides = [1, 1, 1]} : vector<8x2x32xf32> to vector<8x1x32xf32>
    %19 = vector.shape_cast %18 : vector<8x1x32xf32> to vector<8x32xf32>
    %20 = vector.extract_strided_slice %1 {offsets = [0, 0, 0], sizes = [16, 1, 32], strides = [1, 1, 1]} : vector<16x2x32xf32> to vector<16x1x32xf32>
    %21 = vector.shape_cast %20 : vector<16x1x32xf32> to vector<16x32xf32>
    %cst = arith.constant dense<0.000000e+00> : vector<8x96xf32>
    %22 = tpu.matmul %19, %2, %cst {dimension_numbers = #tpu.dot_dimension_numbers<[1], [0], [0], [1], [0, 0, 1, 1], [], []>} : vector<8x32xf32>, vector<32x96xf32>, vector<8x96xf32> -> vector<8x96xf32>
    %23 = vector.broadcast %3 : vector<1x96xf32> to vector<8x96xf32>
    %24 = arith.addf %22, %23 : vector<8x96xf32>
    %25 = vector.extract_strided_slice %24 {offsets = [0, 0], sizes = [8, 32], strides = [1, 1]} : vector<8x96xf32> to vector<8x32xf32>
    %cst_37 = arith.constant 0.353553385 : f32
    %26 = vector.broadcast %cst_37 : f32 to vector<8x32xf32>
    %27 = arith.mulf %25, %26 : vector<8x32xf32>
    %28 = vector.extract_strided_slice %24 {offsets = [0, 32], sizes = [8, 32], strides = [1, 1]} : vector<8x96xf32> to vector<8x32xf32>
    %29 = vector.extract_strided_slice %24 {offsets = [0, 64], sizes = [8, 32], strides = [1, 1]} : vector<8x96xf32> to vector<8x32xf32>
    %30 = vector.extract_strided_slice %27 {offsets = [0, 0], sizes = [8, 8], strides = [1, 1]} : vector<8x32xf32> to vector<8x8xf32>
    %31 = vector.extract_strided_slice %28 {offsets = [0, 0], sizes = [8, 8], strides = [1, 1]} : vector<8x32xf32> to vector<8x8xf32>
    %32 = vector.extract_strided_slice %29 {offsets = [0, 0], sizes = [8, 8], strides = [1, 1]} : vector<8x32xf32> to vector<8x8xf32>
    %cst_38 = arith.constant dense<0.000000e+00> : vector<8x8xf32>
    %33 = tpu.matmul %30, %31, %cst_38 {dimension_numbers = #tpu.dot_dimension_numbers<[1], [1], [0], [0], [0, 0, 1, 0], [], []>} : vector<8x8xf32>, vector<8x8xf32>, vector<8x8xf32> -> vector<8x8xf32>
    %cst_39 = arith.constant dense<0xFF800000> : vector<8xf32>
    %34 = vector.multi_reduction <maximumf>, %33, %cst_39 [1] : vector<8x8xf32> to vector<8xf32>
    %35 = vector.shape_cast %34 : vector<8xf32> to vector<8x1xf32>
    %36 = vector.broadcast %35 : vector<8x1xf32> to vector<8x8xf32>
    %37 = arith.subf %33, %36 : vector<8x8xf32>
    %38 = math.exp %37 : vector<8x8xf32>
    %cst_40 = arith.constant dense<0.000000e+00> : vector<8xf32>
    %39 = vector.multi_reduction <add>, %38, %cst_40 [1] : vector<8x8xf32> to vector<8xf32>
    %40 = vector.shape_cast %39 : vector<8xf32> to vector<8x1xf32>
    %41 = tpu.reciprocal %40 {approx = true} : vector<8x1xf32> -> vector<8x1xf32>
    %42 = vector.broadcast %41 : vector<8x1xf32> to vector<8x8xf32>
    %43 = arith.mulf %38, %42 : vector<8x8xf32>
    %cst_41 = arith.constant dense<0.000000e+00> : vector<8x8xf32>
    %44 = tpu.matmul %43, %32, %cst_41 {dimension_numbers = #tpu.dot_dimension_numbers<[1], [0], [0], [1], [0, 0, 1, 1], [], []>} : vector<8x8xf32>, vector<8x8xf32>, vector<8x8xf32> -> vector<8x8xf32>
    %45 = vector.extract_strided_slice %27 {offsets = [0, 8], sizes = [8, 8], strides = [1, 1]} : vector<8x32xf32> to vector<8x8xf32>
    %46 = vector.extract_strided_slice %28 {offsets = [0, 8], sizes = [8, 8], strides = [1, 1]} : vector<8x32xf32> to vector<8x8xf32>
    %47 = vector.extract_strided_slice %29 {offsets = [0, 8], sizes = [8, 8], strides = [1, 1]} : vector<8x32xf32> to vector<8x8xf32>
    %cst_42 = arith.constant dense<0.000000e+00> : vector<8x8xf32>
    %48 = tpu.matmul %45, %46, %cst_42 {dimension_numbers = #tpu.dot_dimension_numbers<[1], [1], [0], [0], [0, 0, 1, 0], [], []>} : vector<8x8xf32>, vector<8x8xf32>, vector<8x8xf32> -> vector<8x8xf32>
    %cst_43 = arith.constant dense<0xFF800000> : vector<8xf32>
    %49 = vector.multi_reduction <maximumf>, %48, %cst_43 [1] : vector<8x8xf32> to vector<8xf32>
    %50 = vector.shape_cast %49 : vector<8xf32> to vector<8x1xf32>
    %51 = vector.broadcast %50 : vector<8x1xf32> to vector<8x8xf32>
    %52 = arith.subf %48, %51 : vector<8x8xf32>
    %53 = math.exp %52 : vector<8x8xf32>
    %cst_44 = arith.constant dense<0.000000e+00> : vector<8xf32>
    %54 = vector.multi_reduction <add>, %53, %cst_44 [1] : vector<8x8xf32> to vector<8xf32>
    %55 = vector.shape_cast %54 : vector<8xf32> to vector<8x1xf32>
    %56 = tpu.reciprocal %55 {approx = true} : vector<8x1xf32> -> vector<8x1xf32>
    %57 = vector.broadcast %56 : vector<8x1xf32> to vector<8x8xf32>
    %58 = arith.mulf %53, %57 : vector<8x8xf32>
    %cst_45 = arith.constant dense<0.000000e+00> : vector<8x8xf32>
    %59 = tpu.matmul %58, %47, %cst_45 {dimension_numbers = #tpu.dot_dimension_numbers<[1], [0], [0], [1], [0, 0, 1, 1], [], []>} : vector<8x8xf32>, vector<8x8xf32>, vector<8x8xf32> -> vector<8x8xf32>
    %60 = vector.extract_strided_slice %27 {offsets = [0, 16], sizes = [8, 8], strides = [1, 1]} : vector<8x32xf32> to vector<8x8xf32>
    %61 = vector.extract_strided_slice %28 {offsets = [0, 16], sizes = [8, 8], strides = [1, 1]} : vector<8x32xf32> to vector<8x8xf32>
    %62 = vector.extract_strided_slice %29 {offsets = [0, 16], sizes = [8, 8], strides = [1, 1]} : vector<8x32xf32> to vector<8x8xf32>
    %cst_46 = arith.constant dense<0.000000e+00> : vector<8x8xf32>
    %63 = tpu.matmul %60, %61, %cst_46 {dimension_numbers = #tpu.dot_dimension_numbers<[1], [1], [0], [0], [0, 0, 1, 0], [], []>} : vector<8x8xf32>, vector<8x8xf32>, vector<8x8xf32> -> vector<8x8xf32>
    %cst_47 = arith.constant dense<0xFF800000> : vector<8xf32>
    %64 = vector.multi_reduction <maximumf>, %63, %cst_47 [1] : vector<8x8xf32> to vector<8xf32>
    %65 = vector.shape_cast %64 : vector<8xf32> to vector<8x1xf32>
    %66 = vector.broadcast %65 : vector<8x1xf32> to vector<8x8xf32>
    %67 = arith.subf %63, %66 : vector<8x8xf32>
    %68 = math.exp %67 : vector<8x8xf32>
    %cst_48 = arith.constant dense<0.000000e+00> : vector<8xf32>
    %69 = vector.multi_reduction <add>, %68, %cst_48 [1] : vector<8x8xf32> to vector<8xf32>
    %70 = vector.shape_cast %69 : vector<8xf32> to vector<8x1xf32>
    %71 = tpu.reciprocal %70 {approx = true} : vector<8x1xf32> -> vector<8x1xf32>
    %72 = vector.broadcast %71 : vector<8x1xf32> to vector<8x8xf32>
    %73 = arith.mulf %68, %72 : vector<8x8xf32>
    %cst_49 = arith.constant dense<0.000000e+00> : vector<8x8xf32>
    %74 = tpu.matmul %73, %62, %cst_49 {dimension_numbers = #tpu.dot_dimension_numbers<[1], [0], [0], [1], [0, 0, 1, 1], [], []>} : vector<8x8xf32>, vector<8x8xf32>, vector<8x8xf32> -> vector<8x8xf32>
    %75 = vector.extract_strided_slice %27 {offsets = [0, 24], sizes = [8, 8], strides = [1, 1]} : vector<8x32xf32> to vector<8x8xf32>
    %76 = vector.extract_strided_slice %28 {offsets = [0, 24], sizes = [8, 8], strides = [1, 1]} : vector<8x32xf32> to vector<8x8xf32>
    %77 = vector.extract_strided_slice %29 {offsets = [0, 24], sizes = [8, 8], strides = [1, 1]} : vector<8x32xf32> to vector<8x8xf32>
    %cst_50 = arith.constant dense<0.000000e+00> : vector<8x8xf32>
    %78 = tpu.matmul %75, %76, %cst_50 {dimension_numbers = #tpu.dot_dimension_numbers<[1], [1], [0], [0], [0, 0, 1, 0], [], []>} : vector<8x8xf32>, vector<8x8xf32>, vector<8x8xf32> -> vector<8x8xf32>
    %cst_51 = arith.constant dense<0xFF800000> : vector<8xf32>
    %79 = vector.multi_reduction <maximumf>, %78, %cst_51 [1] : vector<8x8xf32> to vector<8xf32>
    %80 = vector.shape_cast %79 : vector<8xf32> to vector<8x1xf32>
    %81 = vector.broadcast %80 : vector<8x1xf32> to vector<8x8xf32>
    %82 = arith.subf %78, %81 : vector<8x8xf32>
    %83 = math.exp %82 : vector<8x8xf32>
    %cst_52 = arith.constant dense<0.000000e+00> : vector<8xf32>
    %84 = vector.multi_reduction <add>, %83, %cst_52 [1] : vector<8x8xf32> to vector<8xf32>
    %85 = vector.shape_cast %84 : vector<8xf32> to vector<8x1xf32>
    %86 = tpu.reciprocal %85 {approx = true} : vector<8x1xf32> -> vector<8x1xf32>
    %87 = vector.broadcast %86 : vector<8x1xf32> to vector<8x8xf32>
    %88 = arith.mulf %83, %87 : vector<8x8xf32>
    %cst_53 = arith.constant dense<0.000000e+00> : vector<8x8xf32>
    %89 = tpu.matmul %88, %77, %cst_53 {dimension_numbers = #tpu.dot_dimension_numbers<[1], [0], [0], [1], [0, 0, 1, 1], [], []>} : vector<8x8xf32>, vector<8x8xf32>, vector<8x8xf32> -> vector<8x8xf32>
    %90 = tpu.concatenate %44, %59, %74, %89 in 1 : vector<8x8xf32>, vector<8x8xf32>, vector<8x8xf32>, vector<8x8xf32> -> vector<8x32xf32>
    %c0_54 = arith.constant 0 : index
    %c0_55 = arith.constant 0 : index
    %c0_56 = arith.constant 0 : index
    %c0_57 = arith.constant 0 : index
    %91 = vector.load %arg20[%c0_54, %c0_55, %c0_56, %c0_57] : memref<2x4x8x8xf32, #tpu.memory_space<vmem>>, vector<1x1x8x8xf32>
    %92 = vector.shape_cast %91 : vector<1x1x8x8xf32> to vector<8x8xf32>
    %93 = vector.shape_cast %43 : vector<8x8xf32> to vector<1x1x8x8xf32>
    tpu.vector_store %arg20[%c0_54, %c0_55, %c0_56, %c0_57], %93 {strides = array<i32>} : memref<2x4x8x8xf32, #tpu.memory_space<vmem>>, vector<1x1x8x8xf32>,
    %c0_58 = arith.constant 0 : index
    %c1 = arith.constant 1 : index
    %c0_59 = arith.constant 0 : index
    %c0_60 = arith.constant 0 : index
    %94 = vector.load %arg20[%c0_58, %c1, %c0_59, %c0_60] : memref<2x4x8x8xf32, #tpu.memory_space<vmem>>, vector<1x1x8x8xf32>
    %95 = vector.shape_cast %94 : vector<1x1x8x8xf32> to vector<8x8xf32>
    %96 = vector.shape_cast %58 : vector<8x8xf32> to vector<1x1x8x8xf32>
    tpu.vector_store %arg20[%c0_58, %c1, %c0_59, %c0_60], %96 {strides = array<i32>} : memref<2x4x8x8xf32, #tpu.memory_space<vmem>>, vector<1x1x8x8xf32>,
    %c0_61 = arith.constant 0 : index
    %c2 = arith.constant 2 : index
    %c0_62 = arith.constant 0 : index
    %c0_63 = arith.constant 0 : index
    %97 = vector.load %arg20[%c0_61, %c2, %c0_62, %c0_63] : memref<2x4x8x8xf32, #tpu.memory_space<vmem>>, vector<1x1x8x8xf32>
    %98 = vector.shape_cast %97 : vector<1x1x8x8xf32> to vector<8x8xf32>
    %99 = vector.shape_cast %73 : vector<8x8xf32> to vector<1x1x8x8xf32>
    tpu.vector_store %arg20[%c0_61, %c2, %c0_62, %c0_63], %99 {strides = array<i32>} : memref<2x4x8x8xf32, #tpu.memory_space<vmem>>, vector<1x1x8x8xf32>,
    %c0_64 = arith.constant 0 : index
    %c3 = arith.constant 3 : index
    %c0_65 = arith.constant 0 : index
    %c0_66 = arith.constant 0 : index
    %100 = vector.load %arg20[%c0_64, %c3, %c0_65, %c0_66] : memref<2x4x8x8xf32, #tpu.memory_space<vmem>>, vector<1x1x8x8xf32>
    %101 = vector.shape_cast %100 : vector<1x1x8x8xf32> to vector<8x8xf32>
    %102 = vector.shape_cast %88 : vector<8x8xf32> to vector<1x1x8x8xf32>
    tpu.vector_store %arg20[%c0_64, %c3, %c0_65, %c0_66], %102 {strides = array<i32>} : memref<2x4x8x8xf32, #tpu.memory_space<vmem>>, vector<1x1x8x8xf32>,
    %cst_67 = arith.constant dense<0.000000e+00> : vector<8x32xf32>
    %103 = tpu.matmul %90, %4, %cst_67 {dimension_numbers = #tpu.dot_dimension_numbers<[1], [0], [0], [1], [0, 0, 1, 1], [], []>} : vector<8x32xf32>, vector<32x32xf32>, vector<8x32xf32> -> vector<8x32xf32>
    %104 = vector.broadcast %5 : vector<1x32xf32> to vector<8x32xf32>
    %105 = arith.addf %103, %104 : vector<8x32xf32>
    %106 = arith.addf %19, %105 : vector<8x32xf32>
    %107 = vector.extract_strided_slice %16 {offsets = [0, 0], sizes = [1, 32], strides = [1, 1]} : vector<3x32xf32> to vector<1x32xf32>
    %108 = vector.extract_strided_slice %17 {offsets = [0, 0], sizes = [1, 32], strides = [1, 1]} : vector<3x32xf32> to vector<1x32xf32>
    %cst_68 = arith.constant dense<0.000000e+00> : vector<8xf32>
    %109 = vector.multi_reduction <add>, %106, %cst_68 [1] : vector<8x32xf32> to vector<8xf32>
    %110 = vector.shape_cast %109 : vector<8xf32> to vector<8x1xf32>
    %cst_69 = arith.constant 3.200000e+01 : f32
    %111 = vector.broadcast %cst_69 : f32 to vector<8x1xf32>
    %112 = arith.divf %110, %111 : vector<8x1xf32>
    %113 = vector.broadcast %112 : vector<8x1xf32> to vector<8x32xf32>
    %114 = arith.subf %106, %113 : vector<8x32xf32>
    %115 = arith.mulf %114, %114 : vector<8x32xf32>
    %cst_70 = arith.constant dense<0.000000e+00> : vector<8xf32>
    %116 = vector.multi_reduction <add>, %115, %cst_70 [1] : vector<8x32xf32> to vector<8xf32>
    %117 = vector.shape_cast %116 : vector<8xf32> to vector<8x1xf32>
    %cst_71 = arith.constant 3.200000e+01 : f32
    %118 = vector.broadcast %cst_71 : f32 to vector<8x1xf32>
    %119 = arith.divf %117, %118 : vector<8x1xf32>
    %cst_72 = arith.constant 9.99999974E-6 : f32
    %120 = vector.broadcast %cst_72 : f32 to vector<8x1xf32>
    %121 = arith.addf %119, %120 : vector<8x1xf32>
    %122 = math.rsqrt %121 : vector<8x1xf32>
    %123 = vector.broadcast %122 : vector<8x1xf32> to vector<8x32xf32>
    %124 = arith.mulf %114, %123 : vector<8x32xf32>
    %125 = vector.broadcast %107 : vector<1x32xf32> to vector<8x32xf32>
    %126 = arith.mulf %124, %125 : vector<8x32xf32>
    %127 = vector.broadcast %108 : vector<1x32xf32> to vector<8x32xf32>
    %128 = arith.addf %126, %127 : vector<8x32xf32>
    %cst_73 = arith.constant dense<0.000000e+00> : vector<8x32xf32>
    %129 = tpu.matmul %128, %6, %cst_73 {dimension_numbers = #tpu.dot_dimension_numbers<[1], [0], [0], [1], [0, 0, 1, 1], [], []>} : vector<8x32xf32>, vector<32x32xf32>, vector<8x32xf32> -> vector<8x32xf32>
    %130 = vector.broadcast %7 : vector<1x32xf32> to vector<8x32xf32>
    %131 = arith.addf %129, %130 : vector<8x32xf32>
    %cst_74 = arith.constant 0.353553385 : f32
    %132 = vector.broadcast %cst_74 : f32 to vector<8x32xf32>
    %133 = arith.mulf %131, %132 : vector<8x32xf32>
    %cst_75 = arith.constant dense<0.000000e+00> : vector<16x64xf32>
    %134 = tpu.matmul %21, %8, %cst_75 {dimension_numbers = #tpu.dot_dimension_numbers<[1], [0], [0], [1], [0, 0, 1, 1], [], []>} : vector<16x32xf32>, vector<32x64xf32>, vector<16x64xf32> -> vector<16x64xf32>
    %135 = vector.broadcast %9 : vector<1x64xf32> to vector<16x64xf32>
    %136 = arith.addf %134, %135 : vector<16x64xf32>
    %137 = vector.extract_strided_slice %136 {offsets = [0, 0], sizes = [16, 32], strides = [1, 1]} : vector<16x64xf32> to vector<16x32xf32>
    %138 = vector.extract_strided_slice %136 {offsets = [0, 32], sizes = [16, 32], strides = [1, 1]} : vector<16x64xf32> to vector<16x32xf32>
    %139 = vector.extract_strided_slice %133 {offsets = [0, 0], sizes = [8, 8], strides = [1, 1]} : vector<8x32xf32> to vector<8x8xf32>
    %140 = vector.extract_strided_slice %137 {offsets = [0, 0], sizes = [16, 8], strides = [1, 1]} : vector<16x32xf32> to vector<16x8xf32>
    %141 = vector.extract_strided_slice %138 {offsets = [0, 0], sizes = [16, 8], strides = [1, 1]} : vector<16x32xf32> to vector<16x8xf32>
    %cst_76 = arith.constant dense<0.000000e+00> : vector<8x16xf32>
    %142 = tpu.matmul %139, %140, %cst_76 {dimension_numbers = #tpu.dot_dimension_numbers<[1], [1], [0], [0], [0, 0, 1, 0], [], []>} : vector<8x8xf32>, vector<16x8xf32>, vector<8x16xf32> -> vector<8x16xf32>
    %cst_77 = arith.constant dense<0xFF800000> : vector<8xf32>
    %143 = vector.multi_reduction <maximumf>, %142, %cst_77 [1] : vector<8x16xf32> to vector<8xf32>
    %144 = vector.shape_cast %143 : vector<8xf32> to vector<8x1xf32>
    %145 = vector.broadcast %144 : vector<8x1xf32> to vector<8x16xf32>
    %146 = arith.subf %142, %145 : vector<8x16xf32>
    %147 = math.exp %146 : vector<8x16xf32>
    %cst_78 = arith.constant dense<0.000000e+00> : vector<8xf32>
    %148 = vector.multi_reduction <add>, %147, %cst_78 [1] : vector<8x16xf32> to vector<8xf32>
    %149 = vector.shape_cast %148 : vector<8xf32> to vector<8x1xf32>
    %150 = tpu.reciprocal %149 {approx = true} : vector<8x1xf32> -> vector<8x1xf32>
    %151 = vector.broadcast %150 : vector<8x1xf32> to vector<8x16xf32>
    %152 = arith.mulf %147, %151 : vector<8x16xf32>
    %cst_79 = arith.constant dense<0.000000e+00> : vector<8x8xf32>
    %153 = tpu.matmul %152, %141, %cst_79 {dimension_numbers = #tpu.dot_dimension_numbers<[1], [0], [0], [1], [0, 0, 1, 1], [], []>} : vector<8x16xf32>, vector<16x8xf32>, vector<8x8xf32> -> vector<8x8xf32>
    %154 = vector.extract_strided_slice %133 {offsets = [0, 8], sizes = [8, 8], strides = [1, 1]} : vector<8x32xf32> to vector<8x8xf32>
    %155 = vector.extract_strided_slice %137 {offsets = [0, 8], sizes = [16, 8], strides = [1, 1]} : vector<16x32xf32> to vector<16x8xf32>
    %156 = vector.extract_strided_slice %138 {offsets = [0, 8], sizes = [16, 8], strides = [1, 1]} : vector<16x32xf32> to vector<16x8xf32>
    %cst_80 = arith.constant dense<0.000000e+00> : vector<8x16xf32>
    %157 = tpu.matmul %154, %155, %cst_80 {dimension_numbers = #tpu.dot_dimension_numbers<[1], [1], [0], [0], [0, 0, 1, 0], [], []>} : vector<8x8xf32>, vector<16x8xf32>, vector<8x16xf32> -> vector<8x16xf32>
    %cst_81 = arith.constant dense<0xFF800000> : vector<8xf32>
    %158 = vector.multi_reduction <maximumf>, %157, %cst_81 [1] : vector<8x16xf32> to vector<8xf32>
    %159 = vector.shape_cast %158 : vector<8xf32> to vector<8x1xf32>
    %160 = vector.broadcast %159 : vector<8x1xf32> to vector<8x16xf32>
    %161 = arith.subf %157, %160 : vector<8x16xf32>
    %162 = math.exp %161 : vector<8x16xf32>
    %cst_82 = arith.constant dense<0.000000e+00> : vector<8xf32>
    %163 = vector.multi_reduction <add>, %162, %cst_82 [1] : vector<8x16xf32> to vector<8xf32>
    %164 = vector.shape_cast %163 : vector<8xf32> to vector<8x1xf32>
    %165 = tpu.reciprocal %164 {approx = true} : vector<8x1xf32> -> vector<8x1xf32>
    %166 = vector.broadcast %165 : vector<8x1xf32> to vector<8x16xf32>
    %167 = arith.mulf %162, %166 : vector<8x16xf32>
    %cst_83 = arith.constant dense<0.000000e+00> : vector<8x8xf32>
    %168 = tpu.matmul %167, %156, %cst_83 {dimension_numbers = #tpu.dot_dimension_numbers<[1], [0], [0], [1], [0, 0, 1, 1], [], []>} : vector<8x16xf32>, vector<16x8xf32>, vector<8x8xf32> -> vector<8x8xf32>
    %169 = vector.extract_strided_slice %133 {offsets = [0, 16], sizes = [8, 8], strides = [1, 1]} : vector<8x32xf32> to vector<8x8xf32>
    %170 = vector.extract_strided_slice %137 {offsets = [0, 16], sizes = [16, 8], strides = [1, 1]} : vector<16x32xf32> to vector<16x8xf32>
    %171 = vector.extract_strided_slice %138 {offsets = [0, 16], sizes = [16, 8], strides = [1, 1]} : vector<16x32xf32> to vector<16x8xf32>
    %cst_84 = arith.constant dense<0.000000e+00> : vector<8x16xf32>
    %172 = tpu.matmul %169, %170, %cst_84 {dimension_numbers = #tpu.dot_dimension_numbers<[1], [1], [0], [0], [0, 0, 1, 0], [], []>} : vector<8x8xf32>, vector<16x8xf32>, vector<8x16xf32> -> vector<8x16xf32>
    %cst_85 = arith.constant dense<0xFF800000> : vector<8xf32>
    %173 = vector.multi_reduction <maximumf>, %172, %cst_85 [1] : vector<8x16xf32> to vector<8xf32>
    %174 = vector.shape_cast %173 : vector<8xf32> to vector<8x1xf32>
    %175 = vector.broadcast %174 : vector<8x1xf32> to vector<8x16xf32>
    %176 = arith.subf %172, %175 : vector<8x16xf32>
    %177 = math.exp %176 : vector<8x16xf32>
    %cst_86 = arith.constant dense<0.000000e+00> : vector<8xf32>
    %178 = vector.multi_reduction <add>, %177, %cst_86 [1] : vector<8x16xf32> to vector<8xf32>
    %179 = vector.shape_cast %178 : vector<8xf32> to vector<8x1xf32>
    %180 = tpu.reciprocal %179 {approx = true} : vector<8x1xf32> -> vector<8x1xf32>
    %181 = vector.broadcast %180 : vector<8x1xf32> to vector<8x16xf32>
    %182 = arith.mulf %177, %181 : vector<8x16xf32>
    %cst_87 = arith.constant dense<0.000000e+00> : vector<8x8xf32>
    %183 = tpu.matmul %182, %171, %cst_87 {dimension_numbers = #tpu.dot_dimension_numbers<[1], [0], [0], [1], [0, 0, 1, 1], [], []>} : vector<8x16xf32>, vector<16x8xf32>, vector<8x8xf32> -> vector<8x8xf32>
    %184 = vector.extract_strided_slice %133 {offsets = [0, 24], sizes = [8, 8], strides = [1, 1]} : vector<8x32xf32> to vector<8x8xf32>
    %185 = vector.extract_strided_slice %137 {offsets = [0, 24], sizes = [16, 8], strides = [1, 1]} : vector<16x32xf32> to vector<16x8xf32>
    %186 = vector.extract_strided_slice %138 {offsets = [0, 24], sizes = [16, 8], strides = [1, 1]} : vector<16x32xf32> to vector<16x8xf32>
    %cst_88 = arith.constant dense<0.000000e+00> : vector<8x16xf32>
    %187 = tpu.matmul %184, %185, %cst_88 {dimension_numbers = #tpu.dot_dimension_numbers<[1], [1], [0], [0], [0, 0, 1, 0], [], []>} : vector<8x8xf32>, vector<16x8xf32>, vector<8x16xf32> -> vector<8x16xf32>
    %cst_89 = arith.constant dense<0xFF800000> : vector<8xf32>
    %188 = vector.multi_reduction <maximumf>, %187, %cst_89 [1] : vector<8x16xf32> to vector<8xf32>
    %189 = vector.shape_cast %188 : vector<8xf32> to vector<8x1xf32>
    %190 = vector.broadcast %189 : vector<8x1xf32> to vector<8x16xf32>
    %191 = arith.subf %187, %190 : vector<8x16xf32>
    %192 = math.exp %191 : vector<8x16xf32>
    %cst_90 = arith.constant dense<0.000000e+00> : vector<8xf32>
    %193 = vector.multi_reduction <add>, %192, %cst_90 [1] : vector<8x16xf32> to vector<8xf32>
    %194 = vector.shape_cast %193 : vector<8xf32> to vector<8x1xf32>
    %195 = tpu.reciprocal %194 {approx = true} : vector<8x1xf32> -> vector<8x1xf32>
    %196 = vector.broadcast %195 : vector<8x1xf32> to vector<8x16xf32>
    %197 = arith.mulf %192, %196 : vector<8x16xf32>
    %cst_91 = arith.constant dense<0.000000e+00> : vector<8x8xf32>
    %198 = tpu.matmul %197, %186, %cst_91 {dimension_numbers = #tpu.dot_dimension_numbers<[1], [0], [0], [1], [0, 0, 1, 1], [], []>} : vector<8x16xf32>, vector<16x8xf32>, vector<8x8xf32> -> vector<8x8xf32>
    %199 = tpu.concatenate %153, %168, %183, %198 in 1 : vector<8x8xf32>, vector<8x8xf32>, vector<8x8xf32>, vector<8x8xf32> -> vector<8x32xf32>
    %cst_92 = arith.constant dense<0.000000e+00> : vector<8x32xf32>
    %200 = tpu.matmul %199, %10, %cst_92 {dimension_numbers = #tpu.dot_dimension_numbers<[1], [0], [0], [1], [0, 0, 1, 1], [], []>} : vector<8x32xf32>, vector<32x32xf32>, vector<8x32xf32> -> vector<8x32xf32>
    %201 = vector.broadcast %11 : vector<1x32xf32> to vector<8x32xf32>
    %202 = arith.addf %200, %201 : vector<8x32xf32>
    %203 = arith.addf %128, %202 : vector<8x32xf32>
    %204 = vector.extract_strided_slice %16 {offsets = [1, 0], sizes = [1, 32], strides = [1, 1]} : vector<3x32xf32> to vector<1x32xf32>
    %205 = vector.extract_strided_slice %17 {offsets = [1, 0], sizes = [1, 32], strides = [1, 1]} : vector<3x32xf32> to vector<1x32xf32>
    %cst_93 = arith.constant dense<0.000000e+00> : vector<8xf32>
    %206 = vector.multi_reduction <add>, %203, %cst_93 [1] : vector<8x32xf32> to vector<8xf32>
    %207 = vector.shape_cast %206 : vector<8xf32> to vector<8x1xf32>
    %cst_94 = arith.constant 3.200000e+01 : f32
    %208 = vector.broadcast %cst_94 : f32 to vector<8x1xf32>
    %209 = arith.divf %207, %208 : vector<8x1xf32>
    %210 = vector.broadcast %209 : vector<8x1xf32> to vector<8x32xf32>
    %211 = arith.subf %203, %210 : vector<8x32xf32>
    %212 = arith.mulf %211, %211 : vector<8x32xf32>
    %cst_95 = arith.constant dense<0.000000e+00> : vector<8xf32>
    %213 = vector.multi_reduction <add>, %212, %cst_95 [1] : vector<8x32xf32> to vector<8xf32>
    %214 = vector.shape_cast %213 : vector<8xf32> to vector<8x1xf32>
    %cst_96 = arith.constant 3.200000e+01 : f32
    %215 = vector.broadcast %cst_96 : f32 to vector<8x1xf32>
    %216 = arith.divf %214, %215 : vector<8x1xf32>
    %cst_97 = arith.constant 9.99999974E-6 : f32
    %217 = vector.broadcast %cst_97 : f32 to vector<8x1xf32>
    %218 = arith.addf %216, %217 : vector<8x1xf32>
    %219 = math.rsqrt %218 : vector<8x1xf32>
    %220 = vector.broadcast %219 : vector<8x1xf32> to vector<8x32xf32>
    %221 = arith.mulf %211, %220 : vector<8x32xf32>
    %222 = vector.broadcast %204 : vector<1x32xf32> to vector<8x32xf32>
    %223 = arith.mulf %221, %222 : vector<8x32xf32>
    %224 = vector.broadcast %205 : vector<1x32xf32> to vector<8x32xf32>
    %225 = arith.addf %223, %224 : vector<8x32xf32>
    %cst_98 = arith.constant dense<0.000000e+00> : vector<8x128xf32>
    %226 = tpu.matmul %225, %12, %cst_98 {dimension_numbers = #tpu.dot_dimension_numbers<[1], [0], [0], [1], [0, 0, 1, 1], [], []>} : vector<8x32xf32>, vector<32x128xf32>, vector<8x128xf32> -> vector<8x128xf32>
    %227 = vector.broadcast %13 : vector<1x128xf32> to vector<8x128xf32>
    %228 = arith.addf %226, %227 : vector<8x128xf32>
    %cst_99 = arith.constant 5.000000e-01 : f32
    %229 = vector.broadcast %cst_99 : f32 to vector<8x128xf32>
    %230 = arith.mulf %229, %228 : vector<8x128xf32>
    %cst_100 = arith.constant 0.707106769 : f32
    %231 = vector.broadcast %cst_100 : f32 to vector<8x128xf32>
    %232 = arith.mulf %228, %231 : vector<8x128xf32>
    %233 = math.absf %232 : vector<8x128xf32>
    %cst_101 = arith.constant 0.327591091 : f32
    %234 = vector.broadcast %cst_101 : f32 to vector<8x128xf32>
    %235 = arith.mulf %234, %233 : vector<8x128xf32>
    %cst_102 = arith.constant 1.000000e+00 : f32
    %236 = vector.broadcast %cst_102 : f32 to vector<8x128xf32>
    %237 = arith.addf %236, %235 : vector<8x128xf32>
    %cst_103 = arith.constant 1.000000e+00 : f32
    %238 = vector.broadcast %cst_103 : f32 to vector<8x128xf32>
    %239 = arith.divf %238, %237 : vector<8x128xf32>
    %cst_104 = arith.constant 1.06140542 : f32
    %240 = vector.broadcast %cst_104 : f32 to vector<8x128xf32>
    %241 = arith.mulf %240, %239 : vector<8x128xf32>
    %cst_105 = arith.constant -1.45315206 : f32
    %242 = vector.broadcast %cst_105 : f32 to vector<8x128xf32>
    %243 = arith.addf %241, %242 : vector<8x128xf32>
    %244 = arith.mulf %243, %239 : vector<8x128xf32>
    %cst_106 = arith.constant 1.42141378 : f32
    %245 = vector.broadcast %cst_106 : f32 to vector<8x128xf32>
    %246 = arith.addf %244, %245 : vector<8x128xf32>
    %247 = arith.mulf %246, %239 : vector<8x128xf32>
    %cst_107 = arith.constant -0.284496725 : f32
    %248 = vector.broadcast %cst_107 : f32 to vector<8x128xf32>
    %249 = arith.addf %247, %248 : vector<8x128xf32>
    %250 = arith.mulf %249, %239 : vector<8x128xf32>
    %cst_108 = arith.constant 0.254829586 : f32
    %251 = vector.broadcast %cst_108 : f32 to vector<8x128xf32>
    %252 = arith.addf %250, %251 : vector<8x128xf32>
    %253 = arith.mulf %252, %239 : vector<8x128xf32>
    %cst_109 = arith.constant 0.000000e+00 : f32
    %254 = vector.broadcast %cst_109 : f32 to vector<8x128xf32>
    %255 = arith.subf %254, %233 : vector<8x128xf32>
    %256 = arith.mulf %255, %233 : vector<8x128xf32>
    %257 = math.exp %256 : vector<8x128xf32>
    %258 = arith.mulf %253, %257 : vector<8x128xf32>
    %cst_110 = arith.constant 1.000000e+00 : f32
    %259 = vector.broadcast %cst_110 : f32 to vector<8x128xf32>
    %260 = arith.subf %259, %258 : vector<8x128xf32>
    %cst_111 = arith.constant 0.000000e+00 : f32
    %261 = vector.broadcast %cst_111 : f32 to vector<8x128xf32>
    %262 = arith.cmpf oge, %232, %261 : vector<8x128xf32>
    %cst_112 = arith.constant 0.000000e+00 : f32
    %263 = vector.broadcast %cst_112 : f32 to vector<8x128xf32>
    %264 = arith.subf %263, %260 : vector<8x128xf32>
    %265 = arith.select %262, %260, %264 : vector<8x128xi1>, vector<8x128xf32>
    %cst_113 = arith.constant 1.000000e+00 : f32
    %266 = vector.broadcast %cst_113 : f32 to vector<8x128xf32>
    %267 = arith.addf %266, %265 : vector<8x128xf32>
    %268 = arith.mulf %230, %267 : vector<8x128xf32>
    %cst_114 = arith.constant dense<0.000000e+00> : vector<8x32xf32>
    %269 = tpu.matmul %268, %14, %cst_114 {dimension_numbers = #tpu.dot_dimension_numbers<[1], [0], [0], [1], [0, 0, 1, 1], [], []>} : vector<8x128xf32>, vector<128x32xf32>, vector<8x32xf32> -> vector<8x32xf32>
    %270 = vector.broadcast %15 : vector<1x32xf32> to vector<8x32xf32>
    %271 = arith.addf %269, %270 : vector<8x32xf32>
    %272 = arith.addf %225, %271 : vector<8x32xf32>
    %273 = vector.extract_strided_slice %16 {offsets = [2, 0], sizes = [1, 32], strides = [1, 1]} : vector<3x32xf32> to vector<1x32xf32>
    %274 = vector.extract_strided_slice %17 {offsets = [2, 0], sizes = [1, 32], strides = [1, 1]} : vector<3x32xf32> to vector<1x32xf32>
    %cst_115 = arith.constant dense<0.000000e+00> : vector<8xf32>
    %275 = vector.multi_reduction <add>, %272, %cst_115 [1] : vector<8x32xf32> to vector<8xf32>
    %276 = vector.shape_cast %275 : vector<8xf32> to vector<8x1xf32>
    %cst_116 = arith.constant 3.200000e+01 : f32
    %277 = vector.broadcast %cst_116 : f32 to vector<8x1xf32>
    %278 = arith.divf %276, %277 : vector<8x1xf32>
    %279 = vector.broadcast %278 : vector<8x1xf32> to vector<8x32xf32>
    %280 = arith.subf %272, %279 : vector<8x32xf32>
    %281 = arith.mulf %280, %280 : vector<8x32xf32>
    %cst_117 = arith.constant dense<0.000000e+00> : vector<8xf32>
    %282 = vector.multi_reduction <add>, %281, %cst_117 [1] : vector<8x32xf32> to vector<8xf32>
    %283 = vector.shape_cast %282 : vector<8xf32> to vector<8x1xf32>
    %cst_118 = arith.constant 3.200000e+01 : f32
    %284 = vector.broadcast %cst_118 : f32 to vector<8x1xf32>
    %285 = arith.divf %283, %284 : vector<8x1xf32>
    %cst_119 = arith.constant 9.99999974E-6 : f32
    %286 = vector.broadcast %cst_119 : f32 to vector<8x1xf32>
    %287 = arith.addf %285, %286 : vector<8x1xf32>
    %288 = math.rsqrt %287 : vector<8x1xf32>
    %289 = vector.broadcast %288 : vector<8x1xf32> to vector<8x32xf32>
    %290 = arith.mulf %280, %289 : vector<8x32xf32>
    %291 = vector.broadcast %273 : vector<1x32xf32> to vector<8x32xf32>
    %292 = arith.mulf %290, %291 : vector<8x32xf32>
    %293 = vector.broadcast %274 : vector<1x32xf32> to vector<8x32xf32>
    %294 = arith.addf %292, %293 : vector<8x32xf32>
    %c0_120 = arith.constant 0 : index
    %c0_121 = arith.constant 0 : index
    %c0_122 = arith.constant 0 : index
    %295 = vector.load %arg19[%c0_120, %c0_121, %c0_122] : memref<8x2x32xf32, #tpu.memory_space<vmem>>, vector<8x1x32xf32>
    %296 = vector.shape_cast %295 : vector<8x1x32xf32> to vector<8x32xf32>
    %297 = vector.shape_cast %294 : vector<8x32xf32> to vector<8x1x32xf32>
    tpu.vector_store %arg19[%c0_120, %c0_121, %c0_122], %297 {strides = array<i32>} : memref<8x2x32xf32, #tpu.memory_space<vmem>>, vector<8x1x32xf32>,
    %298 = vector.extract_strided_slice %0 {offsets = [0, 1, 0], sizes = [8, 1, 32], strides = [1, 1, 1]} : vector<8x2x32xf32> to vector<8x1x32xf32>
    %299 = vector.shape_cast %298 : vector<8x1x32xf32> to vector<8x32xf32>
    %300 = vector.extract_strided_slice %1 {offsets = [0, 1, 0], sizes = [16, 1, 32], strides = [1, 1, 1]} : vector<16x2x32xf32> to vector<16x1x32xf32>
    %301 = vector.shape_cast %300 : vector<16x1x32xf32> to vector<16x32xf32>
    %cst_123 = arith.constant dense<0.000000e+00> : vector<8x96xf32>
    %302 = tpu.matmul %299, %2, %cst_123 {dimension_numbers = #tpu.dot_dimension_numbers<[1], [0], [0], [1], [0, 0, 1, 1], [], []>} : vector<8x32xf32>, vector<32x96xf32>, vector<8x96xf32> -> vector<8x96xf32>
    %303 = vector.broadcast %3 : vector<1x96xf32> to vector<8x96xf32>
    %304 = arith.addf %302, %303 : vector<8x96xf32>
    %305 = vector.extract_strided_slice %304 {offsets = [0, 0], sizes = [8, 32], strides = [1, 1]} : vector<8x96xf32> to vector<8x32xf32>
    %cst_124 = arith.constant 0.353553385 : f32
    %306 = vector.broadcast %cst_124 : f32 to vector<8x32xf32>
    %307 = arith.mulf %305, %306 : vector<8x32xf32>
    %308 = vector.extract_strided_slice %304 {offsets = [0, 32], sizes = [8, 32], strides = [1, 1]} : vector<8x96xf32> to vector<8x32xf32>
    %309 = vector.extract_strided_slice %304 {offsets = [0, 64], sizes = [8, 32], strides = [1, 1]} : vector<8x96xf32> to vector<8x32xf32>
    %310 = vector.extract_strided_slice %307 {offsets = [0, 0], sizes = [8, 8], strides = [1, 1]} : vector<8x32xf32> to vector<8x8xf32>
    %311 = vector.extract_strided_slice %308 {offsets = [0, 0], sizes = [8, 8], strides = [1, 1]} : vector<8x32xf32> to vector<8x8xf32>
    %312 = vector.extract_strided_slice %309 {offsets = [0, 0], sizes = [8, 8], strides = [1, 1]} : vector<8x32xf32> to vector<8x8xf32>
    %cst_125 = arith.constant dense<0.000000e+00> : vector<8x8xf32>
    %313 = tpu.matmul %310, %311, %cst_125 {dimension_numbers = #tpu.dot_dimension_numbers<[1], [1], [0], [0], [0, 0, 1, 0], [], []>} : vector<8x8xf32>, vector<8x8xf32>, vector<8x8xf32> -> vector<8x8xf32>
    %cst_126 = arith.constant dense<0xFF800000> : vector<8xf32>
    %314 = vector.multi_reduction <maximumf>, %313, %cst_126 [1] : vector<8x8xf32> to vector<8xf32>
    %315 = vector.shape_cast %314 : vector<8xf32> to vector<8x1xf32>
    %316 = vector.broadcast %315 : vector<8x1xf32> to vector<8x8xf32>
    %317 = arith.subf %313, %316 : vector<8x8xf32>
    %318 = math.exp %317 : vector<8x8xf32>
    %cst_127 = arith.constant dense<0.000000e+00> : vector<8xf32>
    %319 = vector.multi_reduction <add>, %318, %cst_127 [1] : vector<8x8xf32> to vector<8xf32>
    %320 = vector.shape_cast %319 : vector<8xf32> to vector<8x1xf32>
    %321 = tpu.reciprocal %320 {approx = true} : vector<8x1xf32> -> vector<8x1xf32>
    %322 = vector.broadcast %321 : vector<8x1xf32> to vector<8x8xf32>
    %323 = arith.mulf %318, %322 : vector<8x8xf32>
    %cst_128 = arith.constant dense<0.000000e+00> : vector<8x8xf32>
    %324 = tpu.matmul %323, %312, %cst_128 {dimension_numbers = #tpu.dot_dimension_numbers<[1], [0], [0], [1], [0, 0, 1, 1], [], []>} : vector<8x8xf32>, vector<8x8xf32>, vector<8x8xf32> -> vector<8x8xf32>
    %325 = vector.extract_strided_slice %307 {offsets = [0, 8], sizes = [8, 8], strides = [1, 1]} : vector<8x32xf32> to vector<8x8xf32>
    %326 = vector.extract_strided_slice %308 {offsets = [0, 8], sizes = [8, 8], strides = [1, 1]} : vector<8x32xf32> to vector<8x8xf32>
    %327 = vector.extract_strided_slice %309 {offsets = [0, 8], sizes = [8, 8], strides = [1, 1]} : vector<8x32xf32> to vector<8x8xf32>
    %cst_129 = arith.constant dense<0.000000e+00> : vector<8x8xf32>
    %328 = tpu.matmul %325, %326, %cst_129 {dimension_numbers = #tpu.dot_dimension_numbers<[1], [1], [0], [0], [0, 0, 1, 0], [], []>} : vector<8x8xf32>, vector<8x8xf32>, vector<8x8xf32> -> vector<8x8xf32>
    %cst_130 = arith.constant dense<0xFF800000> : vector<8xf32>
    %329 = vector.multi_reduction <maximumf>, %328, %cst_130 [1] : vector<8x8xf32> to vector<8xf32>
    %330 = vector.shape_cast %329 : vector<8xf32> to vector<8x1xf32>
    %331 = vector.broadcast %330 : vector<8x1xf32> to vector<8x8xf32>
    %332 = arith.subf %328, %331 : vector<8x8xf32>
    %333 = math.exp %332 : vector<8x8xf32>
    %cst_131 = arith.constant dense<0.000000e+00> : vector<8xf32>
    %334 = vector.multi_reduction <add>, %333, %cst_131 [1] : vector<8x8xf32> to vector<8xf32>
    %335 = vector.shape_cast %334 : vector<8xf32> to vector<8x1xf32>
    %336 = tpu.reciprocal %335 {approx = true} : vector<8x1xf32> -> vector<8x1xf32>
    %337 = vector.broadcast %336 : vector<8x1xf32> to vector<8x8xf32>
    %338 = arith.mulf %333, %337 : vector<8x8xf32>
    %cst_132 = arith.constant dense<0.000000e+00> : vector<8x8xf32>
    %339 = tpu.matmul %338, %327, %cst_132 {dimension_numbers = #tpu.dot_dimension_numbers<[1], [0], [0], [1], [0, 0, 1, 1], [], []>} : vector<8x8xf32>, vector<8x8xf32>, vector<8x8xf32> -> vector<8x8xf32>
    %340 = vector.extract_strided_slice %307 {offsets = [0, 16], sizes = [8, 8], strides = [1, 1]} : vector<8x32xf32> to vector<8x8xf32>
    %341 = vector.extract_strided_slice %308 {offsets = [0, 16], sizes = [8, 8], strides = [1, 1]} : vector<8x32xf32> to vector<8x8xf32>
    %342 = vector.extract_strided_slice %309 {offsets = [0, 16], sizes = [8, 8], strides = [1, 1]} : vector<8x32xf32> to vector<8x8xf32>
    %cst_133 = arith.constant dense<0.000000e+00> : vector<8x8xf32>
    %343 = tpu.matmul %340, %341, %cst_133 {dimension_numbers = #tpu.dot_dimension_numbers<[1], [1], [0], [0], [0, 0, 1, 0], [], []>} : vector<8x8xf32>, vector<8x8xf32>, vector<8x8xf32> -> vector<8x8xf32>
    %cst_134 = arith.constant dense<0xFF800000> : vector<8xf32>
    %344 = vector.multi_reduction <maximumf>, %343, %cst_134 [1] : vector<8x8xf32> to vector<8xf32>
    %345 = vector.shape_cast %344 : vector<8xf32> to vector<8x1xf32>
    %346 = vector.broadcast %345 : vector<8x1xf32> to vector<8x8xf32>
    %347 = arith.subf %343, %346 : vector<8x8xf32>
    %348 = math.exp %347 : vector<8x8xf32>
    %cst_135 = arith.constant dense<0.000000e+00> : vector<8xf32>
    %349 = vector.multi_reduction <add>, %348, %cst_135 [1] : vector<8x8xf32> to vector<8xf32>
    %350 = vector.shape_cast %349 : vector<8xf32> to vector<8x1xf32>
    %351 = tpu.reciprocal %350 {approx = true} : vector<8x1xf32> -> vector<8x1xf32>
    %352 = vector.broadcast %351 : vector<8x1xf32> to vector<8x8xf32>
    %353 = arith.mulf %348, %352 : vector<8x8xf32>
    %cst_136 = arith.constant dense<0.000000e+00> : vector<8x8xf32>
    %354 = tpu.matmul %353, %342, %cst_136 {dimension_numbers = #tpu.dot_dimension_numbers<[1], [0], [0], [1], [0, 0, 1, 1], [], []>} : vector<8x8xf32>, vector<8x8xf32>, vector<8x8xf32> -> vector<8x8xf32>
    %355 = vector.extract_strided_slice %307 {offsets = [0, 24], sizes = [8, 8], strides = [1, 1]} : vector<8x32xf32> to vector<8x8xf32>
    %356 = vector.extract_strided_slice %308 {offsets = [0, 24], sizes = [8, 8], strides = [1, 1]} : vector<8x32xf32> to vector<8x8xf32>
    %357 = vector.extract_strided_slice %309 {offsets = [0, 24], sizes = [8, 8], strides = [1, 1]} : vector<8x32xf32> to vector<8x8xf32>
    %cst_137 = arith.constant dense<0.000000e+00> : vector<8x8xf32>
    %358 = tpu.matmul %355, %356, %cst_137 {dimension_numbers = #tpu.dot_dimension_numbers<[1], [1], [0], [0], [0, 0, 1, 0], [], []>} : vector<8x8xf32>, vector<8x8xf32>, vector<8x8xf32> -> vector<8x8xf32>
    %cst_138 = arith.constant dense<0xFF800000> : vector<8xf32>
    %359 = vector.multi_reduction <maximumf>, %358, %cst_138 [1] : vector<8x8xf32> to vector<8xf32>
    %360 = vector.shape_cast %359 : vector<8xf32> to vector<8x1xf32>
    %361 = vector.broadcast %360 : vector<8x1xf32> to vector<8x8xf32>
    %362 = arith.subf %358, %361 : vector<8x8xf32>
    %363 = math.exp %362 : vector<8x8xf32>
    %cst_139 = arith.constant dense<0.000000e+00> : vector<8xf32>
    %364 = vector.multi_reduction <add>, %363, %cst_139 [1] : vector<8x8xf32> to vector<8xf32>
    %365 = vector.shape_cast %364 : vector<8xf32> to vector<8x1xf32>
    %366 = tpu.reciprocal %365 {approx = true} : vector<8x1xf32> -> vector<8x1xf32>
    %367 = vector.broadcast %366 : vector<8x1xf32> to vector<8x8xf32>
    %368 = arith.mulf %363, %367 : vector<8x8xf32>
    %cst_140 = arith.constant dense<0.000000e+00> : vector<8x8xf32>
    %369 = tpu.matmul %368, %357, %cst_140 {dimension_numbers = #tpu.dot_dimension_numbers<[1], [0], [0], [1], [0, 0, 1, 1], [], []>} : vector<8x8xf32>, vector<8x8xf32>, vector<8x8xf32> -> vector<8x8xf32>
    %370 = tpu.concatenate %324, %339, %354, %369 in 1 : vector<8x8xf32>, vector<8x8xf32>, vector<8x8xf32>, vector<8x8xf32> -> vector<8x32xf32>
    %c1_141 = arith.constant 1 : index
    %c0_142 = arith.constant 0 : index
    %c0_143 = arith.constant 0 : index
    %c0_144 = arith.constant 0 : index
    %371 = vector.load %arg20[%c1_141, %c0_142, %c0_143, %c0_144] : memref<2x4x8x8xf32, #tpu.memory_space<vmem>>, vector<1x1x8x8xf32>
    %372 = vector.shape_cast %371 : vector<1x1x8x8xf32> to vector<8x8xf32>
    %373 = vector.shape_cast %323 : vector<8x8xf32> to vector<1x1x8x8xf32>
    tpu.vector_store %arg20[%c1_141, %c0_142, %c0_143, %c0_144], %373 {strides = array<i32>} : memref<2x4x8x8xf32, #tpu.memory_space<vmem>>, vector<1x1x8x8xf32>,
    %c1_145 = arith.constant 1 : index
    %c1_146 = arith.constant 1 : index
    %c0_147 = arith.constant 0 : index
    %c0_148 = arith.constant 0 : index
    %374 = vector.load %arg20[%c1_145, %c1_146, %c0_147, %c0_148] : memref<2x4x8x8xf32, #tpu.memory_space<vmem>>, vector<1x1x8x8xf32>
    %375 = vector.shape_cast %374 : vector<1x1x8x8xf32> to vector<8x8xf32>
    %376 = vector.shape_cast %338 : vector<8x8xf32> to vector<1x1x8x8xf32>
    tpu.vector_store %arg20[%c1_145, %c1_146, %c0_147, %c0_148], %376 {strides = array<i32>} : memref<2x4x8x8xf32, #tpu.memory_space<vmem>>, vector<1x1x8x8xf32>,
    %c1_149 = arith.constant 1 : index
    %c2_150 = arith.constant 2 : index
    %c0_151 = arith.constant 0 : index
    %c0_152 = arith.constant 0 : index
    %377 = vector.load %arg20[%c1_149, %c2_150, %c0_151, %c0_152] : memref<2x4x8x8xf32, #tpu.memory_space<vmem>>, vector<1x1x8x8xf32>
    %378 = vector.shape_cast %377 : vector<1x1x8x8xf32> to vector<8x8xf32>
    %379 = vector.shape_cast %353 : vector<8x8xf32> to vector<1x1x8x8xf32>
    tpu.vector_store %arg20[%c1_149, %c2_150, %c0_151, %c0_152], %379 {strides = array<i32>} : memref<2x4x8x8xf32, #tpu.memory_space<vmem>>, vector<1x1x8x8xf32>,
    %c1_153 = arith.constant 1 : index
    %c3_154 = arith.constant 3 : index
    %c0_155 = arith.constant 0 : index
    %c0_156 = arith.constant 0 : index
    %380 = vector.load %arg20[%c1_153, %c3_154, %c0_155, %c0_156] : memref<2x4x8x8xf32, #tpu.memory_space<vmem>>, vector<1x1x8x8xf32>
    %381 = vector.shape_cast %380 : vector<1x1x8x8xf32> to vector<8x8xf32>
    %382 = vector.shape_cast %368 : vector<8x8xf32> to vector<1x1x8x8xf32>
    tpu.vector_store %arg20[%c1_153, %c3_154, %c0_155, %c0_156], %382 {strides = array<i32>} : memref<2x4x8x8xf32, #tpu.memory_space<vmem>>, vector<1x1x8x8xf32>,
    %cst_157 = arith.constant dense<0.000000e+00> : vector<8x32xf32>
    %383 = tpu.matmul %370, %4, %cst_157 {dimension_numbers = #tpu.dot_dimension_numbers<[1], [0], [0], [1], [0, 0, 1, 1], [], []>} : vector<8x32xf32>, vector<32x32xf32>, vector<8x32xf32> -> vector<8x32xf32>
    %384 = vector.broadcast %5 : vector<1x32xf32> to vector<8x32xf32>
    %385 = arith.addf %383, %384 : vector<8x32xf32>
    %386 = arith.addf %299, %385 : vector<8x32xf32>
    %387 = vector.extract_strided_slice %16 {offsets = [0, 0], sizes = [1, 32], strides = [1, 1]} : vector<3x32xf32> to vector<1x32xf32>
    %388 = vector.extract_strided_slice %17 {offsets = [0, 0], sizes = [1, 32], strides = [1, 1]} : vector<3x32xf32> to vector<1x32xf32>
    %cst_158 = arith.constant dense<0.000000e+00> : vector<8xf32>
    %389 = vector.multi_reduction <add>, %386, %cst_158 [1] : vector<8x32xf32> to vector<8xf32>
    %390 = vector.shape_cast %389 : vector<8xf32> to vector<8x1xf32>
    %cst_159 = arith.constant 3.200000e+01 : f32
    %391 = vector.broadcast %cst_159 : f32 to vector<8x1xf32>
    %392 = arith.divf %390, %391 : vector<8x1xf32>
    %393 = vector.broadcast %392 : vector<8x1xf32> to vector<8x32xf32>
    %394 = arith.subf %386, %393 : vector<8x32xf32>
    %395 = arith.mulf %394, %394 : vector<8x32xf32>
    %cst_160 = arith.constant dense<0.000000e+00> : vector<8xf32>
    %396 = vector.multi_reduction <add>, %395, %cst_160 [1] : vector<8x32xf32> to vector<8xf32>
    %397 = vector.shape_cast %396 : vector<8xf32> to vector<8x1xf32>
    %cst_161 = arith.constant 3.200000e+01 : f32
    %398 = vector.broadcast %cst_161 : f32 to vector<8x1xf32>
    %399 = arith.divf %397, %398 : vector<8x1xf32>
    %cst_162 = arith.constant 9.99999974E-6 : f32
    %400 = vector.broadcast %cst_162 : f32 to vector<8x1xf32>
    %401 = arith.addf %399, %400 : vector<8x1xf32>
    %402 = math.rsqrt %401 : vector<8x1xf32>
    %403 = vector.broadcast %402 : vector<8x1xf32> to vector<8x32xf32>
    %404 = arith.mulf %394, %403 : vector<8x32xf32>
    %405 = vector.broadcast %387 : vector<1x32xf32> to vector<8x32xf32>
    %406 = arith.mulf %404, %405 : vector<8x32xf32>
    %407 = vector.broadcast %388 : vector<1x32xf32> to vector<8x32xf32>
    %408 = arith.addf %406, %407 : vector<8x32xf32>
    %cst_163 = arith.constant dense<0.000000e+00> : vector<8x32xf32>
    %409 = tpu.matmul %408, %6, %cst_163 {dimension_numbers = #tpu.dot_dimension_numbers<[1], [0], [0], [1], [0, 0, 1, 1], [], []>} : vector<8x32xf32>, vector<32x32xf32>, vector<8x32xf32> -> vector<8x32xf32>
    %410 = vector.broadcast %7 : vector<1x32xf32> to vector<8x32xf32>
    %411 = arith.addf %409, %410 : vector<8x32xf32>
    %cst_164 = arith.constant 0.353553385 : f32
    %412 = vector.broadcast %cst_164 : f32 to vector<8x32xf32>
    %413 = arith.mulf %411, %412 : vector<8x32xf32>
    %cst_165 = arith.constant dense<0.000000e+00> : vector<16x64xf32>
    %414 = tpu.matmul %301, %8, %cst_165 {dimension_numbers = #tpu.dot_dimension_numbers<[1], [0], [0], [1], [0, 0, 1, 1], [], []>} : vector<16x32xf32>, vector<32x64xf32>, vector<16x64xf32> -> vector<16x64xf32>
    %415 = vector.broadcast %9 : vector<1x64xf32> to vector<16x64xf32>
    %416 = arith.addf %414, %415 : vector<16x64xf32>
    %417 = vector.extract_strided_slice %416 {offsets = [0, 0], sizes = [16, 32], strides = [1, 1]} : vector<16x64xf32> to vector<16x32xf32>
    %418 = vector.extract_strided_slice %416 {offsets = [0, 32], sizes = [16, 32], strides = [1, 1]} : vector<16x64xf32> to vector<16x32xf32>
    %419 = vector.extract_strided_slice %413 {offsets = [0, 0], sizes = [8, 8], strides = [1, 1]} : vector<8x32xf32> to vector<8x8xf32>
    %420 = vector.extract_strided_slice %417 {offsets = [0, 0], sizes = [16, 8], strides = [1, 1]} : vector<16x32xf32> to vector<16x8xf32>
    %421 = vector.extract_strided_slice %418 {offsets = [0, 0], sizes = [16, 8], strides = [1, 1]} : vector<16x32xf32> to vector<16x8xf32>
    %cst_166 = arith.constant dense<0.000000e+00> : vector<8x16xf32>
    %422 = tpu.matmul %419, %420, %cst_166 {dimension_numbers = #tpu.dot_dimension_numbers<[1], [1], [0], [0], [0, 0, 1, 0], [], []>} : vector<8x8xf32>, vector<16x8xf32>, vector<8x16xf32> -> vector<8x16xf32>
    %cst_167 = arith.constant dense<0xFF800000> : vector<8xf32>
    %423 = vector.multi_reduction <maximumf>, %422, %cst_167 [1] : vector<8x16xf32> to vector<8xf32>
    %424 = vector.shape_cast %423 : vector<8xf32> to vector<8x1xf32>
    %425 = vector.broadcast %424 : vector<8x1xf32> to vector<8x16xf32>
    %426 = arith.subf %422, %425 : vector<8x16xf32>
    %427 = math.exp %426 : vector<8x16xf32>
    %cst_168 = arith.constant dense<0.000000e+00> : vector<8xf32>
    %428 = vector.multi_reduction <add>, %427, %cst_168 [1] : vector<8x16xf32> to vector<8xf32>
    %429 = vector.shape_cast %428 : vector<8xf32> to vector<8x1xf32>
    %430 = tpu.reciprocal %429 {approx = true} : vector<8x1xf32> -> vector<8x1xf32>
    %431 = vector.broadcast %430 : vector<8x1xf32> to vector<8x16xf32>
    %432 = arith.mulf %427, %431 : vector<8x16xf32>
    %cst_169 = arith.constant dense<0.000000e+00> : vector<8x8xf32>
    %433 = tpu.matmul %432, %421, %cst_169 {dimension_numbers = #tpu.dot_dimension_numbers<[1], [0], [0], [1], [0, 0, 1, 1], [], []>} : vector<8x16xf32>, vector<16x8xf32>, vector<8x8xf32> -> vector<8x8xf32>
    %434 = vector.extract_strided_slice %413 {offsets = [0, 8], sizes = [8, 8], strides = [1, 1]} : vector<8x32xf32> to vector<8x8xf32>
    %435 = vector.extract_strided_slice %417 {offsets = [0, 8], sizes = [16, 8], strides = [1, 1]} : vector<16x32xf32> to vector<16x8xf32>
    %436 = vector.extract_strided_slice %418 {offsets = [0, 8], sizes = [16, 8], strides = [1, 1]} : vector<16x32xf32> to vector<16x8xf32>
    %cst_170 = arith.constant dense<0.000000e+00> : vector<8x16xf32>
    %437 = tpu.matmul %434, %435, %cst_170 {dimension_numbers = #tpu.dot_dimension_numbers<[1], [1], [0], [0], [0, 0, 1, 0], [], []>} : vector<8x8xf32>, vector<16x8xf32>, vector<8x16xf32> -> vector<8x16xf32>
    %cst_171 = arith.constant dense<0xFF800000> : vector<8xf32>
    %438 = vector.multi_reduction <maximumf>, %437, %cst_171 [1] : vector<8x16xf32> to vector<8xf32>
    %439 = vector.shape_cast %438 : vector<8xf32> to vector<8x1xf32>
    %440 = vector.broadcast %439 : vector<8x1xf32> to vector<8x16xf32>
    %441 = arith.subf %437, %440 : vector<8x16xf32>
    %442 = math.exp %441 : vector<8x16xf32>
    %cst_172 = arith.constant dense<0.000000e+00> : vector<8xf32>
    %443 = vector.multi_reduction <add>, %442, %cst_172 [1] : vector<8x16xf32> to vector<8xf32>
    %444 = vector.shape_cast %443 : vector<8xf32> to vector<8x1xf32>
    %445 = tpu.reciprocal %444 {approx = true} : vector<8x1xf32> -> vector<8x1xf32>
    %446 = vector.broadcast %445 : vector<8x1xf32> to vector<8x16xf32>
    %447 = arith.mulf %442, %446 : vector<8x16xf32>
    %cst_173 = arith.constant dense<0.000000e+00> : vector<8x8xf32>
    %448 = tpu.matmul %447, %436, %cst_173 {dimension_numbers = #tpu.dot_dimension_numbers<[1], [0], [0], [1], [0, 0, 1, 1], [], []>} : vector<8x16xf32>, vector<16x8xf32>, vector<8x8xf32> -> vector<8x8xf32>
    %449 = vector.extract_strided_slice %413 {offsets = [0, 16], sizes = [8, 8], strides = [1, 1]} : vector<8x32xf32> to vector<8x8xf32>
    %450 = vector.extract_strided_slice %417 {offsets = [0, 16], sizes = [16, 8], strides = [1, 1]} : vector<16x32xf32> to vector<16x8xf32>
    %451 = vector.extract_strided_slice %418 {offsets = [0, 16], sizes = [16, 8], strides = [1, 1]} : vector<16x32xf32> to vector<16x8xf32>
    %cst_174 = arith.constant dense<0.000000e+00> : vector<8x16xf32>
    %452 = tpu.matmul %449, %450, %cst_174 {dimension_numbers = #tpu.dot_dimension_numbers<[1], [1], [0], [0], [0, 0, 1, 0], [], []>} : vector<8x8xf32>, vector<16x8xf32>, vector<8x16xf32> -> vector<8x16xf32>
    %cst_175 = arith.constant dense<0xFF800000> : vector<8xf32>
    %453 = vector.multi_reduction <maximumf>, %452, %cst_175 [1] : vector<8x16xf32> to vector<8xf32>
    %454 = vector.shape_cast %453 : vector<8xf32> to vector<8x1xf32>
    %455 = vector.broadcast %454 : vector<8x1xf32> to vector<8x16xf32>
    %456 = arith.subf %452, %455 : vector<8x16xf32>
    %457 = math.exp %456 : vector<8x16xf32>
    %cst_176 = arith.constant dense<0.000000e+00> : vector<8xf32>
    %458 = vector.multi_reduction <add>, %457, %cst_176 [1] : vector<8x16xf32> to vector<8xf32>
    %459 = vector.shape_cast %458 : vector<8xf32> to vector<8x1xf32>
    %460 = tpu.reciprocal %459 {approx = true} : vector<8x1xf32> -> vector<8x1xf32>
    %461 = vector.broadcast %460 : vector<8x1xf32> to vector<8x16xf32>
    %462 = arith.mulf %457, %461 : vector<8x16xf32>
    %cst_177 = arith.constant dense<0.000000e+00> : vector<8x8xf32>
    %463 = tpu.matmul %462, %451, %cst_177 {dimension_numbers = #tpu.dot_dimension_numbers<[1], [0], [0], [1], [0, 0, 1, 1], [], []>} : vector<8x16xf32>, vector<16x8xf32>, vector<8x8xf32> -> vector<8x8xf32>
    %464 = vector.extract_strided_slice %413 {offsets = [0, 24], sizes = [8, 8], strides = [1, 1]} : vector<8x32xf32> to vector<8x8xf32>
    %465 = vector.extract_strided_slice %417 {offsets = [0, 24], sizes = [16, 8], strides = [1, 1]} : vector<16x32xf32> to vector<16x8xf32>
    %466 = vector.extract_strided_slice %418 {offsets = [0, 24], sizes = [16, 8], strides = [1, 1]} : vector<16x32xf32> to vector<16x8xf32>
    %cst_178 = arith.constant dense<0.000000e+00> : vector<8x16xf32>
    %467 = tpu.matmul %464, %465, %cst_178 {dimension_numbers = #tpu.dot_dimension_numbers<[1], [1], [0], [0], [0, 0, 1, 0], [], []>} : vector<8x8xf32>, vector<16x8xf32>, vector<8x16xf32> -> vector<8x16xf32>
    %cst_179 = arith.constant dense<0xFF800000> : vector<8xf32>
    %468 = vector.multi_reduction <maximumf>, %467, %cst_179 [1] : vector<8x16xf32> to vector<8xf32>
    %469 = vector.shape_cast %468 : vector<8xf32> to vector<8x1xf32>
    %470 = vector.broadcast %469 : vector<8x1xf32> to vector<8x16xf32>
    %471 = arith.subf %467, %470 : vector<8x16xf32>
    %472 = math.exp %471 : vector<8x16xf32>
    %cst_180 = arith.constant dense<0.000000e+00> : vector<8xf32>
    %473 = vector.multi_reduction <add>, %472, %cst_180 [1] : vector<8x16xf32> to vector<8xf32>
    %474 = vector.shape_cast %473 : vector<8xf32> to vector<8x1xf32>
    %475 = tpu.reciprocal %474 {approx = true} : vector<8x1xf32> -> vector<8x1xf32>
    %476 = vector.broadcast %475 : vector<8x1xf32> to vector<8x16xf32>
    %477 = arith.mulf %472, %476 : vector<8x16xf32>
    %cst_181 = arith.constant dense<0.000000e+00> : vector<8x8xf32>
    %478 = tpu.matmul %477, %466, %cst_181 {dimension_numbers = #tpu.dot_dimension_numbers<[1], [0], [0], [1], [0, 0, 1, 1], [], []>} : vector<8x16xf32>, vector<16x8xf32>, vector<8x8xf32> -> vector<8x8xf32>
    %479 = tpu.concatenate %433, %448, %463, %478 in 1 : vector<8x8xf32>, vector<8x8xf32>, vector<8x8xf32>, vector<8x8xf32> -> vector<8x32xf32>
    %cst_182 = arith.constant dense<0.000000e+00> : vector<8x32xf32>
    %480 = tpu.matmul %479, %10, %cst_182 {dimension_numbers = #tpu.dot_dimension_numbers<[1], [0], [0], [1], [0, 0, 1, 1], [], []>} : vector<8x32xf32>, vector<32x32xf32>, vector<8x32xf32> -> vector<8x32xf32>
    %481 = vector.broadcast %11 : vector<1x32xf32> to vector<8x32xf32>
    %482 = arith.addf %480, %481 : vector<8x32xf32>
    %483 = arith.addf %408, %482 : vector<8x32xf32>
    %484 = vector.extract_strided_slice %16 {offsets = [1, 0], sizes = [1, 32], strides = [1, 1]} : vector<3x32xf32> to vector<1x32xf32>
    %485 = vector.extract_strided_slice %17 {offsets = [1, 0], sizes = [1, 32], strides = [1, 1]} : vector<3x32xf32> to vector<1x32xf32>
    %cst_183 = arith.constant dense<0.000000e+00> : vector<8xf32>
    %486 = vector.multi_reduction <add>, %483, %cst_183 [1] : vector<8x32xf32> to vector<8xf32>
    %487 = vector.shape_cast %486 : vector<8xf32> to vector<8x1xf32>
    %cst_184 = arith.constant 3.200000e+01 : f32
    %488 = vector.broadcast %cst_184 : f32 to vector<8x1xf32>
    %489 = arith.divf %487, %488 : vector<8x1xf32>
    %490 = vector.broadcast %489 : vector<8x1xf32> to vector<8x32xf32>
    %491 = arith.subf %483, %490 : vector<8x32xf32>
    %492 = arith.mulf %491, %491 : vector<8x32xf32>
    %cst_185 = arith.constant dense<0.000000e+00> : vector<8xf32>
    %493 = vector.multi_reduction <add>, %492, %cst_185 [1] : vector<8x32xf32> to vector<8xf32>
    %494 = vector.shape_cast %493 : vector<8xf32> to vector<8x1xf32>
    %cst_186 = arith.constant 3.200000e+01 : f32
    %495 = vector.broadcast %cst_186 : f32 to vector<8x1xf32>
    %496 = arith.divf %494, %495 : vector<8x1xf32>
    %cst_187 = arith.constant 9.99999974E-6 : f32
    %497 = vector.broadcast %cst_187 : f32 to vector<8x1xf32>
    %498 = arith.addf %496, %497 : vector<8x1xf32>
    %499 = math.rsqrt %498 : vector<8x1xf32>
    %500 = vector.broadcast %499 : vector<8x1xf32> to vector<8x32xf32>
    %501 = arith.mulf %491, %500 : vector<8x32xf32>
    %502 = vector.broadcast %484 : vector<1x32xf32> to vector<8x32xf32>
    %503 = arith.mulf %501, %502 : vector<8x32xf32>
    %504 = vector.broadcast %485 : vector<1x32xf32> to vector<8x32xf32>
    %505 = arith.addf %503, %504 : vector<8x32xf32>
    %cst_188 = arith.constant dense<0.000000e+00> : vector<8x128xf32>
    %506 = tpu.matmul %505, %12, %cst_188 {dimension_numbers = #tpu.dot_dimension_numbers<[1], [0], [0], [1], [0, 0, 1, 1], [], []>} : vector<8x32xf32>, vector<32x128xf32>, vector<8x128xf32> -> vector<8x128xf32>
    %507 = vector.broadcast %13 : vector<1x128xf32> to vector<8x128xf32>
    %508 = arith.addf %506, %507 : vector<8x128xf32>
    %cst_189 = arith.constant 5.000000e-01 : f32
    %509 = vector.broadcast %cst_189 : f32 to vector<8x128xf32>
    %510 = arith.mulf %509, %508 : vector<8x128xf32>
    %cst_190 = arith.constant 0.707106769 : f32
    %511 = vector.broadcast %cst_190 : f32 to vector<8x128xf32>
    %512 = arith.mulf %508, %511 : vector<8x128xf32>
    %513 = math.absf %512 : vector<8x128xf32>
    %cst_191 = arith.constant 0.327591091 : f32
    %514 = vector.broadcast %cst_191 : f32 to vector<8x128xf32>
    %515 = arith.mulf %514, %513 : vector<8x128xf32>
    %cst_192 = arith.constant 1.000000e+00 : f32
    %516 = vector.broadcast %cst_192 : f32 to vector<8x128xf32>
    %517 = arith.addf %516, %515 : vector<8x128xf32>
    %cst_193 = arith.constant 1.000000e+00 : f32
    %518 = vector.broadcast %cst_193 : f32 to vector<8x128xf32>
    %519 = arith.divf %518, %517 : vector<8x128xf32>
    %cst_194 = arith.constant 1.06140542 : f32
    %520 = vector.broadcast %cst_194 : f32 to vector<8x128xf32>
    %521 = arith.mulf %520, %519 : vector<8x128xf32>
    %cst_195 = arith.constant -1.45315206 : f32
    %522 = vector.broadcast %cst_195 : f32 to vector<8x128xf32>
    %523 = arith.addf %521, %522 : vector<8x128xf32>
    %524 = arith.mulf %523, %519 : vector<8x128xf32>
    %cst_196 = arith.constant 1.42141378 : f32
    %525 = vector.broadcast %cst_196 : f32 to vector<8x128xf32>
    %526 = arith.addf %524, %525 : vector<8x128xf32>
    %527 = arith.mulf %526, %519 : vector<8x128xf32>
    %cst_197 = arith.constant -0.284496725 : f32
    %528 = vector.broadcast %cst_197 : f32 to vector<8x128xf32>
    %529 = arith.addf %527, %528 : vector<8x128xf32>
    %530 = arith.mulf %529, %519 : vector<8x128xf32>
    %cst_198 = arith.constant 0.254829586 : f32
    %531 = vector.broadcast %cst_198 : f32 to vector<8x128xf32>
    %532 = arith.addf %530, %531 : vector<8x128xf32>
    %533 = arith.mulf %532, %519 : vector<8x128xf32>
    %cst_199 = arith.constant 0.000000e+00 : f32
    %534 = vector.broadcast %cst_199 : f32 to vector<8x128xf32>
    %535 = arith.subf %534, %513 : vector<8x128xf32>
    %536 = arith.mulf %535, %513 : vector<8x128xf32>
    %537 = math.exp %536 : vector<8x128xf32>
    %538 = arith.mulf %533, %537 : vector<8x128xf32>
    %cst_200 = arith.constant 1.000000e+00 : f32
    %539 = vector.broadcast %cst_200 : f32 to vector<8x128xf32>
    %540 = arith.subf %539, %538 : vector<8x128xf32>
    %cst_201 = arith.constant 0.000000e+00 : f32
    %541 = vector.broadcast %cst_201 : f32 to vector<8x128xf32>
    %542 = arith.cmpf oge, %512, %541 : vector<8x128xf32>
    %cst_202 = arith.constant 0.000000e+00 : f32
    %543 = vector.broadcast %cst_202 : f32 to vector<8x128xf32>
    %544 = arith.subf %543, %540 : vector<8x128xf32>
    %545 = arith.select %542, %540, %544 : vector<8x128xi1>, vector<8x128xf32>
    %cst_203 = arith.constant 1.000000e+00 : f32
    %546 = vector.broadcast %cst_203 : f32 to vector<8x128xf32>
    %547 = arith.addf %546, %545 : vector<8x128xf32>
    %548 = arith.mulf %510, %547 : vector<8x128xf32>
    %cst_204 = arith.constant dense<0.000000e+00> : vector<8x32xf32>
    %549 = tpu.matmul %548, %14, %cst_204 {dimension_numbers = #tpu.dot_dimension_numbers<[1], [0], [0], [1], [0, 0, 1, 1], [], []>} : vector<8x128xf32>, vector<128x32xf32>, vector<8x32xf32> -> vector<8x32xf32>
    %550 = vector.broadcast %15 : vector<1x32xf32> to vector<8x32xf32>
    %551 = arith.addf %549, %550 : vector<8x32xf32>
    %552 = arith.addf %505, %551 : vector<8x32xf32>
    %553 = vector.extract_strided_slice %16 {offsets = [2, 0], sizes = [1, 32], strides = [1, 1]} : vector<3x32xf32> to vector<1x32xf32>
    %554 = vector.extract_strided_slice %17 {offsets = [2, 0], sizes = [1, 32], strides = [1, 1]} : vector<3x32xf32> to vector<1x32xf32>
    %cst_205 = arith.constant dense<0.000000e+00> : vector<8xf32>
    %555 = vector.multi_reduction <add>, %552, %cst_205 [1] : vector<8x32xf32> to vector<8xf32>
    %556 = vector.shape_cast %555 : vector<8xf32> to vector<8x1xf32>
    %cst_206 = arith.constant 3.200000e+01 : f32
    %557 = vector.broadcast %cst_206 : f32 to vector<8x1xf32>
    %558 = arith.divf %556, %557 : vector<8x1xf32>
    %559 = vector.broadcast %558 : vector<8x1xf32> to vector<8x32xf32>
    %560 = arith.subf %552, %559 : vector<8x32xf32>
    %561 = arith.mulf %560, %560 : vector<8x32xf32>
    %cst_207 = arith.constant dense<0.000000e+00> : vector<8xf32>
    %562 = vector.multi_reduction <add>, %561, %cst_207 [1] : vector<8x32xf32> to vector<8xf32>
    %563 = vector.shape_cast %562 : vector<8xf32> to vector<8x1xf32>
    %cst_208 = arith.constant 3.200000e+01 : f32
    %564 = vector.broadcast %cst_208 : f32 to vector<8x1xf32>
    %565 = arith.divf %563, %564 : vector<8x1xf32>
    %cst_209 = arith.constant 9.99999974E-6 : f32
    %566 = vector.broadcast %cst_209 : f32 to vector<8x1xf32>
    %567 = arith.addf %565, %566 : vector<8x1xf32>
    %568 = math.rsqrt %567 : vector<8x1xf32>
    %569 = vector.broadcast %568 : vector<8x1xf32> to vector<8x32xf32>
    %570 = arith.mulf %560, %569 : vector<8x32xf32>
    %571 = vector.broadcast %553 : vector<1x32xf32> to vector<8x32xf32>
    %572 = arith.mulf %570, %571 : vector<8x32xf32>
    %573 = vector.broadcast %554 : vector<1x32xf32> to vector<8x32xf32>
    %574 = arith.addf %572, %573 : vector<8x32xf32>
    %c0_210 = arith.constant 0 : index
    %c1_211 = arith.constant 1 : index
    %c0_212 = arith.constant 0 : index
    %575 = vector.load %arg19[%c0_210, %c1_211, %c0_212] : memref<8x2x32xf32, #tpu.memory_space<vmem>>, vector<8x1x32xf32>
    %576 = vector.shape_cast %575 : vector<8x1x32xf32> to vector<8x32xf32>
    %577 = vector.shape_cast %574 : vector<8x32xf32> to vector<8x1x32xf32>
    tpu.vector_store %arg19[%c0_210, %c1_211, %c0_212], %577 {strides = array<i32>} : memref<8x2x32xf32, #tpu.memory_space<vmem>>, vector<8x1x32xf32>,
    return
  }
  func.func @transform_0(%arg0: i32) -> (i32, i32, i32) {
    %c0_i32 = arith.constant 0 : i32
    %c0_i32_0 = arith.constant 0 : i32
    %c0_i32_1 = arith.constant 0 : i32
    %c0_i32_2 = arith.constant 0 : i32
    return %c0_i32, %c0_i32_0, %c0_i32_1 : i32, i32, i32
  }
  func.func @transform_1(%arg0: i32) -> (i32, i32, i32) {
    %c0_i32 = arith.constant 0 : i32
    %c0_i32_0 = arith.constant 0 : i32
    %c0_i32_1 = arith.constant 0 : i32
    %c0_i32_2 = arith.constant 0 : i32
    return %c0_i32, %c0_i32_0, %c0_i32_1 : i32, i32, i32
  }
  func.func @transform_2(%arg0: i32) -> (i32, i32) {
    %c0_i32 = arith.constant 0 : i32
    %c0_i32_0 = arith.constant 0 : i32
    %c0_i32_1 = arith.constant 0 : i32
    return %c0_i32, %c0_i32_0 : i32, i32
  }
  func.func @transform_3(%arg0: i32) -> (i32, i32) {
    %c0_i32 = arith.constant 0 : i32
    %c0_i32_0 = arith.constant 0 : i32
    %c0_i32_1 = arith.constant 0 : i32
    return %c0_i32, %c0_i32_0 : i32, i32
  }
  func.func @transform_4(%arg0: i32) -> (i32, i32) {
    %c0_i32 = arith.constant 0 : i32
    %c0_i32_0 = arith.constant 0 : i32
    %c0_i32_1 = arith.constant 0 : i32
    return %c0_i32, %c0_i32_0 : i32, i32
  }
  func.func @transform_5(%arg0: i32) -> (i32, i32) {
    %c0_i32 = arith.constant 0 : i32
    %c0_i32_0 = arith.constant 0 : i32
    %c0_i32_1 = arith.constant 0 : i32
    return %c0_i32, %c0_i32_0 : i32, i32
  }
  func.func @transform_6(%arg0: i32) -> (i32, i32) {
    %c0_i32 = arith.constant 0 : i32
    %c0_i32_0 = arith.constant 0 : i32
    %c0_i32_1 = arith.constant 0 : i32
    return %c0_i32, %c0_i32_0 : i32, i32
  }
  func.func @transform_7(%arg0: i32) -> (i32, i32) {
    %c0_i32 = arith.constant 0 : i32
    %c0_i32_0 = arith.constant 0 : i32
    %c0_i32_1 = arith.constant 0 : i32
    return %c0_i32, %c0_i32_0 : i32, i32
  }
  func.func @transform_8(%arg0: i32) -> (i32, i32) {
    %c0_i32 = arith.constant 0 : i32
    %c0_i32_0 = arith.constant 0 : i32
    %c0_i32_1 = arith.constant 0 : i32
    return %c0_i32, %c0_i32_0 : i32, i32
  }
  func.func @transform_9(%arg0: i32) -> (i32, i32) {
    %c0_i32 = arith.constant 0 : i32
    %c0_i32_0 = arith.constant 0 : i32
    %c0_i32_1 = arith.constant 0 : i32
    return %c0_i32, %c0_i32_0 : i32, i32
  }
  func.func @transform_10(%arg0: i32) -> (i32, i32) {
    %c0_i32 = arith.constant 0 : i32
    %c0_i32_0 = arith.constant 0 : i32
    %c0_i32_1 = arith.constant 0 : i32
    return %c0_i32, %c0_i32_0 : i32, i32
  }
  func.func @transform_11(%arg0: i32) -> (i32, i32) {
    %c0_i32 = arith.constant 0 : i32
    %c0_i32_0 = arith.constant 0 : i32
    %c0_i32_1 = arith.constant 0 : i32
    return %c0_i32, %c0_i32_0 : i32, i32
  }
  func.func @transform_12(%arg0: i32) -> (i32, i32) {
    %c0_i32 = arith.constant 0 : i32
    %c0_i32_0 = arith.constant 0 : i32
    %c0_i32_1 = arith.constant 0 : i32
    return %c0_i32, %c0_i32_0 : i32, i32
  }
  func.func @transform_13(%arg0: i32) -> (i32, i32) {
    %c0_i32 = arith.constant 0 : i32
    %c0_i32_0 = arith.constant 0 : i32
    %c0_i32_1 = arith.constant 0 : i32
    return %c0_i32, %c0_i32_0 : i32, i32
  }
  func.func @transform_14(%arg0: i32) -> (i32, i32) {
    %c0_i32 = arith.constant 0 : i32
    %c0_i32_0 = arith.constant 0 : i32
    %c0_i32_1 = arith.constant 0 : i32
    return %c0_i32, %c0_i32_0 : i32, i32
  }
  func.func @transform_15(%arg0: i32) -> (i32, i32) {
    %c0_i32 = arith.constant 0 : i32
    %c0_i32_0 = arith.constant 0 : i32
    %c0_i32_1 = arith.constant 0 : i32
    return %c0_i32, %c0_i32_0 : i32, i32
  }
  func.func @transform_16(%arg0: i32) -> (i32, i32) {
    %c0_i32 = arith.constant 0 : i32
    %c0_i32_0 = arith.constant 0 : i32
    %c0_i32_1 = arith.constant 0 : i32
    return %c0_i32, %c0_i32_0 : i32, i32
  }
  func.func @transform_17(%arg0: i32) -> (i32, i32) {
    %c0_i32 = arith.constant 0 : i32
    %c0_i32_0 = arith.constant 0 : i32
    %c0_i32_1 = arith.constant 0 : i32
    return %c0_i32, %c0_i32_0 : i32, i32
  }
  func.func @transform_18(%arg0: i32) -> (i32, i32, i32) {
    %c0_i32 = arith.constant 0 : i32
    %c0_i32_0 = arith.constant 0 : i32
    %c0_i32_1 = arith.constant 0 : i32
    %c0_i32_2 = arith.constant 0 : i32
    return %c0_i32, %c0_i32_0, %c0_i32_1 : i32, i32, i32
  }
  func.func @transform_19(%arg0: i32) -> (i32, i32, i32, i32) {
    %c0_i32 = arith.constant 0 : i32
    %c0_i32_0 = arith.constant 0 : i32
    %c0_i32_1 = arith.constant 0 : i32
    %c0_i32_2 = arith.constant 0 : i32
    %c0_i32_3 = arith.constant 0 : i32
    return %c0_i32, %c0_i32_0, %c0_i32_1, %c0_i32_2 : i32, i32, i32, i32
  }
}

</mosaic_0001>

<bundles_post_ra>
// kernel: tpu_custom_call.1
= control target key start
LH: loop header
LB: loop body
LE: loop exit
PB: predicated region body
PF: predicated region fallthrough
CT: control target
= control target key end

     0   :  { %s8125_s0 = inlined_call_operand.hbm [shape: f32[8,2,32], index: 0, kind: input, shape index: {}]   ;;  %s8126_s1 = inlined_call_operand.vmem [shape: f32[16,2,32], index: 1, kind: input, shape index: {}]   ;;  %s8127_s2 = inlined_call_operand.vmem [shape: f32[32,96], index: 2, kind: input, shape index: {}]   ;;  %s8128_s3 = inlined_call_operand.vmem [shape: f32[1,96], index: 3, kind: input, shape index: {}]   ;;  %s8129_s4 = inlined_call_operand.vmem [shape: f32[32,32], index: 4, kind: input, shape index: {}]   ;;  %s8130_s5 = inlined_call_operand.vmem [shape: f32[1,32], index: 5, kind: input, shape index: {}]   ;;  %s8131_s6 = inlined_call_operand.vmem [shape: f32[32,32], index: 6, kind: input, shape index: {}]   ;;  %s8132_s7 = inlined_call_operand.vmem [shape: f32[1,32], index: 7, kind: input, shape index: {}]   ;;  %s8133_s8 = inlined_call_operand.vmem [shape: f32[32,64], index: 8, kind: input, shape index: {}]   ;;  %s8134_s9 = inlined_call_operand.vmem [shape: f32[1,64], index: 9, kind: input, shape index: {}]   ;;  %s8135_s10 = inlined_call_operand.hbm [shape: f32[32,32], index: 10, kind: input, shape index: {}]   ;;  %s8136_s11 = inlined_call_operand.vmem [shape: f32[1,32], index: 11, kind: input, shape index: {}]   ;;  %s8137_s12 = inlined_call_operand.hbm [shape: f32[32,128], index: 12, kind: input, shape index: {}]   ;;  %s8138_s13 = inlined_call_operand.vmem [shape: f32[1,128], index: 13, kind: input, shape index: {}]   ;;  %s8139_s14 = inlined_call_operand.vmem [shape: f32[128,32], index: 14, kind: input, shape index: {}]   ;;  %s8140_s15 = inlined_call_operand.vmem [shape: f32[1,32], index: 15, kind: input, shape index: {}]   ;;  %s8141_s16 = inlined_call_operand.vmem [shape: f32[3,32], index: 16, kind: input, shape index: {}]   ;;  %s8142_s17 = inlined_call_operand.vmem [shape: f32[3,32], index: 17, kind: input, shape index: {}]   ;;  %s8143_s18 = inlined_call_operand.hbm [shape: f32[8,2,32], index: 18, kind: output, shape index: {0}]   ;;  %s8144_s19 = inlined_call_operand.hbm [shape: f32[2,4,8,8], index: 19, kind: output, shape index: {1}]  }
   0x1   :  { %8171 = sst [smem:[#allocation16_spill]] %s8125_s0 }
   0x2   :  { %8172 = sst [smem:[#allocation17_spill]] %s8126_s1 }
   0x3   :  { %8173 = sst [smem:[#allocation18_spill]] %s8127_s2 }
   0x4   :  { %8174 = sst [smem:[#allocation19_spill]] %s8128_s3 }
   0x5   :  { %8175 = sst [smem:[#allocation20_spill]] %s8143_s18 }
   0x6   :  { %25 = vsyncpa [#allocation3], 0 }
   0x7   :  { %26 = vsyncpa [#allocation6], 0 }
   0x8   :  { %27 = vsyncpa [#allocation4], 0 }
   0x9   :  { %28 = vsyncpa [#allocation10], 0  ;;  %s6459_s0 = smov [#allocation5]   ;;  %s6341_s1 = scalar_lea.hbm %s8135_s10, 512 }
   0xa   :  { %s64_s30 = sshll.u32 %s6459_s0, 4  ;;  %p6342_p0 = scmp.ne.s32.totalorder %s8135_s10, %s6341_s1  ;;  %s65_s30 = int_to_ptr.vmem [resolvable:$true] %s64_s30 }
   0xb   :  { %p6345_p1 = scmp.lt.u32.totalorder %s6341_s1, %s8135_s10 }
   0xd   :  { %p6347_p2 = pnand %p6345_p1, %p6342_p0 }
   0xf   :  { %6350 = shalt.err (!%p6347_p2)
}
  0x10   :  { %s6351_s25 = scalar_lea.vmem %s65_s30, 512  ;;  %p6356_p4 = scmp.lt.s32.totalorder %s65_s30, %s65_s30 }
  0x11   :  { %p6352_p3 = scmp.ne.s32.totalorder %s65_s30, %s6351_s25  ;;  %p6357_p5 = scmp.lt.s32.totalorder %s6351_s25, %s6351_s25 }
  0x13   :  { %p6358_p6 = por %p6357_p5, %p6356_p4 }
  0x15   :  { %p6359_p7 = pnand %p6358_p6, %p6352_p3 }
  0x17   :  { %6362 = shalt.err (!%p6359_p7)
}
  0x18   :  { %s8150_s3 = smov 128   ;;  %s8164_s26 = smov 8  }
  0x19   :  { %70 = dma.hbm_to_vmem [thread:$0]  %s8135_s10, 512, %s65_s30, [#allocation6], %s8150_s3, %s8150_s3, %s8164_s26  }
  0x1a   :  { %s6462_s29 = smov [#allocation2]   ;;  %s8176_s1 = sld [smem:[#allocation16_spill]] }
  0x1b   :  { %s34_s0 = sshll.u32 %s6462_s29, 4  ;;  %s35_s0 = int_to_ptr.vmem [resolvable:$true] %s34_s0 }
  0x20   :  { %s6363_s22 = scalar_lea.hbm %s8176_s1, 256 }
  0x21   :  { %p6364_p8 = scmp.ne.s32.totalorder %s8176_s1, %s6363_s22  ;;  %p6367_p9 = scmp.lt.u32.totalorder %s6363_s22, %s8176_s1 }
  0x23   :  { %p6369_p10 = pnand %p6367_p9, %p6364_p8 }
  0x25   :  { %6372 = shalt.err (!%p6369_p10)
}
  0x26   :  { %s6373_s18 = scalar_lea.vmem %s35_s0, 256  ;;  %p6378_p12 = scmp.lt.s32.totalorder %s35_s0, %s35_s0 }
  0x27   :  { %p6374_p11 = scmp.ne.s32.totalorder %s35_s0, %s6373_s18  ;;  %p6379_p13 = scmp.lt.s32.totalorder %s6373_s18, %s6373_s18 }
  0x29   :  { %p6380_p0 = por %p6379_p13, %p6378_p12 }
  0x2b   :  { %p6381_p1 = pnand %p6380_p0, %p6374_p11 }
  0x2d   :  { %6384 = shalt.err (!%p6381_p1)
}
  0x2e   :  { %s8152_s10 = smov 32   ;;  %s8153_s30 = smov 2  }
  0x2f   :  { %40 = dma.hbm_to_vmem [thread:$0]  %s8176_s1, 256, %s35_s0, [#allocation3], %s8152_s10, %s8152_s10, %s8153_s30  }
  0x30   :  { %s6465_s29 = smov [#allocation7]   ;;  %s6385_s2 = scalar_lea.hbm %s8137_s12, 512 }
  0x31   :  { %s78_s20 = sshll.u32 %s6465_s29, 4  ;;  %p6386_p2 = scmp.ne.s32.totalorder %s8137_s12, %s6385_s2  ;;  %s79_s20 = int_to_ptr.vmem [resolvable:$true] %s78_s20 }
  0x32   :  { %p6389_p3 = scmp.lt.u32.totalorder %s6385_s2, %s8137_s12 }
  0x34   :  { %p6391_p4 = pnand %p6389_p3, %p6386_p2 }
  0x36   :  { %6394 = shalt.err (!%p6391_p4)
}
  0x37   :  { %s6395_s3 = scalar_lea.vmem %s79_s20, 512  ;;  %p6400_p6 = scmp.lt.s32.totalorder %s79_s20, %s79_s20 }
  0x38   :  { %p6396_p5 = scmp.ne.s32.totalorder %s79_s20, %s6395_s3  ;;  %p6401_p7 = scmp.lt.s32.totalorder %s6395_s3, %s6395_s3 }
  0x3a   :  { %p6402_p8 = por %p6401_p7, %p6400_p6 }
  0x3c   :  { %p6403_p9 = pnand %p6402_p8, %p6396_p5 }
  0x3e   :  { %6406 = shalt.err (!%p6403_p9)
}
  0x3f   :  { %s8177_s0 = smov 128  }
  0x40   :  { %84 = dma.hbm_to_vmem [thread:$0]  %s8137_s12, 512, %s79_s20, [#allocation6], %s8177_s0, %s8177_s0, %s8164_s26  }
  0x41   :  { %6451 = dma.done.wait [#allocation3], 256  }
  0x42   :  { %6452 = vsyncadd [#allocation3], 4294967040 }
  0x43   :  { %6453 = dma.done.wait [#allocation6], 1024  }
  0x44   :  { %6454 = vsyncadd [#allocation6], 4294966272  ;;  %v8166_v0 = vmov 0.0|0.0   ;;  %vm6467_vm0 = vmmov 0   ;;  %v8168_v1 = vmov 0.0   ;;  %s8178_s12 = sld [smem:[#allocation18_spill]] }
  0x45   :  { %5944 = vmatprep.subr.bf16.mxu1 %v8166_v0  ;;  %5558 = vmatprep.mubr.msk.f32.mxu1 %vm6467_vm0, %v8168_v1  ;;  %v6649_v7 = vld [vmem:[#allocation2 + $0x2] sm:$0x3]  ;;  %v6651_v8 = vld [vmem:[#allocation2 + $0x4] sm:$0x3]  ;;  %v6653_v9 = vld [vmem:[#allocation2 + $0x6] sm:$0x3] }
  0x46   :  { %5571 = vmatprep.subr.mxu0 %v8168_v1  ;;  %5573 = vmatprep.mubr.msk.f32.mxu0 %vm6467_vm0, %v8168_v1  ;;  %v6655_v10 = vld [vmem:[#allocation2 + $0x8] sm:$0x3]  ;;  %v6660_v12 = vld [vmem:[#allocation2] sm:$0x3]  ;;  %v6662_v13 = vld [vmem:[#allocation2 + $0xa] sm:$0x3] }
  0x47   :  { %vm192_vm1 = vcmask 1041409   ;;  %v6665_v14 = vld [vmem:[#allocation2 + $0xc] sm:$0x3]  ;;  %v191_v15 = vrot.slane %v6649_v7, 7  ;;  %v194_v16 = vrot.slane %v6651_v8, 6  ;;  %vm195_vm2 = vcmask 1042434  }
  0x48   :  { %v197_v17 = vrot.slane %v6653_v9, 5  ;;  %v6670_v18 = vld [vmem:[#allocation2 + $0xe] sm:$0x3]  ;;  %vm198_vm3 = vcmask 1043459   ;;  %v200_v19 = vrot.slane %v6655_v10, 4  ;;  %vm201_vm4 = vcmask 1044484  }
  0x49   :  { %v193_v20 = vsel %vm192_vm1, %v191_v15, %v6660_v12  ;;  %v203_v21 = vrot.slane %v6662_v13, 3  ;;  %vm204_vm5 = vcmask 1045509   ;;  %v206_v23 = vrot.slane %v6665_v14, 2  ;;  %s8179_s25 = sld [smem:[#allocation19_spill]]  ;;  %s6469_s1 = smov 96  }
  0x4a   :  { %v128_v2 = vld [vmem:[%s8178_s12] sm:$0xff]  ;;  %v129_v3 = vld [vmem:[%s8178_s12 + $0x8] sm:$0xff]  ;;  %v130_v4 = vld [vmem:[%s8178_s12 + $0x10] sm:$0xff]  ;;  %v196_v22 = vsel %vm195_vm2, %v194_v16, %v193_v20  ;;  %vm207_vm6 = vcmask 1046534   ;;  %v209_v25 = vrot.slane %v6670_v18, 1  ;;  %vm210_vm7 = vcmask 1047559  }
  0x4b   :  { %v6644_v5 = vpack.c.bf16 %v129_v3, %v128_v2  ;;  %v131_v6 = vld [vmem:[%s8178_s12 + $0x18] sm:$0xff]  ;;  %v199_v24 = vsel %vm198_vm3, %v197_v17, %v196_v22  ;;  %vm212_vm8 = vcmask 261120   ;;  %s6470_s27 = smov 120   ;;  %s6471_s3 = smov 88   ;;  %vm289_vm9 = vcmask 64512  }
  0x4c   :  { %v6658_v11 = vpack.c.bf16 %v131_v6, %v130_v4  ;;  %v202_v26 = vsel %vm201_vm4, %v200_v19, %v199_v24  ;;  %s6472_s28 = smov 80   ;;  %s6473_s12 = smov 112   ;;  %vm960_vm10 = vcmask 130048   ;;  %vm962_vm11 = vcmask 195584   ;;  %vm7036_vm12 = vmpackc.low %vm289_vm9, %vm289_vm9 }
  0x4d   :  { %5946 = vmatpush3.bf16.msra.mxu1 %v6644_v5  ;;  %v205_v27 = vsel %vm204_vm5, %v203_v21, %v202_v26  ;;  %s8160_s29 = smov 72   ;;  %s6475_s20 = smov 104   ;;  %vm2743_vm14 = vcmask 253952   ;;  %vm3642_vm15 = vcmask 261121  }
  0x4e   :  { %5947 = vmatprep.subr.bf16.mxu1 %v8166_v0  ;;  %v208_v28 = vsel %vm207_vm6, %v206_v23, %v205_v27  ;;  %s8156_s21 = smov 56   ;;  %s8157_s22 = smov 64  }
  0x4f   :  { %v211_v29 = vsel %vm210_vm7, %v209_v25, %v208_v28  ;;  %v5297_v30 = vld [vmem:[%s8179_s25] ss:$0 sm:$0xff]  ;;  %s8155_s2 = smov 48   ;;  %s8154_s18 = smov 40  }
  0x50   :  { %s8162_s10 = smov 16   ;;  %s8158_s30 = smov 24  }
  0x51   :  { %5949 = vmatpush3.bf16.msra.mxu1 %v6658_v11  ;;  %s8184_s23 = smov 8   ;;  %s8185_s24 = smov 16  }
  0x52   :  { %5561 = vmatprep.subr.mxu1 %v8168_v1 }
  0x54   :  { %5559 = vmatmul.mubr.msk.f32.vlgmr.msra.gmra.mrb[0].mxu1 %vm212_vm8, %v211_v29 }
  0x55   :  { %5563 = vmatprep.mubr.msk.f32.mxu1 %vm6467_vm0, %v8168_v1 }
 0x127   :  { %v281_v31 = vpop.f32.mrb[0].mxu1 }
 0x128   :  { %v6692_v32 = vadd.f32 %v5297_v30, %v281_v31  ;;  %v5560_v33 = vpop.f32.mrb[1].mxu1 }
 0x12a   :  { %287 = vrot.lane.b32.xlu0 %v6692_v32, %s6469_s1  ;;  %v285_v34 = vmul.f32 0.35355338, %v6692_v32 }
 0x12c   :  { %452 = vrot.lane.b32.xlu1 %v285_v34, %s6470_s27 }
 0x12e   :  { %454 = vrot.lane.b32.xlu0 %v6692_v32, %s6471_s3 }
 0x130   :  { %619 = vrot.lane.b32.xlu1 %v6692_v32, %s6472_s28 }
 0x132   :  { %617 = vrot.lane.b32.xlu0 %v285_v34, %s6473_s12 }
 0x134   :  { %784 = vrot.lane.b32.xlu1 %v6692_v32, %s8160_s29 }
 0x136   :  { %782 = vrot.lane.b32.xlu0 %v285_v34, %s6475_s20 }
 0x19c   :  { %v288_v35 = vpop.permute.xlu0 %287 }
 0x19d   :  { %5562 = vmatpush3.xpose.msk.msra.mxu1 %vm289_vm9, %v288_v35 }
 0x19e   :  { %v453_v36 = vpop.permute.xlu1 %452  ;;  %5566 = vmatprep.subr.mxu1 %v8168_v1 }
 0x1a0   :  { %v455_v37 = vpop.permute.xlu0 %454  ;;  %5564 = vmatmul.mubr.msk.f32.vlgmr.msra.gmra.mrb[2].mxu1 %vm289_vm9, %v285_v34 }
 0x1a1   :  { %5572 = vmatpush3.xpose.msk.msra.mxu0 %vm289_vm9, %v455_v37  ;;  %5568 = vmatprep.mubr.msk.f32.mxu1 %vm6467_vm0, %v8168_v1 }
 0x1a2   :  { %v620_v38 = vpop.permute.xlu1 %619  ;;  %5581 = vmatprep.subr.mxu0 %v8168_v1 }
 0x1a4   :  { %5574 = vmatmul.mubr.msk.f32.vlgmr.msra.gmra.mrb[0].mxu0 %vm289_vm9, %v453_v36  ;;  %v618_v39 = vpop.permute.xlu0 %617 }
 0x1a5   :  { %5582 = vmatpush3.xpose.msk.msra.mxu0 %vm289_vm9, %v620_v38  ;;  %5583 = vmatprep.mubr.msk.f32.mxu0 %vm6467_vm0, %v8168_v1  ;;  %v133_v38 = vld [vmem:[%s8129_s4] sm:$0xff] }
 0x1a6   :  { %5591 = vmatprep.subr.mxu0 %v8168_v1  ;;  %v785_v40 = vpop.permute.xlu1 %784 }
 0x1a8   :  { %5584 = vmatmul.mubr.msk.f32.vlgmr.msra.gmra.mrb[2].mxu0 %vm289_vm9, %v618_v39  ;;  %v783_v41 = vpop.permute.xlu0 %782  ;;  %v134_v39 = vld [vmem:[%s8129_s4 + $0x8] sm:$0xff] }
 0x1a9   :  { %5592 = vmatpush3.xpose.msk.msra.mxu0 %vm289_vm9, %v785_v40  ;;  %5593 = vmatprep.mubr.msk.f32.mxu0 %vm6467_vm0, %v8168_v1  ;;  %v6765_v40 = vpack.c.bf16 %v134_v39, %v133_v38 }
 0x1ac   :  { %5594 = vmatmul.mubr.msk.f32.vlgmr.msra.gmra.mrb[4].mxu0 %vm289_vm9, %v783_v41 }
 0x273   :  { %v361_v42 = vpop.f32.mrb[2].mxu1 }
 0x274   :  { %v5565_v43 = vpop.f32.mrb[3].mxu1  ;;  %v365_v44 = vsel %vm289_vm9, %v361_v42, -inf }
 0x275   :  { %366 = vmax.xlane.f32.xlu1 %v365_v44 }
 0x277   :  { %v526_v45 = vpop.f32.mrb[0].mxu0 }
 0x278   :  { %v5575_v46 = vpop.f32.mrb[1].mxu0  ;;  %v530_v47 = vsel %vm289_vm9, %v526_v45, -inf }
 0x279   :  { %531 = vmax.xlane.f32.xlu0 %v530_v47  ;;  %v136_v46 = vld [vmem:[%s8129_s4 + $0x18] sm:$0xff] }
 0x27b   :  { %v691_v48 = vpop.f32.mrb[2].mxu0 }
 0x27c   :  { %v5585_v49 = vpop.f32.mrb[3].mxu0  ;;  %v695_v50 = vsel %vm289_vm9, %v691_v48, -inf }
 0x27d   :  { %696 = vmax.xlane.f32.xlu0 %v695_v50 }
 0x27f   :  { %v856_v51 = vpop.f32.mrb[4].mxu0 }
 0x280   :  { %v5595_v52 = vpop.f32.mrb[5].mxu0  ;;  %v860_v53 = vsel %vm289_vm9, %v856_v51, -inf }
 0x281   :  { %861 = vmax.xlane.f32.xlu1 %v860_v53 }
 0x292   :  { %541 = vrot.lane.b32.xlu1 %v6692_v32, %s8156_s21  ;;  %s8187_s21 = smov 24  }
 0x302   :  { %v367_v54 = vpop.xlane.xlu1 %366 }
 0x303   :  { %v368_v55 = vsub.f32 %v361_v42, %v367_v54 }
 0x305   :  { %v369_v56 = vmul.f32 1.442695, %v368_v55 }
 0x306   :  { %v532_v57 = vpop.xlane.xlu0 %531 }
 0x307   :  { %6219 = vpow2.f32 %v369_v56  ;;  %v533_v58 = vsub.f32 %v526_v45, %v532_v57  ;;  %v135_v45 = vld [vmem:[%s8129_s4 + $0x10] sm:$0xff]  ;;  %s8186_s4 = smov 72  }
 0x308   :  { %v6776_v47 = vpack.c.bf16 %v136_v46, %v135_v45 }
 0x309   :  { %v534_v59 = vmul.f32 1.442695, %v533_v58  ;;  %v5311_v58 = vld [vmem:[%s8130_s5] ss:$0 sm:$0xff] }
 0x30a   :  { %v697_v16 = vpop.xlane.xlu0 %696 }
 0x30b   :  { %6221 = vpow2.f32 %v534_v59  ;;  %v698_v17 = vsub.f32 %v691_v48, %v697_v16 }
 0x30d   :  { %v699_v19 = vmul.f32 1.442695, %v698_v17 }
 0x30e   :  { %v862_v60 = vpop.xlane.xlu1 %861 }
 0x30f   :  { %v863_v61 = vsub.f32 %v856_v51, %v862_v60 }
 0x311   :  { %v6220_v62 = vpop.eup %6219  ;;  %v864_v63 = vmul.f32 1.442695, %v863_v61 }
 0x312   :  { %v371_v2 = vsel %vm289_vm9, %v6220_v62, 0.0  ;;  %v542_v22 = vpop.permute.xlu1 %541 }
 0x313   :  { %6223 = vpow2.f32 %v864_v63  ;;  %372 = vadd.xlane.f32.xlu0 %v371_v2 }
 0x314   :  { %6225 = vpow2.f32 %v699_v19 }
 0x315   :  { %v6222_v3 = vpop.eup %6221 }
 0x316   :  { %v536_v4 = vsel %vm289_vm9, %v6222_v3, 0.0 }
 0x317   :  { %537 = vadd.xlane.f32.xlu1 %v536_v4 }
 0x31d   :  { %v6224_v6 = vpop.eup %6223 }
 0x31e   :  { %v866_v15 = vsel %vm289_vm9, %v6224_v6, 0.0  ;;  %v6226_v20 = vpop.eup %6225 }
 0x31f   :  { %867 = vadd.xlane.f32.xlu1 %v866_v15  ;;  %v701_v21 = vsel %vm289_vm9, %v6226_v20, 0.0 }
 0x329   :  { %376 = vrot.lane.b32.xlu0 %v6692_v32, %s8157_s22 }
 0x330   :  { %706 = vrot.lane.b32.xlu1 %v6692_v32, %s8155_s2 }
 0x348   :  { %702 = vadd.xlane.f32.xlu0 %v701_v21 }
 0x35e   :  { %871 = vrot.lane.b32.xlu0 %v6692_v32, %s8154_s18  ;;  %s8193_s18 = smov 40  }
 0x3a0   :  { %v373_v23 = vpop.xlane.xlu0 %372 }
 0x3a1   :  { %6227 = vrcp.f32 %v373_v23 }
 0x3a4   :  { %v377_v24 = vpop.permute.xlu0 %376  ;;  %v538_v25 = vpop.xlane.xlu1 %537 }
 0x3a5   :  { %6229 = vrcp.f32 %v538_v25  ;;  %5567 = vmatpush3.msra.mxu1 %v377_v24 }
 0x3a6   :  { %5576 = vmatprep.subr.mxu1 %v8168_v1 }
 0x3ab   :  { %v6228_v26 = vpop.eup %6227 }
 0x3ac   :  { %v375_v27 = vmul.f32 %v6228_v26, %v6220_v62  ;;  %v868_v28 = vpop.xlane.xlu1 %867 }
 0x3ad   :  { %6231 = vrcp.f32 %v868_v28 }
 0x3ae   :  { %964 = vst.msk [vmem:[#allocation9] sm:$0xff] %vm289_vm9, %v375_v27  ;;  %5569 = vmatmul.mubr.msk.f32.vlgmr.msra.gmra.mrb[4].mxu1 %vm289_vm9, %v375_v27 }
 0x3af   :  { %v6230_v29 = vpop.eup %6229  ;;  %5577 = vmatpush3.msra.mxu1 %v542_v22  ;;  %5578 = vmatprep.mubr.msk.f32.mxu1 %vm6467_vm0, %v8168_v1 }
 0x3b0   :  { %v540_v30 = vmul.f32 %v6230_v29, %v6222_v3  ;;  %v707_v31 = vpop.permute.xlu1 %706  ;;  %5586 = vmatprep.subr.mxu1 %v8168_v1 }
 0x3b2   :  { %966 = vst.msk [vmem:[#allocation9 + $0x8] sm:$0xff] %vm289_vm9, %v540_v30  ;;  %5579 = vmatmul.mubr.msk.f32.vlgmr.msra.gmra.mrb[6].mxu1 %vm289_vm9, %v540_v30 }
 0x3b3   :  { %5587 = vmatpush3.msra.mxu1 %v707_v31  ;;  %5588 = vmatprep.mubr.msk.f32.mxu1 %vm6467_vm0, %v8168_v1 }
 0x3b4   :  { %5596 = vmatprep.subr.mxu1 %v8168_v1 }
 0x3b7   :  { %v6232_v32 = vpop.eup %6231 }
 0x3b8   :  { %v870_v33 = vmul.f32 %v6232_v32, %v6224_v6 }
 0x3ba   :  { %970 = vst.msk [vmem:[#allocation9 + $0x18] sm:$0xff] %vm289_vm9, %v870_v33 }
 0x3d5   :  { %v703_v34 = vpop.xlane.xlu0 %702 }
 0x3d6   :  { %6233 = vrcp.f32 %v703_v34 }
 0x3d9   :  { %v872_v37 = vpop.permute.xlu0 %871 }
 0x3e0   :  { %v6234_v35 = vpop.eup %6233 }
 0x3e1   :  { %v705_v36 = vmul.f32 %v6234_v35, %v6226_v20 }
 0x3e3   :  { %968 = vst.msk [vmem:[#allocation9 + $0x10] sm:$0xff] %vm289_vm9, %v705_v36  ;;  %5589 = vmatmul.mubr.msk.f32.vlgmr.msra.gmra.mrb[8].mxu1 %vm289_vm9, %v705_v36 }
 0x3e4   :  { %5597 = vmatpush3.msra.mxu1 %v872_v37  ;;  %5598 = vmatprep.mubr.msk.f32.mxu1 %vm6467_vm0, %v8168_v1 }
 0x3e5   :  { %5950 = vmatprep.subr.bf16.mxu1 %v8166_v0 }
 0x3e7   :  { %5599 = vmatmul.mubr.msk.f32.vlgmr.msra.gmra.mrb[10].mxu1 %vm289_vm9, %v870_v33 }
 0x3e8   :  { %5609 = vmatprep.mubr.msk.f32.mxu1 %vm6467_vm0, %v8168_v1  ;;  %5952 = vmatpush3.bf16.msra.mxu1 %v6765_v40 }
 0x3e9   :  { %5953 = vmatprep.subr.bf16.mxu1 %v8166_v0 }
 0x3ec   :  { %5955 = vmatpush3.bf16.msra.mxu1 %v6776_v47 }
 0x3ed   :  { %5956 = vmatprep.subr.bf16.mxu1 %v8166_v0 }
 0x481   :  { %v448_v41 = vpop.f32.mrb[4].mxu1 }
 0x482   :  { %v5570_v42 = vpop.f32.mrb[5].mxu1 }
 0x485   :  { %v613_v43 = vpop.f32.mrb[6].mxu1 }
 0x486   :  { %948 = vrot.lane.b32.xlu1 %v613_v43, %s8164_s26  ;;  %v5580_v44 = vpop.f32.mrb[7].mxu1  ;;  %s8180_s26 = sld [smem:[#allocation17_spill]] }
 0x4b6   :  { %v778_v48 = vpop.f32.mrb[8].mxu1 }
 0x4b7   :  { %952 = vrot.lane.b32.xlu0 %v778_v48, %s8162_s10  ;;  %v5590_v49 = vpop.f32.mrb[9].mxu1  ;;  %s8190_s10 = smov 56  }
 0x4ba   :  { %v943_v50 = vpop.f32.mrb[10].mxu1 }
 0x4bb   :  { %956 = vrot.lane.b32.xlu1 %v943_v50, %s8158_s30  ;;  %v5600_v51 = vpop.f32.mrb[11].mxu1  ;;  %s8192_s30 = smov 48  }
 0x4f8   :  { %v949_v52 = vpop.permute.xlu1 %948 }
 0x4f9   :  { %v959_v54 = vsel %vm289_vm9, %v448_v41, %v949_v52 }
 0x529   :  { %v953_v53 = vpop.permute.xlu0 %952 }
 0x52a   :  { %v961_v55 = vsel %vm960_vm10, %v959_v54, %v953_v53 }
 0x52d   :  { %v957_v56 = vpop.permute.xlu1 %956 }
 0x52e   :  { %v963_v57 = vsel %vm962_vm11, %v961_v55, %v957_v56 }
 0x52f   :  { %5610 = vmatmul.mubr.msk.f32.vlgmr.msra.gmra.mrb[12].mxu1 %vm212_vm8, %v963_v57 }
 0x530   :  { %5620 = vmatprep.mubr.msk.f32.mxu1 %vm6467_vm0, %v8168_v1 }
 0x602   :  { %v1046_v59 = vpop.f32.mrb[12].mxu1 }
 0x603   :  { %v1047_v60 = vadd.f32 %v5311_v58, %v1046_v59  ;;  %v5611_v61 = vpop.f32.mrb[13].mxu1 }
 0x605   :  { %v1051_v62 = vrot.slane %v1047_v60, 1  ;;  %v1052_v63 = vrot.slane %v1047_v60, 2  ;;  %v1053_v2 = vrot.slane %v1047_v60, 3  ;;  %v1054_v3 = vrot.slane %v1047_v60, 4 }
 0x606   :  { %v1055_v4 = vrot.slane %v1047_v60, 5  ;;  %v1056_v6 = vrot.slane %v1047_v60, 6  ;;  %v1057_v15 = vrot.slane %v1047_v60, 7  ;;  %v1066_v21 = vadd.f32 %v1047_v60, %v6660_v12 }
 0x607   :  { %v1067_v16 = vadd.f32 %v1051_v62, %v6649_v7  ;;  %v1068_v17 = vadd.f32 %v1052_v63, %v6651_v8  ;;  %v1069_v19 = vadd.f32 %v1053_v2, %v6653_v9  ;;  %v1070_v20 = vadd.f32 %v1054_v3, %v6655_v10 }
 0x608   :  { %v1071_v22 = vadd.f32 %v1055_v4, %v6662_v13  ;;  %v1072_v25 = vadd.f32 %v1056_v6, %v6665_v14  ;;  %v1073_v26 = vadd.f32 %v1057_v15, %v6670_v18 }
 0x609   :  { %v1082_v23 = vrot.slane %v1067_v16, 7  ;;  %v1084_v24 = vrot.slane %v1068_v17, 6  ;;  %v1086_v28 = vrot.slane %v1069_v19, 5  ;;  %v1088_v8 = vrot.slane %v1070_v20, 4 }
 0x60a   :  { %v1090_v29 = vrot.slane %v1071_v22, 3  ;;  %v1092_v12 = vrot.slane %v1072_v25, 2  ;;  %v1094_v30 = vrot.slane %v1073_v26, 1 }
 0x60b   :  { %v1083_v27 = vsel %vm192_vm1, %v1082_v23, %v1066_v21  ;;  %v144_v23 = vld [vmem:[%s8133_s8 + $0x8] sm:$0xff] }
 0x60c   :  { %v1085_v7 = vsel %vm195_vm2, %v1084_v24, %v1083_v27  ;;  %v145_v24 = vld [vmem:[%s8133_s8 + $0x10] sm:$0xff]  ;;  %v113_v27 = vld [vmem:[%s8180_s26 + $0x2] sm:$0x3] }
 0x60d   :  { %v1087_v9 = vsel %vm198_vm3, %v1086_v28, %v1085_v7  ;;  %v114_v7 = vld [vmem:[%s8180_s26 + $0x4] sm:$0x3] }
 0x60e   :  { %v1089_v10 = vsel %vm201_vm4, %v1088_v8, %v1087_v9  ;;  %v115_v8 = vld [vmem:[%s8180_s26 + $0x6] sm:$0x3]  ;;  %v116_v9 = vld [vmem:[%s8180_s26 + $0x8] sm:$0x3] }
 0x60f   :  { %v1091_v13 = vsel %vm204_vm5, %v1090_v29, %v1089_v10  ;;  %v112_v29 = vld [vmem:[%s8180_s26] sm:$0x3]  ;;  %v117_v10 = vld [vmem:[%s8180_s26 + $0xa] sm:$0x3] }
 0x610   :  { %v1093_v31 = vsel %vm207_vm6, %v1092_v12, %v1091_v13  ;;  %v118_v12 = vld [vmem:[%s8180_s26 + $0xc] sm:$0x3]  ;;  %v119_v13 = vld [vmem:[%s8180_s26 + $0xe] sm:$0x3] }
 0x611   :  { %v1095_v14 = vsel %vm210_vm7, %v1094_v30, %v1093_v31  ;;  %v1334_v30 = vrot.slane %v113_v27, 7  ;;  %v1336_v31 = vrot.slane %v114_v7, 6 }
 0x612   :  { %v1097_v18 = vsel %vm212_vm8, %v1095_v14, 0.0  ;;  %v1338_v14 = vrot.slane %v115_v8, 5 }
 0x613   :  { %1098 = vadd.xlane.f32.xlu0 %v1097_v18  ;;  %v1340_v18 = vrot.slane %v116_v9, 4 }
 0x6a0   :  { %v1099_v32 = vpop.xlane.xlu0 %1098 }
 0x6a1   :  { %v1101_v33 = vmul.f32 0.03125, %v1099_v32  ;;  %v1342_v32 = vrot.slane %v117_v10, 3  ;;  %v1187_v10 = vlaneseq }
 0x6a3   :  { %v1103_v34 = vrot.slane %v1101_v33, 1  ;;  %v1104_v35 = vrot.slane %v1101_v33, 2  ;;  %v1105_v36 = vrot.slane %v1101_v33, 3  ;;  %v1106_v37 = vrot.slane %v1101_v33, 4 }
 0x6a4   :  { %v1107_v38 = vrot.slane %v1101_v33, 5  ;;  %v1108_v39 = vrot.slane %v1101_v33, 6  ;;  %v1109_v41 = vrot.slane %v1101_v33, 7  ;;  %v6807_v42 = vsub.f32 %v1066_v21, %v1101_v33  ;;  %v120_v33 = vld [vmem:[%s8180_s26 + $0x10] sm:$0x3] }
 0x6a5   :  { %v6809_v43 = vsub.f32 %v1067_v16, %v1103_v34  ;;  %v6811_v44 = vsub.f32 %v1068_v17, %v1104_v35  ;;  %v6813_v45 = vsub.f32 %v1069_v19, %v1105_v36  ;;  %v6815_v46 = vsub.f32 %v1070_v20, %v1106_v37  ;;  %v121_v34 = vld [vmem:[%s8180_s26 + $0x12] sm:$0x3]  ;;  %v122_v36 = vld [vmem:[%s8180_s26 + $0x14] sm:$0x3]  ;;  %v123_v37 = vld [vmem:[%s8180_s26 + $0x16] sm:$0x3] }
 0x6a6   :  { %v6817_v48 = vsub.f32 %v1071_v22, %v1107_v38  ;;  %v6819_v49 = vsub.f32 %v1072_v25, %v1108_v39  ;;  %v6821_v50 = vsub.f32 %v1073_v26, %v1109_v41  ;;  %v1126_v55 = vmul.f32 %v6807_v42, %v6807_v42  ;;  %v143_v22 = vld [vmem:[%s8133_s8] sm:$0xff]  ;;  %v146_v26 = vld [vmem:[%s8133_s8 + $0x18] sm:$0xff] }
 0x6a7   :  { %v1127_v51 = vmul.f32 %v6809_v43, %v6809_v43  ;;  %v1128_v52 = vmul.f32 %v6811_v44, %v6811_v44  ;;  %v1129_v53 = vmul.f32 %v6813_v45, %v6813_v45  ;;  %v1130_v54 = vmul.f32 %v6815_v46, %v6815_v46  ;;  %v124_v38 = vld [vmem:[%s8180_s26 + $0x18] sm:$0x3] }
 0x6a8   :  { %v1131_v56 = vmul.f32 %v6817_v48, %v6817_v48  ;;  %v1132_v59 = vmul.f32 %v6819_v49, %v6819_v49  ;;  %v1133_v60 = vmul.f32 %v6821_v50, %v6821_v50  ;;  %v6856_v25 = vpack.c.bf16 %v144_v23, %v143_v22 }
 0x6a9   :  { %v1142_v57 = vrot.slane %v1127_v51, 7  ;;  %v1144_v58 = vrot.slane %v1128_v52, 6  ;;  %v1146_v62 = vrot.slane %v1129_v53, 5  ;;  %v1148_v2 = vrot.slane %v1130_v54, 4  ;;  %v125_v52 = vld [vmem:[%s8180_s26 + $0x1a] sm:$0x3] }
 0x6aa   :  { %v1150_v4 = vrot.slane %v1131_v56, 3  ;;  %v1152_v15 = vrot.slane %v1132_v59, 2  ;;  %v1154_v17 = vrot.slane %v1133_v60, 1  ;;  %v6864_v28 = vpack.c.bf16 %v146_v26, %v145_v24  ;;  %5963 = vmatprep.subr.bf16.mxu0 %v6856_v25  ;;  %v126_v53 = vld [vmem:[%s8180_s26 + $0x1c] sm:$0x3]  ;;  %v139_v59 = vld [vmem:[%s8131_s6 + $0x8] sm:$0xff] }
 0x6ab   :  { %v1143_v61 = vsel %vm192_vm1, %v1142_v57, %v1126_v55  ;;  %5965 = vmatpush3.bf16.msra.mxu0 %v6856_v25  ;;  %v1335_v35 = vsel %vm192_vm1, %v1334_v30, %v112_v29  ;;  %v1344_v41 = vrot.slane %v118_v12, 2  ;;  %v1346_v51 = vrot.slane %v119_v13, 1  ;;  %v6960_v30 = vld [vmem:[%s8141_s16] sm:$0x7] }
 0x6ac   :  { %v1145_v63 = vsel %vm195_vm2, %v1144_v58, %v1143_v61  ;;  %5967 = vmatprep.subr.bf16.mxu0 %v6864_v28  ;;  %v1337_v39 = vsel %vm195_vm2, %v1336_v31, %v1335_v35  ;;  %v1348_v55 = vrot.slane %v121_v34, 7  ;;  %v1350_v56 = vrot.slane %v122_v36, 6  ;;  %v138_v58 = vld [vmem:[%s8131_s6] sm:$0xff]  ;;  %v127_v61 = vld [vmem:[%s8180_s26 + $0x1e] sm:$0x3] }
 0x6ad   :  { %v1147_v3 = vsel %vm198_vm3, %v1146_v62, %v1145_v63  ;;  %v1339_v54 = vsel %vm198_vm3, %v1338_v14, %v1337_v39  ;;  %v1352_v57 = vrot.slane %v123_v37, 5  ;;  %v1354_v62 = vrot.slane %v124_v38, 4  ;;  %v6965_v31 = vld [vmem:[%s8142_s17] sm:$0x7] }
 0x6ae   :  { %v1149_v6 = vsel %vm201_vm4, %v1148_v2, %v1147_v3  ;;  %v1341_v60 = vsel %vm201_vm4, %v1340_v18, %v1339_v54  ;;  %v1349_v2 = vsel %vm192_vm1, %v1348_v55, %v120_v33  ;;  %v1356_v3 = vrot.slane %v125_v52, 3 }
 0x6af   :  { %v1151_v16 = vsel %vm204_vm5, %v1150_v4, %v1149_v6  ;;  %5969 = vmatpush3.bf16.msra.mxu0 %v6864_v28  ;;  %v1343_v63 = vsel %vm204_vm5, %v1342_v32, %v1341_v60  ;;  %v140_v4 = vld [vmem:[%s8131_s6 + $0x10] sm:$0xff]  ;;  %v141_v6 = vld [vmem:[%s8131_s6 + $0x18] sm:$0xff]  ;;  %v1360_v22 = vrot.slane %v127_v61, 1  ;;  %v6954_v12 = vshrl.u32 %v1187_v10, 7 }
 0x6b0   :  { %v1153_v19 = vsel %vm207_vm6, %v1152_v15, %v1151_v16  ;;  %5974 = vmatprep.subr.bf16.mxu0 %v8166_v0  ;;  %v1345_v15 = vsel %vm207_vm6, %v1344_v41, %v1343_v63  ;;  %v1351_v16 = vsel %vm195_vm2, %v1350_v56, %v1349_v2  ;;  %v6943_v24 = vpack.c.bf16 %v141_v6, %v140_v4 }
 0x6b1   :  { %v1155_v20 = vsel %vm210_vm7, %v1154_v17, %v1153_v19  ;;  %v1358_v17 = vrot.slane %v126_v53, 2  ;;  %v6936_v19 = vpack.c.bf16 %v139_v59, %v138_v58  ;;  %8181 = vst [vmem:[#allocation15_spill] sm:$0xff] %v6954_v12  ;;  %v1189_v13 = vsub.s32 0, %v6954_v12 }
 0x6b2   :  { %v1157_v21 = vsel %vm212_vm8, %v1155_v20, 0.0  ;;  %v1347_v20 = vsel %vm210_vm7, %v1346_v51, %v1345_v15 }
 0x6b3   :  { %1158 = vadd.xlane.f32.xlu1 %v1157_v21  ;;  %v1353_v21 = vsel %vm198_vm3, %v1352_v57, %v1351_v16  ;;  %5631 = vmatprep.mubr.msk.f32.mxu0 %vm212_vm8, %v1347_v20  ;;  %v6968_v18 = vrot.slane %v6960_v30, %v1189_v13  ;;  %v6971_v32 = vrot.slane %v6965_v31, %v1189_v13 }
 0x6b4   :  { %v1355_v23 = vsel %vm201_vm4, %v1354_v62, %v1353_v21  ;;  %5958 = vmatpush3.bf16.msra.mxu1 %v6936_v19 }
 0x6b5   :  { %v1357_v26 = vsel %vm204_vm5, %v1356_v3, %v1355_v23  ;;  %5959 = vmatprep.subr.bf16.mxu1 %v8166_v0 }
 0x6b6   :  { %v1359_v27 = vsel %vm207_vm6, %v1358_v17, %v1357_v26 }
 0x6b7   :  { %v1361_v7 = vsel %vm210_vm7, %v1360_v22, %v1359_v27 }
 0x6b8   :  { %5632 = vmatmul.mubr.msk.f32.vlgmr.msra.gmra.mrb[6].mxu0 %vm212_vm8, %v1361_v7  ;;  %5961 = vmatpush3.bf16.msra.mxu1 %v6943_v24 }
 0x6b9   :  { %5970 = vmatprep.subr.bf16.mxu1 %v8166_v0  ;;  %5645 = vmatprep.mubr.msk.f32.mxu0 %vm6467_vm0, %v8168_v1 }
 0x740   :  { %v1159_v8 = vpop.xlane.xlu1 %1158 }
 0x741   :  { %v1160_v9 = vmul.f32 0.03125, %v1159_v8 }
 0x743   :  { %v1161_v29 = vadd.f32 1e-05, %v1160_v9 }
 0x745   :  { %6235 = vrsqrt.f32 %v1161_v29  ;;  %v5315_v29 = vld [vmem:[%s8134_s9] ss:$0 sm:$0xff] }
 0x74f   :  { %v6236_v14 = vpop.eup %6235 }
 0x750   :  { %v1164_v33 = vrot.slane %v6236_v14, 1  ;;  %v1165_v34 = vrot.slane %v6236_v14, 2  ;;  %v1166_v35 = vrot.slane %v6236_v14, 3  ;;  %v1167_v36 = vrot.slane %v6236_v14, 4 }
 0x751   :  { %v1168_v37 = vrot.slane %v6236_v14, 5  ;;  %v1169_v38 = vrot.slane %v6236_v14, 6  ;;  %v1170_v39 = vrot.slane %v6236_v14, 7  ;;  %v1179_v41 = vmul.f32 %v6236_v14, %v6807_v42 }
 0x752   :  { %v1180_v51 = vmul.f32 %v1164_v33, %v6809_v43  ;;  %v1181_v52 = vmul.f32 %v1165_v34, %v6811_v44  ;;  %v1182_v53 = vmul.f32 %v1166_v35, %v6813_v45  ;;  %v1183_v54 = vmul.f32 %v1167_v36, %v6815_v46 }
 0x753   :  { %v1184_v55 = vmul.f32 %v1168_v37, %v6817_v48  ;;  %v1185_v56 = vmul.f32 %v1169_v38, %v6819_v49  ;;  %v1186_v57 = vmul.f32 %v1170_v39, %v6821_v50  ;;  %v1191_v58 = vmul.f32 %v6968_v18, %v1179_v41  ;;  %v5313_v38 = vld [vmem:[%s8132_s7] ss:$0 sm:$0xff] }
 0x754   :  { %v1192_v59 = vmul.f32 %v6968_v18, %v1180_v51  ;;  %v1193_v42 = vmul.f32 %v6968_v18, %v1181_v52  ;;  %v1194_v43 = vmul.f32 %v6968_v18, %v1182_v53  ;;  %v1195_v44 = vmul.f32 %v6968_v18, %v1183_v54 }
 0x755   :  { %v1196_v45 = vmul.f32 %v6968_v18, %v1184_v55  ;;  %v1197_v46 = vmul.f32 %v6968_v18, %v1185_v56  ;;  %v1198_v48 = vmul.f32 %v6968_v18, %v1186_v57  ;;  %v7002_v62 = vadd.f32 %v6971_v32, %v1191_v58 }
 0x756   :  { %v6990_v49 = vadd.f32 %v6971_v32, %v1192_v59  ;;  %v6993_v50 = vadd.f32 %v6971_v32, %v1193_v42  ;;  %v6996_v60 = vadd.f32 %v6971_v32, %v1194_v43  ;;  %v6999_v61 = vadd.f32 %v6971_v32, %v1195_v44 }
 0x757   :  { %v7005_v63 = vadd.f32 %v6971_v32, %v1196_v45  ;;  %v7010_v4 = vadd.f32 %v6971_v32, %v1197_v46  ;;  %v7013_v6 = vadd.f32 %v6971_v32, %v1198_v48 }
 0x758   :  { %v1225_v2 = vrot.slane %v6990_v49, 7  ;;  %v1227_v3 = vrot.slane %v6993_v50, 6  ;;  %v1229_v16 = vrot.slane %v6996_v60, 5  ;;  %v1231_v20 = vrot.slane %v6999_v61, 4 }
 0x759   :  { %v1233_v22 = vrot.slane %v7005_v63, 3  ;;  %v1235_v26 = vrot.slane %v7010_v4, 2  ;;  %v1237_v7 = vrot.slane %v7013_v6, 1 }
 0x75a   :  { %v1226_v15 = vsel %vm192_vm1, %v1225_v2, %v7002_v62 }
 0x75b   :  { %v1228_v17 = vsel %vm195_vm2, %v1227_v3, %v1226_v15 }
 0x75c   :  { %v1230_v21 = vsel %vm198_vm3, %v1229_v16, %v1228_v17 }
 0x75d   :  { %v1232_v23 = vsel %vm201_vm4, %v1231_v20, %v1230_v21 }
 0x75e   :  { %v1234_v27 = vsel %vm204_vm5, %v1233_v22, %v1232_v23 }
 0x75f   :  { %v1236_v8 = vsel %vm207_vm6, %v1235_v26, %v1234_v27 }
 0x760   :  { %v1238_v9 = vsel %vm210_vm7, %v1237_v7, %v1236_v8 }
 0x761   :  { %5621 = vmatmul.mubr.msk.f32.vlgmr.msra.gmra.mrb[14].mxu1 %vm212_vm8, %v1238_v9 }
 0x762   :  { %5638 = vmatprep.mubr.msk.f32.mxu1 %vm6467_vm0, %v8168_v1 }
 0x78b   :  { %v5633_v10 = vpop.f32.mrb[6].mxu0 }
 0x78c   :  { %v1438_v13 = vadd.f32 %v5633_v10, %v5315_v29  ;;  %v1432_v14 = vpop.f32.mrb[7].mxu0 }
 0x78d   :  { %v1433_v33 = vadd.f32 %v5315_v29, %v1432_v14 }
 0x78f   :  { %v7040_v35 = vpack.i.bf16 %v1438_v13, %v1433_v33  ;;  %v5971_v36 = vpack.c.bf16 %v1438_v13, %v1433_v33 }
 0x791   :  { %6150 = vrot.lane.b32.xlu0 %v7040_v35, %s6470_s27  ;;  %5973 = vmatpush3.bf16.xpose.msk.msra.mxu1 %vm7036_vm12, %v5971_v36 }
 0x792   :  { %5977 = vmatprep.subr.bf16.mxu1 %v8166_v0 }
 0x803   :  { %v6151_v37 = vpop.permute.xlu0 %6150 }
 0x804   :  { %v6153_v39 = vunpack.i.h.bf16 %v6151_v37  ;;  %v6152_v41 = vunpack.i.l.bf16 %v6151_v37 }
 0x806   :  { %v5978_v54 = vpack.c.bf16 %v6153_v39, %v6152_v41 }
 0x834   :  { %v1307_v51 = vpop.f32.mrb[14].mxu1 }
 0x835   :  { %v1308_v52 = vadd.f32 %v5313_v38, %v1307_v51  ;;  %v5622_v53 = vpop.f32.mrb[15].mxu1 }
 0x837   :  { %v7050_v55 = vmul.f32 0.35355338, %v1308_v52 }
 0x839   :  { %1610 = vrot.lane.b32.xlu1 %v7050_v55, %s6470_s27  ;;  %5639 = vmatmul.mubr.msk.f32.vlgmr.msra.gmra.mrb[16].mxu1 %vm289_vm9, %v7050_v55 }
 0x83a   :  { %5980 = vmatpush3.bf16.xpose.msk.msra.mxu1 %vm7036_vm12, %v5978_v54  ;;  %5652 = vmatprep.mubr.msk.f32.mxu1 %vm6467_vm0, %v8168_v1 }
 0x83b   :  { %5988 = vmatprep.subr.bf16.mxu1 %v8166_v0 }
 0x8ab   :  { %v1611_v56 = vpop.permute.xlu1 %1610 }
 0x8ac   :  { %5653 = vmatmul.mubr.msk.f32.vlgmr.msra.gmra.mrb[18].mxu1 %vm289_vm9, %v1611_v56 }
 0x8ad   :  { %5673 = vmatprep.mubr.msk.f32.mxu1 %vm6467_vm0, %v8168_v1 }
 0x90c   :  { %v1516_v57 = vpop.f32.mrb[16].mxu1 }
 0x90d   :  { %v5640_v58 = vpop.f32.mrb[17].mxu1  ;;  %v1520_v59 = vsel %vm960_vm10, %v1516_v57, -inf }
 0x90e   :  { %1521 = vmax.xlane.f32.xlu0 %v1520_v59 }
 0x97f   :  { %v1688_v42 = vpop.f32.mrb[18].mxu1 }
 0x980   :  { %v5654_v43 = vpop.f32.mrb[19].mxu1  ;;  %v1692_v44 = vsel %vm960_vm10, %v1688_v42, -inf }
 0x981   :  { %1693 = vmax.xlane.f32.xlu1 %v1692_v44 }
 0x992   :  { %6155 = vrot.lane.b32.xlu1 %v7040_v35, %s6469_s1 }
 0x996   :  { %6165 = vrot.lane.b32.xlu1 %v7040_v35, %s6473_s12 }
 0x99a   :  { %1782 = vrot.lane.b32.xlu1 %v7050_v55, %s6473_s12 }
 0x99b   :  { %v1522_v45 = vpop.xlane.xlu0 %1521 }
 0x99c   :  { %v1523_v46 = vsub.f32 %v1516_v57, %v1522_v45 }
 0x99e   :  { %v1524_v48 = vmul.f32 1.442695, %v1523_v46 }
 0x9a0   :  { %6237 = vpow2.f32 %v1524_v48 }
 0x9aa   :  { %v6238_v2 = vpop.eup %6237 }
 0x9ab   :  { %v1526_v3 = vsel %vm960_vm10, %v6238_v2, 0.0 }
 0x9ac   :  { %1527 = vadd.xlane.f32.xlu0 %v1526_v3 }
 0xa0e   :  { %v1694_v15 = vpop.xlane.xlu1 %1693 }
 0xa0f   :  { %v1695_v16 = vsub.f32 %v1688_v42, %v1694_v15 }
 0xa11   :  { %v1696_v17 = vmul.f32 1.442695, %v1695_v16 }
 0xa12   :  { %v6156_v20 = vpop.permute.xlu1 %6155 }
 0xa13   :  { %6239 = vpow2.f32 %v1696_v17  ;;  %v6158_v21 = vunpack.i.h.bf16 %v6156_v20  ;;  %v6157_v22 = vunpack.i.l.bf16 %v6156_v20 }
 0xa15   :  { %v5975_v23 = vpack.c.bf16 %v6158_v21, %v6157_v22 }
 0xa16   :  { %v6166_v36 = vpop.permute.xlu1 %6165 }
 0xa17   :  { %5976 = vmatpush3.bf16.msra.mxu0 %v5975_v23  ;;  %v6168_v38 = vunpack.i.h.bf16 %v6166_v36  ;;  %v6167_v39 = vunpack.i.l.bf16 %v6166_v36 }
 0xa18   :  { %5981 = vmatprep.subr.bf16.mxu0 %v8166_v0 }
 0xa19   :  { %v5985_v51 = vpack.c.bf16 %v6168_v38, %v6167_v39 }
 0xa1a   :  { %v1783_v52 = vpop.permute.xlu1 %1782 }
 0xa1d   :  { %v6240_v26 = vpop.eup %6239 }
 0xa1e   :  { %v1698_v27 = vsel %vm960_vm10, %v6240_v26, 0.0 }
 0xa1f   :  { %1699 = vadd.xlane.f32.xlu0 %v1698_v27 }
 0xa35   :  { %6160 = vrot.lane.b32.xlu0 %v7040_v35, %s6471_s3 }
 0xa39   :  { %v1528_v7 = vpop.xlane.xlu0 %1527 }
 0xa3a   :  { %6241 = vrcp.f32 %v1528_v7 }
 0xa44   :  { %v6242_v8 = vpop.eup %6241 }
 0xa45   :  { %v1530_v9 = vmul.f32 %v6242_v8, %v6238_v2 }
 0xa47   :  { %5646 = vmatmul.mubr.msk.f32.vlgmr.msra.gmra.mrb[8].mxu0 %vm960_vm10, %v1530_v9 }
 0xa48   :  { %5659 = vmatprep.mubr.msk.f32.mxu0 %vm6467_vm0, %v8168_v1 }
 0xaac   :  { %v1700_v29 = vpop.xlane.xlu0 %1699 }
 0xaad   :  { %6243 = vrcp.f32 %v1700_v29 }
 0xab0   :  { %v6161_v10 = vpop.permute.xlu0 %6160 }
 0xab1   :  { %v6163_v13 = vunpack.i.h.bf16 %v6161_v10  ;;  %v6162_v14 = vunpack.i.l.bf16 %v6161_v10 }
 0xab3   :  { %v5982_v33 = vpack.c.bf16 %v6163_v13, %v6162_v14 }
 0xab5   :  { %5983 = vmatpush3.bf16.msra.mxu0 %v5982_v33 }
 0xab6   :  { %5984 = vmatprep.subr.bf16.mxu0 %v8166_v0 }
 0xab7   :  { %v6244_v37 = vpop.eup %6243 }
 0xab8   :  { %v1702_v41 = vmul.f32 %v6244_v37, %v6240_v26 }
 0xaba   :  { %5660 = vmatmul.mubr.msk.f32.vlgmr.msra.gmra.mrb[10].mxu0 %vm960_vm10, %v1702_v41 }
 0xabb   :  { %5666 = vmatprep.mubr.msk.f32.mxu0 %vm6467_vm0, %v8168_v1 }
 0xabe   :  { %5987 = vmatpush3.bf16.xpose.msk.msra.mxu0 %vm7036_vm12, %v5985_v51 }
 0xabf   :  { %5995 = vmatprep.subr.bf16.mxu0 %v8166_v0 }
 0xac5   :  { %5667 = vmatmul.mubr.msk.f32.vlgmr.msra.gmra.mrb[12].mxu0 %vm289_vm9, %v1783_v52 }
 0xac6   :  { %5687 = vmatprep.mubr.msk.f32.mxu0 %vm6467_vm0, %v8168_v1 }
 0xb1a   :  { %v7090_v53 = vpop.f32.mrb[8].mxu0 }
 0xb1b   :  { %v5647_v54 = vpop.f32.mrb[9].mxu0 }
 0xb8d   :  { %v1778_v56 = vpop.f32.mrb[10].mxu0 }
 0xb8e   :  { %v5661_v57 = vpop.f32.mrb[11].mxu0 }
 0xb8f   :  { %v148_v57 = vld [vmem:[#allocation5] sm:$0xff] }
 0xb98   :  { %v1860_v58 = vpop.f32.mrb[12].mxu0 }
 0xb99   :  { %v5668_v59 = vpop.f32.mrb[13].mxu0  ;;  %v1864_v42 = vsel %vm960_vm10, %v1860_v58, -inf }
 0xb9a   :  { %1865 = vmax.xlane.f32.xlu0 %v1864_v42  ;;  %v150_v59 = vld [vmem:[#allocation5 + $0x10] sm:$0xff]  ;;  %v151_v42 = vld [vmem:[#allocation5 + $0x18] sm:$0xff] }
 0xbb0   :  { %6170 = vrot.lane.b32.xlu0 %v7040_v35, %s6472_s28 }
 0xbb4   :  { %1954 = vrot.lane.b32.xlu0 %v7050_v55, %s6475_s20 }
 0xc27   :  { %v1866_v43 = vpop.xlane.xlu0 %1865 }
 0xc28   :  { %v1867_v44 = vsub.f32 %v1860_v58, %v1866_v43  ;;  %v149_v58 = vld [vmem:[#allocation5 + $0x8] sm:$0xff]  ;;  %v7123_v43 = vpack.c.bf16 %v151_v42, %v150_v59 }
 0xc2a   :  { %v1868_v45 = vmul.f32 1.442695, %v1867_v44 }
 0xc2b   :  { %v6171_v46 = vpop.permute.xlu0 %6170 }
 0xc2c   :  { %6245 = vpow2.f32 %v1868_v45  ;;  %v6173_v48 = vunpack.i.h.bf16 %v6171_v46  ;;  %v6172_v2 = vunpack.i.l.bf16 %v6171_v46 }
 0xc2e   :  { %v5989_v3 = vpack.c.bf16 %v6173_v48, %v6172_v2 }
 0xc2f   :  { %v1955_v27 = vpop.permute.xlu0 %1954 }
 0xc30   :  { %5990 = vmatpush3.bf16.msra.mxu1 %v5989_v3 }
 0xc31   :  { %5991 = vmatprep.subr.bf16.mxu1 %v8166_v0 }
 0xc36   :  { %v6246_v15 = vpop.eup %6245 }
 0xc37   :  { %v1870_v16 = vsel %vm960_vm10, %v6246_v15, 0.0 }
 0xc38   :  { %1871 = vadd.xlane.f32.xlu1 %v1870_v16 }
 0xc49   :  { %6175 = vrot.lane.b32.xlu1 %v7040_v35, %s6475_s20 }
 0xcc5   :  { %v1872_v17 = vpop.xlane.xlu1 %1871 }
 0xcc6   :  { %6247 = vrcp.f32 %v1872_v17  ;;  %v5334_v17 = vld [vmem:[%s8136_s11] ss:$0 sm:$0xff] }
 0xcc9   :  { %v6176_v55 = vpop.permute.xlu1 %6175 }
 0xcca   :  { %v6178_v20 = vunpack.i.h.bf16 %v6176_v55  ;;  %v6177_v21 = vunpack.i.l.bf16 %v6176_v55 }
 0xccc   :  { %v5992_v26 = vpack.c.bf16 %v6178_v20, %v6177_v21 }
 0xcd0   :  { %v6248_v22 = vpop.eup %6247 }
 0xcd1   :  { %v1874_v23 = vmul.f32 %v6248_v22, %v6246_v15 }
 0xcd3   :  { %5674 = vmatmul.mubr.msk.f32.vlgmr.msra.gmra.mrb[20].mxu1 %vm960_vm10, %v1874_v23 }
 0xcd4   :  { %5994 = vmatpush3.bf16.xpose.msk.msra.mxu1 %vm7036_vm12, %v5992_v26  ;;  %5680 = vmatprep.mubr.msk.f32.mxu1 %vm6467_vm0, %v8168_v1 }
 0xcd5   :  { %6004 = vmatprep.subr.bf16.mxu1 %v8166_v0 }
 0xcdb   :  { %5681 = vmatmul.mubr.msk.f32.vlgmr.msra.gmra.mrb[22].mxu1 %vm289_vm9, %v1955_v27 }
 0xcdc   :  { %5709 = vmatprep.mubr.msk.f32.mxu1 %vm6467_vm0, %v8168_v1 }
 0xda6   :  { %v1950_v7 = vpop.f32.mrb[20].mxu1 }
 0xda7   :  { %v5675_v8 = vpop.f32.mrb[21].mxu1 }
 0xdae   :  { %v2032_v9 = vpop.f32.mrb[22].mxu1 }
 0xdaf   :  { %v5682_v29 = vpop.f32.mrb[23].mxu1  ;;  %v2036_v10 = vsel %vm960_vm10, %v2032_v9, -inf }
 0xdb0   :  { %2037 = vmax.xlane.f32.xlu1 %v2036_v10 }
 0xdc1   :  { %2127 = vrot.lane.b32.xlu1 %v1778_v56, %s8184_s23 }
 0xdc5   :  { %2131 = vrot.lane.b32.xlu1 %v1950_v7, %s8185_s24 }
 0xe3d   :  { %v2038_v13 = vpop.xlane.xlu1 %2037 }
 0xe3e   :  { %v2039_v14 = vsub.f32 %v2032_v9, %v2038_v13 }
 0xe40   :  { %v2040_v33 = vmul.f32 1.442695, %v2039_v14 }
 0xe41   :  { %v2128_v46 = vpop.permute.xlu1 %2127 }
 0xe42   :  { %6249 = vpow2.f32 %v2040_v33  ;;  %v2138_v2 = vsel %vm289_vm9, %v7090_v53, %v2128_v46 }
 0xe45   :  { %v2132_v48 = vpop.permute.xlu1 %2131 }
 0xe46   :  { %v2139_v3 = vsel %vm960_vm10, %v2138_v2, %v2132_v48 }
 0xe4c   :  { %v6250_v36 = vpop.eup %6249 }
 0xe4d   :  { %v2042_v37 = vsel %vm960_vm10, %v6250_v36, 0.0 }
 0xe4e   :  { %2043 = vadd.xlane.f32.xlu0 %v2042_v37 }
 0xe64   :  { %6180 = vrot.lane.b32.xlu0 %v7040_v35, %s8186_s4  ;;  %v7120_v35 = vpack.c.bf16 %v149_v58, %v148_v57 }
 0xedb   :  { %v2044_v38 = vpop.xlane.xlu0 %2043 }
 0xedc   :  { %6251 = vrcp.f32 %v2044_v38 }
 0xedf   :  { %v6181_v39 = vpop.permute.xlu0 %6180 }
 0xee0   :  { %v6183_v41 = vunpack.i.h.bf16 %v6181_v39  ;;  %v6182_v51 = vunpack.i.l.bf16 %v6181_v39 }
 0xee2   :  { %v5996_v52 = vpack.c.bf16 %v6183_v41, %v6182_v51 }
 0xee4   :  { %5997 = vmatpush3.bf16.msra.mxu0 %v5996_v52 }
 0xee5   :  { %5998 = vmatprep.subr.bf16.mxu0 %v8166_v0 }
 0xee6   :  { %v6252_v54 = vpop.eup %6251 }
 0xee7   :  { %v2046_v56 = vmul.f32 %v6252_v54, %v6250_v36 }
 0xee9   :  { %5688 = vmatmul.mubr.msk.f32.vlgmr.msra.gmra.mrb[14].mxu0 %vm960_vm10, %v2046_v56 }
 0xeea   :  { %5698 = vmatprep.mubr.msk.f32.mxu0 %vm6467_vm0, %v8168_v1  ;;  %6000 = vmatpush3.bf16.msra.mxu0 %v7120_v35 }
 0xeeb   :  { %6001 = vmatprep.subr.bf16.mxu0 %v8166_v0 }
 0xeee   :  { %6003 = vmatpush3.bf16.msra.mxu0 %v7123_v43 }
 0xeef   :  { %6010 = vmatprep.subr.bf16.mxu0 %v8166_v0 }
 0xfbc   :  { %v2122_v44 = vpop.f32.mrb[14].mxu0 }
 0xfbd   :  { %2135 = vrot.lane.b32.xlu0 %v2122_v44, %s8187_s21  ;;  %v5689_v45 = vpop.f32.mrb[15].mxu0 }
0x102f   :  { %v2136_v15 = vpop.permute.xlu0 %2135 }
0x1030   :  { %v2140_v16 = vsel %vm962_vm11, %v2139_v3, %v2136_v15 }
0x1031   :  { %5699 = vmatmul.mubr.msk.f32.vlgmr.msra.gmra.mrb[16].mxu0 %vm212_vm8, %v2140_v16 }
0x1032   :  { %5744 = vmatprep.mubr.msk.f32.mxu0 %vm6467_vm0, %v8168_v1 }
0x1104   :  { %v2216_v55 = vpop.f32.mrb[16].mxu0 }
0x1105   :  { %v2217_v20 = vadd.f32 %v5334_v17, %v2216_v55  ;;  %v5700_v21 = vpop.f32.mrb[17].mxu0 }
0x1107   :  { %v2221_v22 = vrot.slane %v2217_v20, 1  ;;  %v2222_v23 = vrot.slane %v2217_v20, 2  ;;  %v2223_v53 = vrot.slane %v2217_v20, 3  ;;  %v2224_v26 = vrot.slane %v2217_v20, 4 }
0x1108   :  { %v2225_v27 = vrot.slane %v2217_v20, 5  ;;  %v2226_v7 = vrot.slane %v2217_v20, 6  ;;  %v2227_v8 = vrot.slane %v2217_v20, 7  ;;  %v2236_v14 = vadd.f32 %v2217_v20, %v7002_v62 }
0x1109   :  { %v2237_v9 = vadd.f32 %v2221_v22, %v6990_v49  ;;  %v2238_v29 = vadd.f32 %v2222_v23, %v6993_v50  ;;  %v2239_v10 = vadd.f32 %v2223_v53, %v6996_v60  ;;  %v2240_v13 = vadd.f32 %v2224_v26, %v6999_v61 }
0x110a   :  { %v2241_v33 = vadd.f32 %v2225_v27, %v7005_v63  ;;  %v2242_v38 = vadd.f32 %v2226_v7, %v7010_v4  ;;  %v2243_v39 = vadd.f32 %v2227_v8, %v7013_v6 }
0x110b   :  { %v2252_v36 = vrot.slane %v2237_v9, 7  ;;  %v2254_v37 = vrot.slane %v2238_v29, 6  ;;  %v2256_v51 = vrot.slane %v2239_v10, 5  ;;  %v2258_v50 = vrot.slane %v2240_v13, 4 }
0x110c   :  { %v2260_v52 = vrot.slane %v2241_v33, 3  ;;  %v2262_v62 = vrot.slane %v2242_v38, 2  ;;  %v2264_v54 = vrot.slane %v2243_v39, 1 }
0x110d   :  { %v2253_v41 = vsel %vm192_vm1, %v2252_v36, %v2236_v14 }
0x110e   :  { %v2255_v49 = vsel %vm195_vm2, %v2254_v37, %v2253_v41 }
0x110f   :  { %v2257_v60 = vsel %vm198_vm3, %v2256_v51, %v2255_v49 }
0x1110   :  { %v2259_v61 = vsel %vm201_vm4, %v2258_v50, %v2257_v60 }
0x1111   :  { %v2261_v63 = vsel %vm204_vm5, %v2260_v52, %v2259_v61 }
0x1112   :  { %v2263_v56 = vsel %vm207_vm6, %v2262_v62, %v2261_v63  ;;  %v153_v62 = vld [vmem:[#allocation7] sm:$0xff]  ;;  %v154_v63 = vld [vmem:[#allocation7 + $0x8] sm:$0xff] }
0x1113   :  { %v2265_v4 = vsel %vm210_vm7, %v2264_v54, %v2263_v56  ;;  %v155_v54 = vld [vmem:[#allocation7 + $0x10] sm:$0xff]  ;;  %v7195_v56 = vpack.c.bf16 %v154_v63, %v153_v62 }
0x1114   :  { %v2267_v6 = vsel %vm212_vm8, %v2265_v4, 0.0  ;;  %v156_v4 = vld [vmem:[#allocation7 + $0x18] sm:$0xff] }
0x1115   :  { %2268 = vadd.xlane.f32.xlu1 %v2267_v6  ;;  %6006 = vmatpush3.bf16.msra.mxu1 %v7195_v56  ;;  %v7198_v6 = vpack.c.bf16 %v156_v4, %v155_v54 }
0x1116   :  { %6007 = vmatprep.subr.bf16.mxu1 %v8166_v0 }
0x1119   :  { %6009 = vmatpush3.bf16.msra.mxu1 %v7198_v6 }
0x111a   :  { %6034 = vmatprep.subr.bf16.mxu1 %v8166_v0 }
0x11a2   :  { %v2269_v57 = vpop.xlane.xlu1 %2268 }
0x11a3   :  { %v2270_v58 = vmul.f32 0.03125, %v2269_v57 }
0x11a5   :  { %v2272_v59 = vrot.slane %v2270_v58, 1  ;;  %v2273_v42 = vrot.slane %v2270_v58, 2  ;;  %v2274_v44 = vrot.slane %v2270_v58, 3  ;;  %v2275_v45 = vrot.slane %v2270_v58, 4 }
0x11a6   :  { %v2276_v46 = vrot.slane %v2270_v58, 5  ;;  %v2277_v48 = vrot.slane %v2270_v58, 6  ;;  %v2278_v2 = vrot.slane %v2270_v58, 7  ;;  %v7155_v3 = vsub.f32 %v2236_v14, %v2270_v58 }
0x11a7   :  { %v7157_v15 = vsub.f32 %v2237_v9, %v2272_v59  ;;  %v7159_v16 = vsub.f32 %v2238_v29, %v2273_v42  ;;  %v7161_v17 = vsub.f32 %v2239_v10, %v2274_v44  ;;  %v7163_v55 = vsub.f32 %v2240_v13, %v2275_v45  ;;  %v7204_v44 = vld [vmem:[#allocation2] sm:$0x3] }
0x11a8   :  { %v7165_v20 = vsub.f32 %v2241_v33, %v2276_v46  ;;  %v7167_v21 = vsub.f32 %v2242_v38, %v2277_v48  ;;  %v7169_v22 = vsub.f32 %v2243_v39, %v2278_v2  ;;  %v2295_v7 = vmul.f32 %v7155_v3, %v7155_v3 }
0x11a9   :  { %v2296_v23 = vmul.f32 %v7157_v15, %v7157_v15  ;;  %v2297_v53 = vmul.f32 %v7159_v16, %v7159_v16  ;;  %v2298_v26 = vmul.f32 %v7161_v17, %v7161_v17  ;;  %v2299_v27 = vmul.f32 %v7163_v55, %v7163_v55 }
0x11aa   :  { %v2300_v8 = vmul.f32 %v7165_v20, %v7165_v20  ;;  %v2301_v10 = vmul.f32 %v7167_v21, %v7167_v21  ;;  %v2302_v13 = vmul.f32 %v7169_v22, %v7169_v22  ;;  %v2358_v42 = vsub.s32 1, %v6954_v12 }
0x11ab   :  { %v2311_v9 = vrot.slane %v2296_v23, 7  ;;  %v2313_v29 = vrot.slane %v2297_v53, 6  ;;  %v2315_v33 = vrot.slane %v2298_v26, 5  ;;  %v2317_v37 = vrot.slane %v2299_v27, 4  ;;  %v7213_v23 = vld [vmem:[#allocation2 + $0x2] sm:$0x3] }
0x11ac   :  { %v2319_v39 = vrot.slane %v2300_v8, 3  ;;  %v2321_v51 = vrot.slane %v2301_v10, 2  ;;  %v2323_v50 = vrot.slane %v2302_v13, 1  ;;  %v2752_v45 = vrot.slane %v7204_v44, 1  ;;  %v7217_v26 = vld [vmem:[#allocation2 + $0x4] sm:$0x3] }
0x11ad   :  { %v2312_v14 = vsel %vm192_vm1, %v2311_v9, %v2295_v7  ;;  %v7208_v48 = vrot.slane %v6960_v30, %v2358_v42  ;;  %v7211_v2 = vrot.slane %v6965_v31, %v2358_v42  ;;  %v2754_v27 = vrot.slane %v7217_v26, 7 }
0x11ae   :  { %v2314_v36 = vsel %vm195_vm2, %v2313_v29, %v2312_v14  ;;  %v2753_v53 = vsel %vm192_vm1, %v7213_v23, %v2752_v45 }
0x11af   :  { %v2316_v38 = vsel %vm198_vm3, %v2315_v33, %v2314_v36  ;;  %v2755_v62 = vsel %vm195_vm2, %v2754_v27, %v2753_v53 }
0x11b0   :  { %v2318_v41 = vsel %vm201_vm4, %v2317_v37, %v2316_v38 }
0x11b1   :  { %v2320_v49 = vsel %vm204_vm5, %v2319_v39, %v2318_v41 }
0x11b2   :  { %v2322_v60 = vsel %vm207_vm6, %v2321_v51, %v2320_v49 }
0x11b3   :  { %v2324_v52 = vsel %vm210_vm7, %v2323_v50, %v2322_v60  ;;  %v7235_v50 = vld [vmem:[#allocation2 + $0x6] sm:$0x3] }
0x11b4   :  { %v2326_v61 = vsel %vm212_vm8, %v2324_v52, 0.0 }
0x11b5   :  { %2327 = vadd.xlane.f32.xlu0 %v2326_v61 }
0x1242   :  { %v2328_v57 = vpop.xlane.xlu0 %2327 }
0x1243   :  { %v2329_v58 = vmul.f32 0.03125, %v2328_v57 }
0x1245   :  { %v2330_v59 = vadd.f32 1e-05, %v2329_v58 }
0x1247   :  { %6253 = vrsqrt.f32 %v2330_v59  ;;  %v7263_v59 = vld [vmem:[#allocation2 + $0x8] sm:$0x3] }
0x1248   :  { %v2758_v42 = vrot.slane %v7263_v59, 5 }
0x1251   :  { %v6254_v46 = vpop.eup %6253 }
0x1252   :  { %v2333_v7 = vrot.slane %v6254_v46, 1  ;;  %v2334_v8 = vrot.slane %v6254_v46, 2  ;;  %v2335_v9 = vrot.slane %v6254_v46, 3  ;;  %v2336_v29 = vrot.slane %v6254_v46, 4 }
0x1253   :  { %v2337_v10 = vrot.slane %v6254_v46, 5  ;;  %v2338_v13 = vrot.slane %v6254_v46, 6  ;;  %v2339_v30 = vrot.slane %v6254_v46, 7  ;;  %v2348_v14 = vmul.f32 %v6254_v46, %v7155_v3 }
0x1254   :  { %v2349_v31 = vmul.f32 %v2333_v7, %v7157_v15  ;;  %v2350_v33 = vmul.f32 %v2334_v8, %v7159_v16  ;;  %v2351_v36 = vmul.f32 %v2335_v9, %v7161_v17  ;;  %v2352_v37 = vmul.f32 %v2336_v29, %v7163_v55 }
0x1255   :  { %v2353_v38 = vmul.f32 %v2337_v10, %v7165_v20  ;;  %v2354_v39 = vmul.f32 %v2338_v13, %v7167_v21  ;;  %v2355_v41 = vmul.f32 %v2339_v30, %v7169_v22  ;;  %v2360_v51 = vmul.f32 %v7208_v48, %v2348_v14  ;;  %v7277_v10 = vld [vmem:[#allocation2 + $0xa] sm:$0x3] }
0x1256   :  { %v2361_v49 = vmul.f32 %v7208_v48, %v2349_v31  ;;  %v2362_v3 = vmul.f32 %v7208_v48, %v2350_v33  ;;  %v2363_v15 = vmul.f32 %v7208_v48, %v2351_v36  ;;  %v2364_v16 = vmul.f32 %v7208_v48, %v2352_v37 }
0x1257   :  { %v2365_v17 = vmul.f32 %v7208_v48, %v2353_v38  ;;  %v2366_v55 = vmul.f32 %v7208_v48, %v2354_v39  ;;  %v2756_v20 = vrot.slane %v7235_v50, 6  ;;  %v2367_v21 = vmul.f32 %v7208_v48, %v2355_v41  ;;  %v7286_v38 = vld [vmem:[#allocation2 + $0xc] sm:$0x3] }
0x1258   :  { %v7240_v22 = vadd.f32 %v7211_v2, %v2361_v49  ;;  %v7243_v60 = vadd.f32 %v7211_v2, %v2362_v3  ;;  %v7246_v52 = vadd.f32 %v7211_v2, %v2363_v15  ;;  %v7249_v61 = vadd.f32 %v7211_v2, %v2364_v16  ;;  %v7295_v49 = vld [vmem:[#allocation2 + $0xe] sm:$0x3] }
0x1259   :  { %v7253_v63 = vadd.f32 %v7211_v2, %v2360_v51  ;;  %v7256_v54 = vadd.f32 %v7211_v2, %v2365_v17  ;;  %v7261_v58 = vadd.f32 %v7211_v2, %v2366_v55  ;;  %v7267_v45 = vadd.f32 %v7211_v2, %v2367_v21  ;;  %v159_v17 = vld [vmem:[%s8139_s14 + $0x8] sm:$0xff] }
0x125a   :  { %v2394_v4 = vrot.slane %v7240_v22, 7  ;;  %v2396_v57 = vrot.slane %v7243_v60, 6  ;;  %v2398_v53 = vrot.slane %v7246_v52, 5  ;;  %v2757_v27 = vsel %vm198_vm3, %v2756_v20, %v2755_v62  ;;  %v161_v20 = vld [vmem:[%s8139_s14 + $0x18] sm:$0xff]  ;;  %v162_v62 = vld [vmem:[%s8139_s14 + $0x20] sm:$0xff] }
0x125b   :  { %v2400_v8 = vrot.slane %v7249_v61, 4  ;;  %v2402_v29 = vrot.slane %v7256_v54, 3  ;;  %v2760_v13 = vrot.slane %v7277_v10, 4  ;;  %v2404_v14 = vrot.slane %v7261_v58, 2 }
0x125c   :  { %v2395_v46 = vsel %vm192_vm1, %v2394_v4, %v7253_v63  ;;  %v2759_v31 = vsel %vm201_vm4, %v2758_v42, %v2757_v27  ;;  %v2406_v36 = vrot.slane %v7267_v45, 1  ;;  %v2762_v39 = vrot.slane %v7286_v38, 3  ;;  %v163_v4 = vld [vmem:[%s8139_s14 + $0x28] sm:$0xff]  ;;  %v164_v42 = vld [vmem:[%s8139_s14 + $0x30] sm:$0xff]  ;;  %v166_v27 = vld [vmem:[%s8139_s14 + $0x40] sm:$0xff] }
0x125d   :  { %v2397_v7 = vsel %vm195_vm2, %v2396_v57, %v2395_v46  ;;  %v2761_v51 = vsel %vm204_vm5, %v2760_v13, %v2759_v31  ;;  %v2764_v3 = vrot.slane %v7295_v49, 2  ;;  %v7332_v57 = vpack.c.bf16 %v163_v4, %v162_v62  ;;  %v165_v46 = vld [vmem:[%s8139_s14 + $0x38] sm:$0xff] }
0x125e   :  { %v2399_v9 = vsel %vm198_vm3, %v2398_v53, %v2397_v7  ;;  %v2763_v15 = vsel %vm207_vm6, %v2762_v39, %v2761_v51  ;;  %v7342_v53 = vpack.c.bf16 %v165_v46, %v164_v42  ;;  %v167_v7 = vld [vmem:[%s8139_s14 + $0x48] sm:$0xff]  ;;  %v5336_v39 = vld [vmem:[%s8138_s13] ss:$0 sm:$0xff] }
0x125f   :  { %v2401_v30 = vsel %vm201_vm4, %v2400_v8, %v2399_v9  ;;  %v2765_v16 = vsel %vm210_vm7, %v2764_v3, %v2763_v15  ;;  %v7352_v8 = vpack.c.bf16 %v167_v7, %v166_v27  ;;  %v168_v9 = vld [vmem:[%s8139_s14 + $0x50] sm:$0xff] }
0x1260   :  { %v2403_v33 = vsel %vm204_vm5, %v2402_v29, %v2401_v30  ;;  %v169_v29 = vld [vmem:[%s8139_s14 + $0x58] sm:$0xff]  ;;  %v170_v30 = vld [vmem:[%s8139_s14 + $0x60] sm:$0xff] }
0x1261   :  { %v2405_v37 = vsel %vm207_vm6, %v2404_v14, %v2403_v33  ;;  %v7362_v13 = vpack.c.bf16 %v169_v29, %v168_v9  ;;  %v171_v14 = vld [vmem:[%s8139_s14 + $0x68] sm:$0xff]  ;;  %v172_v33 = vld [vmem:[%s8139_s14 + $0x70] sm:$0xff] }
0x1262   :  { %v2407_v41 = vsel %vm210_vm7, %v2406_v36, %v2405_v37  ;;  %v7372_v31 = vpack.c.bf16 %v171_v14, %v170_v30  ;;  %v173_v36 = vld [vmem:[%s8139_s14 + $0x78] sm:$0xff] }
0x1263   :  { %5710 = vmatmul.mubr.msk.f32.vlgmr.msra.gmra.mrb[24].mxu1 %vm212_vm8, %v2407_v41  ;;  %v7382_v37 = vpack.c.bf16 %v173_v36, %v172_v33 }
0x1264   :  { %6036 = vmatpush3.bf16.msra.mxu1 %v6644_v5  ;;  %5755 = vmatprep.mubr.msk.f32.mxu1 %vm6467_vm0, %v8168_v1  ;;  %v158_v5 = vld [vmem:[%s8139_s14] sm:$0xff] }
0x1265   :  { %6037 = vmatprep.subr.bf16.mxu1 %v8166_v0  ;;  %v7312_v55 = vpack.c.bf16 %v159_v17, %v158_v5 }
0x1267   :  { %6012 = vmatpush3.bf16.msra.mxu0 %v7312_v55 }
0x1268   :  { %6039 = vmatpush3.bf16.msra.mxu1 %v6658_v11  ;;  %6013 = vmatprep.subr.bf16.mxu0 %v8166_v0  ;;  %v160_v11 = vld [vmem:[%s8139_s14 + $0x10] sm:$0xff] }
0x1269   :  { %5758 = vmatprep.subr.mxu1 %v8168_v1  ;;  %v7322_v21 = vpack.c.bf16 %v161_v20, %v160_v11  ;;  %v6317_v20 = vld [vmem:[%s8179_s25] ss:$0 sm:$0xff]  ;;  %s8189_s25 = smov 64  }
0x126b   :  { %5756 = vmatmul.mubr.msk.f32.vlgmr.msra.gmra.mrb[26].mxu1 %vm212_vm8, %v2765_v16  ;;  %6015 = vmatpush3.bf16.msra.mxu0 %v7322_v21 }
0x126c   :  { %5760 = vmatprep.mubr.msk.f32.mxu1 %vm6467_vm0, %v8168_v1  ;;  %6016 = vmatprep.subr.bf16.mxu0 %v8166_v0 }
0x126f   :  { %6018 = vmatpush3.bf16.msra.mxu0 %v7332_v57 }
0x1270   :  { %6019 = vmatprep.subr.bf16.mxu0 %v8166_v0 }
0x1273   :  { %6021 = vmatpush3.bf16.msra.mxu0 %v7342_v53 }
0x1274   :  { %6022 = vmatprep.subr.bf16.mxu0 %v8166_v0 }
0x1277   :  { %6024 = vmatpush3.bf16.msra.mxu0 %v7352_v8 }
0x1278   :  { %6025 = vmatprep.subr.bf16.mxu0 %v8166_v0 }
0x127b   :  { %6027 = vmatpush3.bf16.msra.mxu0 %v7362_v13 }
0x127c   :  { %6028 = vmatprep.subr.bf16.mxu0 %v8166_v0 }
0x127f   :  { %6030 = vmatpush3.bf16.msra.mxu0 %v7372_v31 }
0x1280   :  { %6031 = vmatprep.subr.bf16.mxu0 %v8166_v0 }
0x1283   :  { %6033 = vmatpush3.bf16.msra.mxu0 %v7382_v37 }
0x1284   :  { %5788 = vmatprep.subr.mxu0 %v8168_v1 }
0x1336   :  { %v2476_v41 = vpop.f32.mrb[24].mxu1 }
0x1337   :  { %v2477_v51 = vadd.f32 %v5336_v39, %v2476_v41  ;;  %v5711_v3 = vpop.f32.mrb[25].mxu1 }
0x1339   :  { %v2481_v15 = vmul.f32 0.70710677, %v2477_v51  ;;  %v2480_v1 = vmul.f32 0.5, %v2477_v51 }
0x133b   :  { %v2482_v16 = vand.u32 2147483647, %v2481_v15  ;;  %vm2502_vm13 = vcmp.ge.f32.partialorder %v2481_v15, 0.0 }
0x133d   :  { %v2483_v5 = vmul.f32 0.3275911, %v2482_v16  ;;  %v2496_v42 = vsub.f32 0.0, %v2482_v16 }
0x133e   :  { %v2834_v17 = vpop.f32.mrb[26].mxu1 }
0x133f   :  { %v2484_v11 = vadd.f32 1.0, %v2483_v5  ;;  %v7392_v62 = vadd.f32 %v6317_v20, %v2834_v17  ;;  %v5757_v4 = vpop.f32.mrb[27].mxu1  ;;  %v2497_v7 = vmul.f32 %v2496_v42, %v2482_v16  ;;  %v8188_v42 = vmov 0.0  }
0x1341   :  { %6255 = vrcp.f32 %v2484_v11  ;;  %2840 = vrot.lane.b32.xlu0 %v7392_v62, %s6469_s1  ;;  %v7399_v46 = vmul.f32 0.35355338, %v7392_v62  ;;  %v2498_v30 = vmul.f32 1.442695, %v2497_v7 }
0x1343   :  { %6257 = vpow2.f32 %v2498_v30 }
0x1345   :  { %3006 = vrot.lane.b32.xlu0 %v7392_v62, %s6471_s3 }
0x1349   :  { %3004 = vrot.lane.b32.xlu0 %v7399_v46, %s6470_s27 }
0x134b   :  { %v6256_v27 = vpop.eup %6255 }
0x134c   :  { %v2487_v9 = vmul.f32 1.0614054, %v6256_v27 }
0x134d   :  { %v6258_v17 = vpop.eup %6257 }
0x134e   :  { %v2488_v29 = vadd.f32 -1.4531521, %v2487_v9 }
0x1350   :  { %v2489_v14 = vmul.f32 %v6256_v27, %v2488_v29 }
0x1352   :  { %v2490_v33 = vadd.f32 1.4214138, %v2489_v14 }
0x1354   :  { %v2491_v36 = vmul.f32 %v6256_v27, %v2490_v33 }
0x1356   :  { %v2492_v39 = vadd.f32 -0.28449672, %v2491_v36 }
0x1358   :  { %v2493_v41 = vmul.f32 %v6256_v27, %v2492_v39 }
0x135a   :  { %v2494_v3 = vadd.f32 0.2548296, %v2493_v41 }
0x135c   :  { %v2495_v5 = vmul.f32 %v6256_v27, %v2494_v3 }
0x135e   :  { %v2500_v11 = vmul.f32 %v6258_v17, %v2495_v5 }
0x1360   :  { %v2501_v20 = vsub.f32 1.0, %v2500_v11 }
0x1362   :  { %v2503_v4 = vsub.f32 0.0, %v2501_v20 }
0x1364   :  { %v2504_v0 = vsel %vm2502_vm13, %v2501_v20, %v2503_v4 }
0x1365   :  { %v2505_v12 = vadd.f32 1.0, %v2504_v0 }
0x1367   :  { %v2506_v16 = vmul.f32 %v2505_v12, %v2480_v1 }
0x1369   :  { %5745 = vmatmul.mubr.f32.vlgmr.msra.gmra.mrb[18].mxu0 %v2506_v16 }
0x136a   :  { %5790 = vmatprep.mubr.msk.f32.mxu0 %vm6467_vm0, %v8188_v42 }
0x13b3   :  { %v2841_v7 = vpop.permute.xlu0 %2840 }
0x13b4   :  { %5759 = vmatpush3.xpose.msk.msra.mxu1 %vm289_vm9, %v2841_v7 }
0x13b5   :  { %5763 = vmatprep.subr.mxu1 %v8188_v42 }
0x13b7   :  { %5761 = vmatmul.mubr.msk.f32.vlgmr.msra.gmra.mrb[28].mxu1 %vm289_vm9, %v7399_v46  ;;  %v3007_v41 = vpop.permute.xlu0 %3006 }
0x13b8   :  { %5765 = vmatprep.mubr.msk.f32.mxu1 %vm6467_vm0, %v8188_v42 }
0x13bb   :  { %v3005_v5 = vpop.permute.xlu0 %3004 }
0x143c   :  { %v7411_v15 = vpop.f32.mrb[18].mxu0 }
0x143d   :  { %v5746_v51 = vpop.f32.mrb[19].mxu0 }
0x148a   :  { %v2913_v0 = vpop.f32.mrb[28].mxu1 }
0x148b   :  { %v5762_v1 = vpop.f32.mrb[29].mxu1  ;;  %v2917_v12 = vsel %vm289_vm9, %v2913_v0, -inf }
0x148c   :  { %2918 = vmax.xlane.f32.xlu1 %v2917_v12 }
0x1519   :  { %v2919_v27 = vpop.xlane.xlu1 %2918 }
0x151a   :  { %v2920_v9 = vsub.f32 %v2913_v0, %v2919_v27 }
0x151c   :  { %v2921_v29 = vmul.f32 1.442695, %v2920_v9 }
0x151e   :  { %6259 = vpow2.f32 %v2921_v29 }
0x1528   :  { %v6260_v30 = vpop.eup %6259 }
0x1529   :  { %v2923_v14 = vsel %vm289_vm9, %v6260_v30, 0.0 }
0x152a   :  { %2924 = vadd.xlane.f32.xlu1 %v2923_v14  ;;  %v8191_v14 = vmov 0.0|0.0  }
0x153b   :  { %2928 = vrot.lane.b32.xlu1 %v7392_v62, %s8189_s25 }
0x15b7   :  { %v2925_v33 = vpop.xlane.xlu1 %2924 }
0x15b8   :  { %6261 = vrcp.f32 %v2925_v33 }
0x15bb   :  { %v2929_v36 = vpop.permute.xlu1 %2928 }
0x15bc   :  { %5764 = vmatpush3.msra.mxu1 %v2929_v36 }
0x15bd   :  { %5768 = vmatprep.subr.mxu1 %v8188_v42 }
0x15c2   :  { %v6262_v39 = vpop.eup %6261 }
0x15c3   :  { %v2927_v3 = vmul.f32 %v6262_v39, %v6260_v30 }
0x15c5   :  { %3515 = vst.msk [vmem:[#allocation9 + $0x20] sm:$0xff] %vm289_vm9, %v2927_v3  ;;  %5766 = vmatmul.mubr.msk.f32.vlgmr.msra.gmra.mrb[30].mxu1 %vm289_vm9, %v2927_v3 }
0x15c6   :  { %5769 = vmatpush3.xpose.msk.msra.mxu1 %vm289_vm9, %v3007_v41  ;;  %5770 = vmatprep.mubr.msk.f32.mxu1 %vm6467_vm0, %v8188_v42 }
0x15c7   :  { %5773 = vmatprep.subr.mxu1 %v8188_v42 }
0x15c9   :  { %5771 = vmatmul.mubr.msk.f32.vlgmr.msra.gmra.mrb[32].mxu1 %vm289_vm9, %v3005_v5 }
0x15ca   :  { %5775 = vmatprep.mubr.msk.f32.mxu1 %vm6467_vm0, %v8188_v42 }
0x1698   :  { %v7427_v17 = vpop.f32.mrb[30].mxu1 }
0x1699   :  { %v5767_v11 = vpop.f32.mrb[31].mxu1 }
0x169c   :  { %v3078_v20 = vpop.f32.mrb[32].mxu1 }
0x169d   :  { %v5772_v4 = vpop.f32.mrb[33].mxu1  ;;  %v3082_v16 = vsel %vm289_vm9, %v3078_v20, -inf }
0x169e   :  { %3083 = vmax.xlane.f32.xlu1 %v3082_v16 }
0x16af   :  { %3171 = vrot.lane.b32.xlu1 %v7392_v62, %s6472_s28 }
0x16b3   :  { %3169 = vrot.lane.b32.xlu1 %v7399_v46, %s6473_s12 }
0x16b7   :  { %3334 = vrot.lane.b32.xlu1 %v7399_v46, %s6475_s20 }
0x172b   :  { %v3084_v7 = vpop.xlane.xlu1 %3083 }
0x172c   :  { %v3085_v51 = vsub.f32 %v3078_v20, %v3084_v7 }
0x172e   :  { %v3086_v0 = vmul.f32 1.442695, %v3085_v51 }
0x172f   :  { %v3172_v27 = vpop.permute.xlu1 %3171 }
0x1730   :  { %6263 = vpow2.f32 %v3086_v0 }
0x1733   :  { %v3170_v30 = vpop.permute.xlu1 %3169 }
0x1737   :  { %v3335_v36 = vpop.permute.xlu1 %3334 }
0x173a   :  { %v6264_v1 = vpop.eup %6263 }
0x173b   :  { %v3088_v12 = vsel %vm289_vm9, %v6264_v1, 0.0 }
0x173c   :  { %3089 = vadd.xlane.f32.xlu0 %v3088_v12 }
0x1752   :  { %3093 = vrot.lane.b32.xlu0 %v7392_v62, %s8190_s10 }
0x1756   :  { %3336 = vrot.lane.b32.xlu0 %v7392_v62, %s8186_s4 }
0x17c9   :  { %v3090_v9 = vpop.xlane.xlu0 %3089 }
0x17ca   :  { %6265 = vrcp.f32 %v3090_v9 }
0x17cd   :  { %v3094_v29 = vpop.permute.xlu0 %3093 }
0x17ce   :  { %5774 = vmatpush3.msra.mxu1 %v3094_v29 }
0x17cf   :  { %5778 = vmatprep.subr.mxu1 %v8188_v42 }
0x17d1   :  { %v3337_v46 = vpop.permute.xlu0 %3336 }
0x17d2   :  { %5789 = vmatpush3.xpose.msk.msra.mxu0 %vm289_vm9, %v3337_v46 }
0x17d3   :  { %6040 = vmatprep.subr.bf16.mxu0 %v8191_v14 }
0x17d4   :  { %v6266_v33 = vpop.eup %6265 }
0x17d5   :  { %v3092_v39 = vmul.f32 %v6266_v33, %v6264_v1  ;;  %5791 = vmatmul.mubr.msk.f32.vlgmr.msra.gmra.mrb[20].mxu0 %vm289_vm9, %v3335_v36 }
0x17d6   :  { %6042 = vmatpush3.bf16.msra.mxu0 %v6765_v40  ;;  %5806 = vmatprep.mubr.msk.f32.mxu0 %vm6467_vm0, %v8188_v42 }
0x17d7   :  { %3517 = vst.msk [vmem:[#allocation9 + $0x28] sm:$0xff] %vm289_vm9, %v3092_v39  ;;  %5776 = vmatmul.mubr.msk.f32.vlgmr.msra.gmra.mrb[34].mxu1 %vm289_vm9, %v3092_v39  ;;  %6043 = vmatprep.subr.bf16.mxu0 %v8191_v14 }
0x17d8   :  { %5779 = vmatpush3.xpose.msk.msra.mxu1 %vm289_vm9, %v3172_v27  ;;  %5780 = vmatprep.mubr.msk.f32.mxu1 %vm6467_vm0, %v8188_v42 }
0x17d9   :  { %5783 = vmatprep.subr.mxu1 %v8188_v42 }
0x17da   :  { %6045 = vmatpush3.bf16.msra.mxu0 %v6776_v47 }
0x17db   :  { %5781 = vmatmul.mubr.msk.f32.vlgmr.msra.gmra.mrb[36].mxu1 %vm289_vm9, %v3170_v30  ;;  %6053 = vmatprep.subr.bf16.mxu0 %v6856_v25 }
0x17dc   :  { %5785 = vmatprep.mubr.msk.f32.mxu1 %vm6467_vm0, %v8188_v42 }
0x18a8   :  { %v3408_v40 = vpop.f32.mrb[20].mxu0 }
0x18a9   :  { %v5792_v41 = vpop.f32.mrb[21].mxu0  ;;  %v3412_v3 = vsel %vm289_vm9, %v3408_v40, -inf }
0x18aa   :  { %3413 = vmax.xlane.f32.xlu1 %v3412_v3  ;;  %v3165_v5 = vpop.f32.mrb[34].mxu1 }
0x18ab   :  { %v5777_v11 = vpop.f32.mrb[35].mxu1 }
0x18ae   :  { %v3243_v20 = vpop.f32.mrb[36].mxu1 }
0x18af   :  { %v5782_v4 = vpop.f32.mrb[37].mxu1  ;;  %v3247_v16 = vsel %vm289_vm9, %v3243_v20, -inf }
0x18b0   :  { %3248 = vmax.xlane.f32.xlu0 %v3247_v16 }
0x18bb   :  { %3258 = vrot.lane.b32.xlu1 %v7392_v62, %s8192_s30 }
0x18bf   :  { %3500 = vrot.lane.b32.xlu1 %v3165_v5, %s8184_s23 }
0x1937   :  { %v3414_v47 = vpop.xlane.xlu1 %3413 }
0x1938   :  { %v3415_v7 = vsub.f32 %v3408_v40, %v3414_v47 }
0x193a   :  { %v3416_v51 = vmul.f32 1.442695, %v3415_v7 }
0x193b   :  { %v3259_v0 = vpop.permute.xlu1 %3258 }
0x193c   :  { %6267 = vpow2.f32 %v3416_v51  ;;  %5784 = vmatpush3.msra.mxu1 %v3259_v0 }
0x193d   :  { %v3249_v1 = vpop.xlane.xlu0 %3248  ;;  %5793 = vmatprep.subr.mxu1 %v8188_v42 }
0x193e   :  { %v3250_v12 = vsub.f32 %v3243_v20, %v3249_v1 }
0x193f   :  { %v3501_v16 = vpop.permute.xlu1 %3500 }
0x1940   :  { %v3251_v27 = vmul.f32 1.442695, %v3250_v12 }
0x1942   :  { %6269 = vpow2.f32 %v3251_v27 }
0x1946   :  { %v6268_v9 = vpop.eup %6267 }
0x1947   :  { %v3418_v29 = vsel %vm289_vm9, %v6268_v9, 0.0 }
0x1948   :  { %3419 = vadd.xlane.f32.xlu0 %v3418_v29 }
0x194c   :  { %v6270_v30 = vpop.eup %6269 }
0x194d   :  { %v3253_v46 = vsel %vm289_vm9, %v6270_v30, 0.0 }
0x194e   :  { %3254 = vadd.xlane.f32.xlu0 %v3253_v46 }
0x1964   :  { %3423 = vrot.lane.b32.xlu0 %v7392_v62, %s8193_s18 }
0x19d5   :  { %v3420_v33 = vpop.xlane.xlu0 %3419 }
0x19d6   :  { %6271 = vrcp.f32 %v3420_v33 }
0x19db   :  { %v3255_v36 = vpop.xlane.xlu0 %3254 }
0x19dc   :  { %6273 = vrcp.f32 %v3255_v36 }
0x19df   :  { %v3424_v5 = vpop.permute.xlu0 %3423 }
0x19e0   :  { %v6272_v39 = vpop.eup %6271 }
0x19e1   :  { %v3422_v40 = vmul.f32 %v6272_v39, %v6268_v9 }
0x19e3   :  { %3521 = vst.msk [vmem:[#allocation9 + $0x38] sm:$0xff] %vm289_vm9, %v3422_v40 }
0x19e6   :  { %v6274_v41 = vpop.eup %6273 }
0x19e7   :  { %v3257_v3 = vmul.f32 %v6274_v41, %v6270_v30 }
0x19e9   :  { %3519 = vst.msk [vmem:[#allocation9 + $0x30] sm:$0xff] %vm289_vm9, %v3257_v3  ;;  %5786 = vmatmul.mubr.msk.f32.vlgmr.msra.gmra.mrb[38].mxu1 %vm289_vm9, %v3257_v3 }
0x19ea   :  { %5794 = vmatpush3.msra.mxu1 %v3424_v5  ;;  %5795 = vmatprep.mubr.msk.f32.mxu1 %vm6467_vm0, %v8188_v42 }
0x19eb   :  { %6046 = vmatprep.subr.bf16.mxu1 %v8191_v14 }
0x19ed   :  { %5796 = vmatmul.mubr.msk.f32.vlgmr.msra.gmra.mrb[40].mxu1 %vm289_vm9, %v3422_v40 }
0x19ee   :  { %6048 = vmatpush3.bf16.msra.mxu1 %v6936_v19  ;;  %5817 = vmatprep.mubr.msk.f32.mxu1 %vm6467_vm0, %v8188_v42  ;;  %v3511_v19 = vsel %vm289_vm9, %v7427_v17, %v3501_v16  ;;  %v6318_v17 = vld [vmem:[%s8130_s5] ss:$0 sm:$0xff] }
0x19ef   :  { %6049 = vmatprep.subr.bf16.mxu1 %v8191_v14 }
0x19f2   :  { %6051 = vmatpush3.bf16.msra.mxu1 %v6943_v24 }
0x19f3   :  { %6060 = vmatprep.subr.bf16.mxu1 %v8191_v14 }
0x1abc   :  { %v3330_v62 = vpop.f32.mrb[38].mxu1 }
0x1abd   :  { %3504 = vrot.lane.b32.xlu1 %v3330_v62, %s8185_s24  ;;  %v5787_v11 = vpop.f32.mrb[39].mxu1 }
0x1ac0   :  { %v3495_v20 = vpop.f32.mrb[40].mxu1 }
0x1ac1   :  { %3508 = vrot.lane.b32.xlu0 %v3495_v20, %s8187_s21  ;;  %v5797_v4 = vpop.f32.mrb[41].mxu1 }
0x1b2f   :  { %v3505_v47 = vpop.permute.xlu1 %3504 }
0x1b30   :  { %v3512_v7 = vsel %vm960_vm10, %v3511_v19, %v3505_v47 }
0x1b33   :  { %v3509_v51 = vpop.permute.xlu0 %3508 }
0x1b34   :  { %v3513_v24 = vsel %vm962_vm11, %v3512_v7, %v3509_v51 }
0x1b35   :  { %5807 = vmatmul.mubr.msk.f32.vlgmr.msra.gmra.mrb[22].mxu0 %vm212_vm8, %v3513_v24 }
0x1b36   :  { %6055 = vmatpush3.bf16.msra.mxu0 %v6856_v25 }
0x1b37   :  { %6057 = vmatprep.subr.bf16.mxu0 %v6864_v28 }
0x1b3a   :  { %6059 = vmatpush3.bf16.msra.mxu0 %v6864_v28 }
0x1b3b   :  { %6064 = vmatprep.subr.bf16.mxu0 %v8191_v14 }
0x1c08   :  { %v3591_v0 = vpop.f32.mrb[22].mxu0 }
0x1c09   :  { %v3592_v1 = vadd.f32 %v6318_v17, %v3591_v0  ;;  %v5808_v12 = vpop.f32.mrb[23].mxu0 }
0x1c0b   :  { %v3602_v27 = vrot.slane %v3592_v1, 6  ;;  %v3596_v9 = vrot.slane %v3592_v1, 7  ;;  %v3597_v29 = vrot.slane %v3592_v1, 1  ;;  %v3598_v30 = vrot.slane %v3592_v1, 2 }
0x1c0c   :  { %v3599_v46 = vrot.slane %v3592_v1, 3  ;;  %v3600_v33 = vrot.slane %v3592_v1, 4  ;;  %v3601_v25 = vrot.slane %v3592_v1, 5  ;;  %v3612_v36 = vadd.f32 %v7213_v23, %v3592_v1 }
0x1c0d   :  { %v3618_v28 = vadd.f32 %v7295_v49, %v3602_v27  ;;  %v3611_v39 = vadd.f32 %v7204_v44, %v3596_v9  ;;  %v3613_v40 = vadd.f32 %v7217_v26, %v3597_v29  ;;  %v3614_v41 = vadd.f32 %v7235_v50, %v3598_v30 }
0x1c0e   :  { %v3615_v3 = vadd.f32 %v7263_v59, %v3599_v46  ;;  %v3616_v5 = vadd.f32 %v7277_v10, %v3600_v33  ;;  %v3627_v62 = vrot.slane %v3612_v36, 7  ;;  %v3617_v20 = vadd.f32 %v7286_v38, %v3601_v25 }
0x1c0f   :  { %v3639_v11 = vrot.slane %v3618_v28, 1  ;;  %v3629_v4 = vrot.slane %v3613_v40, 6  ;;  %v3631_v16 = vrot.slane %v3614_v41, 5 }
0x1c10   :  { %v3628_v23 = vsel %vm195_vm2, %v3627_v62, %v3611_v39  ;;  %v3633_v26 = vrot.slane %v3615_v3, 4  ;;  %v3635_v47 = vrot.slane %v3616_v5, 3  ;;  %v3637_v10 = vrot.slane %v3617_v20, 2 }
0x1c11   :  { %v3646_v49 = vsel %vm2743_vm14, %v3639_v11, 0.0  ;;  %v3630_v44 = vsel %vm198_vm3, %v3629_v4, %v3628_v23 }
0x1c12   :  { %3647 = vadd.xlane.f32.xlu0 %v3646_v49  ;;  %v3632_v50 = vsel %vm201_vm4, %v3631_v16, %v3630_v44 }
0x1c13   :  { %v3634_v59 = vsel %vm204_vm5, %v3633_v26, %v3632_v50 }
0x1c14   :  { %v3636_v19 = vsel %vm207_vm6, %v3635_v47, %v3634_v59 }
0x1c15   :  { %v3638_v38 = vsel %vm210_vm7, %v3637_v10, %v3636_v19 }
0x1c16   :  { %v3643_v7 = vsel %vm3642_vm15, %v3638_v38, 0.0 }
0x1c17   :  { %3644 = vadd.xlane.f32.xlu1 %v3643_v7 }
0x1c9f   :  { %v3648_v51 = vpop.xlane.xlu0 %3647 }
0x1ca0   :  { %v3650_v24 = vmul.f32 0.03125, %v3648_v51 }
0x1ca2   :  { %v3659_v0 = vrot.slane %v3650_v24, 7 }
0x1ca4   :  { %v7513_v17 = vsub.f32 %v3618_v28, %v3659_v0  ;;  %v3645_v1 = vpop.xlane.xlu1 %3644 }
0x1ca5   :  { %v3649_v12 = vmul.f32 0.03125, %v3645_v1 }
0x1ca6   :  { %v3683_v27 = vmul.f32 %v7513_v17, %v7513_v17 }
0x1ca7   :  { %v3653_v9 = vrot.slane %v3649_v12, 1  ;;  %v3654_v29 = vrot.slane %v3649_v12, 2  ;;  %v3655_v30 = vrot.slane %v3649_v12, 3  ;;  %v3656_v46 = vrot.slane %v3649_v12, 4 }
0x1ca8   :  { %v3704_v33 = vrot.slane %v3683_v27, 1  ;;  %v3657_v25 = vrot.slane %v3649_v12, 5  ;;  %v3658_v62 = vrot.slane %v3649_v12, 6  ;;  %v7517_v11 = vsub.f32 %v3611_v39, %v3649_v12 }
0x1ca9   :  { %v7519_v4 = vsub.f32 %v3612_v36, %v3653_v9  ;;  %v7521_v16 = vsub.f32 %v3613_v40, %v3654_v29  ;;  %v7523_v28 = vsub.f32 %v3614_v41, %v3655_v30  ;;  %v7525_v23 = vsub.f32 %v3615_v3, %v3656_v46  ;;  %v6319_v9 = vld [vmem:[%s8180_s26] sm:$0x3]  ;;  %v6320_v30 = vld [vmem:[%s8180_s26 + $0x10] sm:$0x3] }
0x1caa   :  { %v3710_v49 = vsel %vm2743_vm14, %v3704_v33, 0.0  ;;  %v7528_v44 = vsub.f32 %v3616_v5, %v3657_v25  ;;  %v7530_v26 = vsub.f32 %v3617_v20, %v3658_v62  ;;  %v3676_v41 = vmul.f32 %v7517_v11, %v7517_v11  ;;  %v6321_v33 = vld [vmem:[%s8180_s26 + $0x2] sm:$0x3]  ;;  %v6322_v62 = vld [vmem:[%s8180_s26 + $0x4] sm:$0x3] }
0x1cab   :  { %3711 = vadd.xlane.f32.xlu1 %v3710_v49  ;;  %v3677_v50 = vmul.f32 %v7519_v4, %v7519_v4  ;;  %v3678_v36 = vmul.f32 %v7521_v16, %v7521_v16  ;;  %v3679_v39 = vmul.f32 %v7523_v28, %v7523_v28  ;;  %v3680_v40 = vmul.f32 %v7525_v23, %v7525_v23 }
0x1cac   :  { %v3681_v3 = vmul.f32 %v7528_v44, %v7528_v44  ;;  %v3682_v47 = vmul.f32 %v7530_v26, %v7530_v26  ;;  %v3855_v29 = vrot.slane %v6319_v9, 1  ;;  %v3869_v46 = vrot.slane %v6320_v30, 1  ;;  %v6332_v9 = vld [vmem:[%s8180_s26 + $0x1a] sm:$0x3] }
0x1cad   :  { %v3692_v5 = vrot.slane %v3677_v50, 7  ;;  %v3694_v20 = vrot.slane %v3678_v36, 6  ;;  %v3696_v10 = vrot.slane %v3679_v39, 5  ;;  %v3698_v38 = vrot.slane %v3680_v40, 4  ;;  %v6323_v50 = vld [vmem:[%s8180_s26 + $0x6] sm:$0x3] }
0x1cae   :  { %v3700_v51 = vrot.slane %v3681_v3, 3  ;;  %v3702_v0 = vrot.slane %v3682_v47, 2  ;;  %v3856_v25 = vsel %vm192_vm1, %v6321_v33, %v3855_v29  ;;  %v3857_v49 = vrot.slane %v6322_v62, 7  ;;  %v6324_v39 = vld [vmem:[%s8180_s26 + $0x8] sm:$0x3] }
0x1caf   :  { %v3693_v59 = vsel %vm195_vm2, %v3692_v5, %v3676_v41  ;;  %v3859_v36 = vrot.slane %v6323_v50, 6  ;;  %v3861_v40 = vrot.slane %v6324_v39, 5  ;;  %v6325_v41 = vld [vmem:[%s8180_s26 + $0xa] sm:$0x3]  ;;  %v6326_v5 = vld [vmem:[%s8180_s26 + $0xc] sm:$0x3] }
0x1cb0   :  { %v3695_v19 = vsel %vm198_vm3, %v3694_v20, %v3693_v59  ;;  %v3863_v3 = vrot.slane %v6325_v41, 4  ;;  %v3865_v20 = vrot.slane %v6326_v5, 3  ;;  %v6327_v47 = vld [vmem:[%s8180_s26 + $0x12] sm:$0x3]  ;;  %v3877_v29 = vrot.slane %v6332_v9, 4 }
0x1cb1   :  { %v3697_v7 = vsel %vm201_vm4, %v3696_v10, %v3695_v19  ;;  %v3870_v59 = vsel %vm192_vm1, %v6327_v47, %v3869_v46  ;;  %v3858_v10 = vsel %vm195_vm2, %v3857_v49, %v3856_v25  ;;  %v6328_v19 = vld [vmem:[%s8180_s26 + $0x14] sm:$0x3]  ;;  %v6333_v33 = vld [vmem:[%s8180_s26 + $0x1c] sm:$0x3]  ;;  %v6334_v50 = vld [vmem:[%s8180_s26 + $0x1e] sm:$0x3] }
0x1cb2   :  { %v3699_v24 = vsel %vm204_vm5, %v3698_v38, %v3697_v7  ;;  %v3871_v38 = vrot.slane %v6328_v19, 7  ;;  %v6329_v7 = vld [vmem:[%s8180_s26 + $0x16] sm:$0x3]  ;;  %v3879_v25 = vrot.slane %v6333_v33, 3 }
0x1cb3   :  { %v3701_v1 = vsel %vm207_vm6, %v3700_v51, %v3699_v24  ;;  %v3873_v51 = vrot.slane %v6329_v7, 6  ;;  %v6330_v24 = vld [vmem:[%s8180_s26 + $0x18] sm:$0x3] }
0x1cb4   :  { %v3703_v12 = vsel %vm210_vm7, %v3702_v0, %v3701_v1  ;;  %v3875_v0 = vrot.slane %v6330_v24, 5  ;;  %v3860_v1 = vsel %vm198_vm3, %v3859_v36, %v3858_v10  ;;  %v3872_v46 = vsel %vm195_vm2, %v3871_v38, %v3870_v59 }
0x1cb5   :  { %v3707_v27 = vsel %vm3642_vm15, %v3703_v12, 0.0  ;;  %v6331_v12 = vld [vmem:[%s8180_s26 + $0xe] sm:$0x3]  ;;  %v3862_v30 = vsel %vm201_vm4, %v3861_v40, %v3860_v1  ;;  %v3874_v49 = vsel %vm198_vm3, %v3873_v51, %v3872_v46  ;;  %v3881_v36 = vrot.slane %v6334_v50, 2 }
0x1cb6   :  { %3708 = vadd.xlane.f32.xlu0 %v3707_v27  ;;  %v3867_v27 = vrot.slane %v6331_v12, 2  ;;  %v3864_v62 = vsel %vm204_vm5, %v3863_v3, %v3862_v30  ;;  %v3876_v40 = vsel %vm201_vm4, %v3875_v0, %v3874_v49 }
0x1cb7   :  { %v3866_v39 = vsel %vm207_vm6, %v3865_v20, %v3864_v62  ;;  %v3878_v5 = vsel %vm204_vm5, %v3877_v29, %v3876_v40 }
0x1cb8   :  { %v3868_v41 = vsel %vm210_vm7, %v3867_v27, %v3866_v39  ;;  %v3880_v47 = vsel %vm207_vm6, %v3879_v25, %v3878_v5 }
0x1cb9   :  { %5828 = vmatprep.mubr.msk.f32.mxu0 %vm212_vm8, %v3868_v41  ;;  %v3882_v3 = vsel %vm210_vm7, %v3881_v36, %v3880_v47 }
0x1cba   :  { %5829 = vmatmul.mubr.msk.f32.vlgmr.msra.gmra.mrb[24].mxu0 %vm212_vm8, %v3882_v3 }
0x1cbb   :  { %5842 = vmatprep.mubr.msk.f32.mxu0 %vm6467_vm0, %v8188_v42 }
0x1d38   :  { %v3712_v59 = vpop.xlane.xlu1 %3711 }
0x1d39   :  { %v3714_v10 = vmul.f32 0.03125, %v3712_v59 }
0x1d3b   :  { %v3716_v20 = vadd.f32 1e-05, %v3714_v10 }
0x1d3d   :  { %6275 = vrsqrt.f32 %v3716_v20 }
0x1d43   :  { %v3709_v19 = vpop.xlane.xlu0 %3708 }
0x1d44   :  { %v3713_v38 = vmul.f32 0.03125, %v3709_v19 }
0x1d46   :  { %v3715_v7 = vadd.f32 1e-05, %v3713_v38 }
0x1d47   :  { %v6276_v51 = vpop.eup %6275 }
0x1d48   :  { %6277 = vrsqrt.f32 %v3715_v7  ;;  %v3727_v24 = vrot.slane %v6276_v51, 7 }
0x1d4a   :  { %v3743_v29 = vmul.f32 %v3727_v24, %v7513_v17 }
0x1d52   :  { %v6278_v0 = vpop.eup %6277 }
0x1d53   :  { %v3721_v1 = vrot.slane %v6278_v0, 1  ;;  %v3722_v12 = vrot.slane %v6278_v0, 2  ;;  %v3723_v27 = vrot.slane %v6278_v0, 3  ;;  %v3724_v9 = vrot.slane %v6278_v0, 4 }
0x1d54   :  { %v3725_v30 = vrot.slane %v6278_v0, 5  ;;  %v3726_v46 = vrot.slane %v6278_v0, 6  ;;  %v3736_v33 = vmul.f32 %v6278_v0, %v7517_v11 }
0x1d55   :  { %v3737_v25 = vmul.f32 %v3721_v1, %v7519_v4  ;;  %v3738_v62 = vmul.f32 %v3722_v12, %v7521_v16  ;;  %v3739_v49 = vmul.f32 %v3723_v27, %v7523_v28  ;;  %v3740_v50 = vmul.f32 %v3724_v9, %v7525_v23 }
0x1d56   :  { %v3741_v36 = vmul.f32 %v3725_v30, %v7528_v44  ;;  %v3742_v39 = vmul.f32 %v3726_v46, %v7530_v26  ;;  %v3744_v40 = vmul.f32 %v3736_v33, %v6968_v18  ;;  %v3751_v16 = vmul.f32 %v3743_v29, %v6968_v18  ;;  %v6335_v33 = vld [vmem:[%s8134_s9] ss:$0 sm:$0xff] }
0x1d57   :  { %v3745_v17 = vmul.f32 %v3737_v25, %v6968_v18  ;;  %v3746_v41 = vmul.f32 %v3738_v62, %v6968_v18  ;;  %v3747_v11 = vmul.f32 %v3739_v49, %v6968_v18  ;;  %v3748_v4 = vmul.f32 %v3740_v50, %v6968_v18 }
0x1d58   :  { %v3749_v28 = vmul.f32 %v3741_v36, %v6968_v18  ;;  %v3750_v23 = vmul.f32 %v3742_v39, %v6968_v18  ;;  %v7636_v44 = vadd.f32 %v3744_v40, %v6971_v32  ;;  %v7660_v38 = vadd.f32 %v3751_v16, %v6971_v32 }
0x1d59   :  { %v7639_v26 = vadd.f32 %v3745_v17, %v6971_v32  ;;  %v7642_v5 = vadd.f32 %v3746_v41, %v6971_v32  ;;  %v7645_v47 = vadd.f32 %v3747_v11, %v6971_v32  ;;  %v7648_v3 = vadd.f32 %v3748_v4, %v6971_v32  ;;  %v6336_v11 = vld [vmem:[%s8132_s7] ss:$0 sm:$0xff] }
0x1d5a   :  { %v7651_v59 = vadd.f32 %v3749_v28, %v6971_v32  ;;  %v3768_v18 = vrot.slane %v7636_v44, 1  ;;  %v7655_v10 = vadd.f32 %v3750_v23, %v6971_v32  ;;  %v3780_v32 = vrot.slane %v7660_v38, 2 }
0x1d5b   :  { %v3770_v20 = vrot.slane %v7642_v5, 7  ;;  %v3772_v19 = vrot.slane %v7645_v47, 6  ;;  %v3774_v24 = vrot.slane %v7648_v3, 5 }
0x1d5c   :  { %v3769_v7 = vsel %vm192_vm1, %v7639_v26, %v3768_v18  ;;  %v3776_v1 = vrot.slane %v7651_v59, 4  ;;  %v3778_v27 = vrot.slane %v7655_v10, 3 }
0x1d5d   :  { %v3771_v51 = vsel %vm195_vm2, %v3770_v20, %v3769_v7 }
0x1d5e   :  { %v3773_v0 = vsel %vm198_vm3, %v3772_v19, %v3771_v51 }
0x1d5f   :  { %v3775_v12 = vsel %vm201_vm4, %v3774_v24, %v3773_v0 }
0x1d60   :  { %v3777_v9 = vsel %vm204_vm5, %v3776_v1, %v3775_v12 }
0x1d61   :  { %v3779_v29 = vsel %vm207_vm6, %v3778_v27, %v3777_v9 }
0x1d62   :  { %v3781_v30 = vsel %vm210_vm7, %v3780_v32, %v3779_v29 }
0x1d63   :  { %5818 = vmatmul.mubr.msk.f32.vlgmr.msra.gmra.mrb[42].mxu1 %vm212_vm8, %v3781_v30 }
0x1d64   :  { %5835 = vmatprep.mubr.msk.f32.mxu1 %vm6467_vm0, %v8188_v42 }
0x1d8d   :  { %v5830_v46 = vpop.f32.mrb[24].mxu0 }
0x1d8e   :  { %v3959_v25 = vadd.f32 %v6335_v33, %v5830_v46  ;;  %v3953_v62 = vpop.f32.mrb[25].mxu0 }
0x1d8f   :  { %v3954_v49 = vadd.f32 %v6335_v33, %v3953_v62 }
0x1d91   :  { %v7680_v50 = vpack.i.bf16 %v3959_v25, %v3954_v49  ;;  %v6061_v36 = vpack.c.bf16 %v3959_v25, %v3954_v49 }
0x1d93   :  { %6185 = vrot.lane.b32.xlu0 %v7680_v50, %s6470_s27  ;;  %6063 = vmatpush3.bf16.xpose.msk.msra.mxu1 %vm7036_vm12, %v6061_v36 }
0x1d94   :  { %6067 = vmatprep.subr.bf16.mxu1 %v8191_v14 }
0x1e05   :  { %v6186_v39 = vpop.permute.xlu0 %6185 }
0x1e06   :  { %v6188_v40 = vunpack.i.h.bf16 %v6186_v39  ;;  %v6187_v17 = vunpack.i.l.bf16 %v6186_v39 }
0x1e08   :  { %v6068_v28 = vpack.c.bf16 %v6188_v40, %v6187_v17 }
0x1e36   :  { %v3850_v41 = vpop.f32.mrb[42].mxu1 }
0x1e37   :  { %v3851_v4 = vadd.f32 %v6336_v11, %v3850_v41  ;;  %v5819_v16 = vpop.f32.mrb[43].mxu1 }
0x1e39   :  { %v7690_v23 = vmul.f32 0.35355338, %v3851_v4 }
0x1e3b   :  { %4131 = vrot.lane.b32.xlu1 %v7690_v23, %s6470_s27  ;;  %5836 = vmatmul.mubr.msk.f32.vlgmr.msra.gmra.mrb[44].mxu1 %vm289_vm9, %v7690_v23 }
0x1e3c   :  { %6070 = vmatpush3.bf16.xpose.msk.msra.mxu1 %vm7036_vm12, %v6068_v28  ;;  %5849 = vmatprep.mubr.msk.f32.mxu1 %vm6467_vm0, %v8188_v42 }
0x1e3d   :  { %6078 = vmatprep.subr.bf16.mxu1 %v8191_v14 }
0x1ead   :  { %v4132_v18 = vpop.permute.xlu1 %4131 }
0x1eae   :  { %5850 = vmatmul.mubr.msk.f32.vlgmr.msra.gmra.mrb[46].mxu1 %vm289_vm9, %v4132_v18 }
0x1eaf   :  { %5870 = vmatprep.mubr.msk.f32.mxu1 %vm6467_vm0, %v8188_v42 }
0x1f0e   :  { %v4037_v20 = vpop.f32.mrb[44].mxu1 }
0x1f0f   :  { %v5837_v19 = vpop.f32.mrb[45].mxu1  ;;  %v4041_v7 = vsel %vm960_vm10, %v4037_v20, -inf }
0x1f10   :  { %4042 = vmax.xlane.f32.xlu1 %v4041_v7 }
0x1f21   :  { %6195 = vrot.lane.b32.xlu1 %v7680_v50, %s6471_s3 }
0x1f81   :  { %v4209_v51 = vpop.f32.mrb[46].mxu1 }
0x1f82   :  { %v5851_v24 = vpop.f32.mrb[47].mxu1  ;;  %v4213_v0 = vsel %vm960_vm10, %v4209_v51, -inf }
0x1f83   :  { %4214 = vmax.xlane.f32.xlu0 %v4213_v0 }
0x1f9d   :  { %v4043_v1 = vpop.xlane.xlu1 %4042 }
0x1f9e   :  { %v4044_v12 = vsub.f32 %v4037_v20, %v4043_v1 }
0x1fa0   :  { %v4045_v27 = vmul.f32 1.442695, %v4044_v12 }
0x1fa1   :  { %v6196_v40 = vpop.permute.xlu1 %6195 }
0x1fa2   :  { %6279 = vpow2.f32 %v4045_v27  ;;  %v6198_v41 = vunpack.i.h.bf16 %v6196_v40  ;;  %v6197_v11 = vunpack.i.l.bf16 %v6196_v40 }
0x1fa4   :  { %v6072_v28 = vpack.c.bf16 %v6198_v41, %v6197_v11 }
0x1fac   :  { %v6280_v9 = vpop.eup %6279 }
0x1fad   :  { %v4047_v32 = vsel %vm960_vm10, %v6280_v9, 0.0 }
0x1fae   :  { %4048 = vadd.xlane.f32.xlu0 %v4047_v32 }
0x1fc4   :  { %6190 = vrot.lane.b32.xlu0 %v7680_v50, %s6469_s1 }
0x1fc8   :  { %4303 = vrot.lane.b32.xlu0 %v7690_v23, %s6473_s12 }
0x2010   :  { %v4215_v29 = vpop.xlane.xlu0 %4214 }
0x2011   :  { %v4216_v30 = vsub.f32 %v4209_v51, %v4215_v29 }
0x2013   :  { %v4217_v46 = vmul.f32 1.442695, %v4216_v30 }
0x2015   :  { %6281 = vpow2.f32 %v4217_v46 }
0x201f   :  { %v6282_v33 = vpop.eup %6281 }
0x2020   :  { %v4219_v25 = vsel %vm960_vm10, %v6282_v33, 0.0 }
0x2021   :  { %4220 = vadd.xlane.f32.xlu1 %v4219_v25 }
0x2032   :  { %6200 = vrot.lane.b32.xlu1 %v7680_v50, %s6473_s12 }
0x203b   :  { %v4049_v62 = vpop.xlane.xlu0 %4048 }
0x203c   :  { %6283 = vrcp.f32 %v4049_v62 }
0x203f   :  { %v6191_v49 = vpop.permute.xlu0 %6190 }
0x2040   :  { %v6193_v36 = vunpack.i.h.bf16 %v6191_v49  ;;  %v6192_v39 = vunpack.i.l.bf16 %v6191_v49 }
0x2042   :  { %v6065_v17 = vpack.c.bf16 %v6193_v36, %v6192_v39 }
0x2043   :  { %v4304_v1 = vpop.permute.xlu0 %4303 }
0x2044   :  { %6066 = vmatpush3.bf16.msra.mxu0 %v6065_v17 }
0x2045   :  { %6071 = vmatprep.subr.bf16.mxu0 %v8191_v14 }
0x2046   :  { %v6284_v4 = vpop.eup %6283 }
0x2047   :  { %v4051_v16 = vmul.f32 %v6284_v4, %v6280_v9 }
0x2049   :  { %5843 = vmatmul.mubr.msk.f32.vlgmr.msra.gmra.mrb[26].mxu0 %vm960_vm10, %v4051_v16 }
0x204a   :  { %6073 = vmatpush3.bf16.msra.mxu0 %v6072_v28  ;;  %5856 = vmatprep.mubr.msk.f32.mxu0 %vm6467_vm0, %v8188_v42 }
0x204b   :  { %6074 = vmatprep.subr.bf16.mxu0 %v8191_v14 }
0x20ae   :  { %v4221_v18 = vpop.xlane.xlu1 %4220 }
0x20af   :  { %6285 = vrcp.f32 %v4221_v18 }
0x20b2   :  { %v6201_v20 = vpop.permute.xlu1 %6200 }
0x20b3   :  { %v6203_v19 = vunpack.i.h.bf16 %v6201_v20  ;;  %v6202_v7 = vunpack.i.l.bf16 %v6201_v20 }
0x20b5   :  { %v6075_v0 = vpack.c.bf16 %v6203_v19, %v6202_v7 }
0x20b9   :  { %v6286_v51 = vpop.eup %6285 }
0x20ba   :  { %v4223_v24 = vmul.f32 %v6286_v51, %v6282_v33 }
0x20bc   :  { %5857 = vmatmul.mubr.msk.f32.vlgmr.msra.gmra.mrb[28].mxu0 %vm960_vm10, %v4223_v24 }
0x20bd   :  { %6077 = vmatpush3.bf16.xpose.msk.msra.mxu0 %vm7036_vm12, %v6075_v0  ;;  %5863 = vmatprep.mubr.msk.f32.mxu0 %vm6467_vm0, %v8188_v42 }
0x20be   :  { %6085 = vmatprep.subr.bf16.mxu0 %v8191_v14 }
0x20c4   :  { %5864 = vmatmul.mubr.msk.f32.vlgmr.msra.gmra.mrb[30].mxu0 %vm289_vm9, %v4304_v1 }
0x20c5   :  { %5884 = vmatprep.mubr.msk.f32.mxu0 %vm6467_vm0, %v8188_v42 }
0x211c   :  { %v7730_v12 = vpop.f32.mrb[26].mxu0 }
0x211d   :  { %v5844_v27 = vpop.f32.mrb[27].mxu0 }
0x218f   :  { %v4299_v9 = vpop.f32.mrb[28].mxu0 }
0x2190   :  { %v5858_v32 = vpop.f32.mrb[29].mxu0 }
0x2197   :  { %v4381_v29 = vpop.f32.mrb[30].mxu0 }
0x2198   :  { %v5865_v30 = vpop.f32.mrb[31].mxu0  ;;  %v4385_v46 = vsel %vm960_vm10, %v4381_v29, -inf }
0x2199   :  { %4386 = vmax.xlane.f32.xlu1 %v4385_v46 }
0x21aa   :  { %6210 = vrot.lane.b32.xlu1 %v7680_v50, %s6475_s20 }
0x21ae   :  { %4475 = vrot.lane.b32.xlu1 %v7690_v23, %s6475_s20 }
0x2226   :  { %v4387_v33 = vpop.xlane.xlu1 %4386 }
0x2227   :  { %v4388_v25 = vsub.f32 %v4381_v29, %v4387_v33 }
0x2229   :  { %v4389_v62 = vmul.f32 1.442695, %v4388_v25 }
0x222a   :  { %v6211_v4 = vpop.permute.xlu1 %6210 }
0x222b   :  { %6287 = vpow2.f32 %v4389_v62  ;;  %v6213_v16 = vunpack.i.h.bf16 %v6211_v4  ;;  %v6212_v28 = vunpack.i.l.bf16 %v6211_v4 }
0x222d   :  { %v6082_v20 = vpack.c.bf16 %v6213_v16, %v6212_v28 }
0x222e   :  { %v4476_v19 = vpop.permute.xlu1 %4475 }
0x2235   :  { %v6288_v49 = vpop.eup %6287 }
0x2236   :  { %v4391_v36 = vsel %vm960_vm10, %v6288_v49, 0.0 }
0x2237   :  { %4392 = vadd.xlane.f32.xlu0 %v4391_v36 }
0x224d   :  { %6205 = vrot.lane.b32.xlu0 %v7680_v50, %s6472_s28 }
0x22c4   :  { %v4393_v39 = vpop.xlane.xlu0 %4392 }
0x22c5   :  { %6289 = vrcp.f32 %v4393_v39 }
0x22c8   :  { %v6206_v40 = vpop.permute.xlu0 %6205 }
0x22c9   :  { %v6208_v17 = vunpack.i.h.bf16 %v6206_v40  ;;  %v6207_v41 = vunpack.i.l.bf16 %v6206_v40 }
0x22cb   :  { %v6079_v11 = vpack.c.bf16 %v6208_v17, %v6207_v41 }
0x22cd   :  { %6080 = vmatpush3.bf16.msra.mxu1 %v6079_v11 }
0x22ce   :  { %6081 = vmatprep.subr.bf16.mxu1 %v8191_v14 }
0x22cf   :  { %v6290_v23 = vpop.eup %6289 }
0x22d0   :  { %v4395_v18 = vmul.f32 %v6290_v23, %v6288_v49 }
0x22d2   :  { %5871 = vmatmul.mubr.msk.f32.vlgmr.msra.gmra.mrb[48].mxu1 %vm960_vm10, %v4395_v18 }
0x22d3   :  { %5877 = vmatprep.mubr.msk.f32.mxu1 %vm6467_vm0, %v8188_v42 }
0x22d6   :  { %6084 = vmatpush3.bf16.xpose.msk.msra.mxu1 %vm7036_vm12, %v6082_v20 }
0x22d7   :  { %6094 = vmatprep.subr.bf16.mxu1 %v8191_v14 }
0x22dd   :  { %5878 = vmatmul.mubr.msk.f32.vlgmr.msra.gmra.mrb[50].mxu1 %vm289_vm9, %v4476_v19 }
0x22de   :  { %6096 = vmatpush3.bf16.msra.mxu1 %v7195_v56  ;;  %5906 = vmatprep.mubr.msk.f32.mxu1 %vm6467_vm0, %v8188_v42 }
0x22df   :  { %6097 = vmatprep.subr.bf16.mxu1 %v8191_v14 }
0x22e2   :  { %6099 = vmatpush3.bf16.msra.mxu1 %v7198_v6 }
0x23a5   :  { %v4471_v7 = vpop.f32.mrb[48].mxu1 }
0x23a6   :  { %v5872_v51 = vpop.f32.mrb[49].mxu1 }
0x23b0   :  { %v4553_v24 = vpop.f32.mrb[50].mxu1 }
0x23b1   :  { %v5879_v0 = vpop.f32.mrb[51].mxu1  ;;  %v4557_v34 = vsel %vm960_vm10, %v4553_v24, -inf }
0x23b2   :  { %4558 = vmax.xlane.f32.xlu0 %v4557_v34 }
0x23c8   :  { %6215 = vrot.lane.b32.xlu0 %v7680_v50, %s8186_s4 }
0x23cc   :  { %4652 = vrot.lane.b32.xlu0 %v4471_v7, %s8185_s24  ;;  %v6337_v7 = vld [vmem:[%s8136_s11] ss:$0 sm:$0xff] }
0x243f   :  { %v4559_v56 = vpop.xlane.xlu0 %4558 }
0x2440   :  { %v4560_v1 = vsub.f32 %v4553_v24, %v4559_v56 }
0x2442   :  { %v4561_v27 = vmul.f32 1.442695, %v4560_v1 }
0x2443   :  { %v6216_v32 = vpop.permute.xlu0 %6215 }
0x2444   :  { %6291 = vpow2.f32 %v4561_v27  ;;  %v6218_v29 = vunpack.i.h.bf16 %v6216_v32  ;;  %v6217_v30 = vunpack.i.l.bf16 %v6216_v32 }
0x2446   :  { %v6086_v6 = vpack.c.bf16 %v6218_v29, %v6217_v30 }
0x2447   :  { %v4653_v40 = vpop.permute.xlu0 %4652 }
0x2448   :  { %6087 = vmatpush3.bf16.msra.mxu0 %v6086_v6 }
0x2449   :  { %6088 = vmatprep.subr.bf16.mxu0 %v8191_v14 }
0x244e   :  { %v6292_v46 = vpop.eup %6291 }
0x244f   :  { %v4563_v33 = vsel %vm960_vm10, %v6292_v46, 0.0 }
0x2450   :  { %4564 = vadd.xlane.f32.xlu1 %v4563_v33 }
0x2461   :  { %4648 = vrot.lane.b32.xlu1 %v4299_v9, %s8184_s23 }
0x24dd   :  { %v4565_v50 = vpop.xlane.xlu1 %4564 }
0x24de   :  { %6293 = vrcp.f32 %v4565_v50 }
0x24e1   :  { %v4649_v36 = vpop.permute.xlu1 %4648 }
0x24e2   :  { %v4659_v39 = vsel %vm289_vm9, %v7730_v12, %v4649_v36 }
0x24e8   :  { %v6294_v25 = vpop.eup %6293 }
0x24e9   :  { %v4567_v62 = vmul.f32 %v6294_v25, %v6292_v46 }
0x24eb   :  { %5885 = vmatmul.mubr.msk.f32.vlgmr.msra.gmra.mrb[32].mxu0 %vm960_vm10, %v4567_v62 }
0x24ec   :  { %6090 = vmatpush3.bf16.msra.mxu0 %v7120_v35  ;;  %5895 = vmatprep.mubr.msk.f32.mxu0 %vm6467_vm0, %v8188_v42  ;;  %v4660_v35 = vsel %vm960_vm10, %v4659_v39, %v4653_v40 }
0x24ed   :  { %6091 = vmatprep.subr.bf16.mxu0 %v8191_v14 }
0x24f0   :  { %6093 = vmatpush3.bf16.msra.mxu0 %v7123_v43  ;;  %v7793_v43 = vld [vmem:[%s8140_s15] ss:$0 sm:$0xff] }
0x24f1   :  { %6100 = vmatprep.subr.bf16.mxu0 %v8191_v14 }
0x25be   :  { %v4643_v49 = vpop.f32.mrb[32].mxu0 }
0x25bf   :  { %4656 = vrot.lane.b32.xlu1 %v4643_v49, %s8187_s21  ;;  %v5886_v9 = vpop.f32.mrb[33].mxu0 }
0x2631   :  { %v4657_v17 = vpop.permute.xlu1 %4656 }
0x2632   :  { %v4661_v41 = vsel %vm962_vm11, %v4660_v35, %v4657_v17 }
0x2633   :  { %5896 = vmatmul.mubr.msk.f32.vlgmr.msra.gmra.mrb[34].mxu0 %vm212_vm8, %v4661_v41 }
0x2634   :  { %6102 = vmatpush3.bf16.msra.mxu0 %v7312_v55  ;;  %5941 = vmatprep.mubr.msk.f32.mxu0 %vm6467_vm0, %v8188_v42  ;;  %v2580_v55 = vadd.f32 %v7793_v43, %v7411_v15 }
0x2635   :  { %6103 = vmatprep.subr.bf16.mxu0 %v8191_v14 }
0x2636   :  { %v2587_v42 = vrot.slane %v2580_v55, 4  ;;  %v2589_v4 = vrot.slane %v2580_v55, 6  ;;  %v2590_v28 = vrot.slane %v2580_v55, 7 }
0x2638   :  { %6105 = vmatpush3.bf16.msra.mxu0 %v7322_v21  ;;  %v2584_v21 = vrot.slane %v2580_v55, 1  ;;  %v7814_v11 = vadd.f32 %v2587_v42, %v7249_v61  ;;  %v7824_v18 = vadd.f32 %v2589_v4, %v7261_v58  ;;  %v7832_v24 = vadd.f32 %v2590_v28, %v7267_v45 }
0x2639   :  { %6106 = vmatprep.subr.bf16.mxu0 %v8191_v14 }
0x263a   :  { %v2625_v34 = vrot.slane %v7824_v18, 2 }
0x263c   :  { %6108 = vmatpush3.bf16.msra.mxu0 %v7332_v57  ;;  %v2585_v57 = vrot.slane %v2580_v55, 2 }
0x263d   :  { %6109 = vmatprep.subr.bf16.mxu0 %v8191_v14 }
0x2640   :  { %6111 = vmatpush3.bf16.msra.mxu0 %v7342_v53  ;;  %v7798_v53 = vadd.f32 %v2584_v21, %v7240_v22  ;;  %v2588_v22 = vrot.slane %v2580_v55, 5 }
0x2641   :  { %6112 = vmatprep.subr.bf16.mxu0 %v8191_v14 }
0x2644   :  { %6114 = vmatpush3.bf16.msra.mxu0 %v7352_v8  ;;  %v7801_v8 = vadd.f32 %v2585_v57, %v7243_v60 }
0x2645   :  { %6115 = vmatprep.subr.bf16.mxu0 %v8191_v14 }
0x2648   :  { %6117 = vmatpush3.bf16.msra.mxu0 %v7362_v13  ;;  %v2586_v13 = vrot.slane %v2580_v55, 3 }
0x2649   :  { %6118 = vmatprep.subr.bf16.mxu0 %v8191_v14 }
0x264a   :  { %v7809_v12 = vadd.f32 %v2586_v13, %v7246_v52  ;;  %v2621_v52 = vrot.slane %v7814_v11, 4 }
0x264c   :  { %6120 = vmatpush3.bf16.msra.mxu0 %v7372_v31  ;;  %v2615_v31 = vrot.slane %v7798_v53, 7  ;;  %v2619_v23 = vrot.slane %v7809_v12, 5 }
0x264d   :  { %6121 = vmatprep.subr.bf16.mxu0 %v8191_v14  ;;  %v2617_v14 = vrot.slane %v7801_v8, 6 }
0x2650   :  { %6123 = vmatpush3.bf16.msra.mxu0 %v7382_v37  ;;  %v7805_v37 = vadd.f32 %v2580_v55, %v7253_v63  ;;  %v7819_v63 = vadd.f32 %v2588_v22, %v7256_v54 }
0x2652   :  { %v2616_v15 = vsel %vm192_vm1, %v2615_v31, %v7805_v37  ;;  %v2623_v19 = vrot.slane %v7819_v63, 3 }
0x2653   :  { %v2618_v60 = vsel %vm195_vm2, %v2617_v14, %v2616_v15 }
0x2654   :  { %v2620_v16 = vsel %vm198_vm3, %v2619_v23, %v2618_v60 }
0x2655   :  { %v2622_v20 = vsel %vm201_vm4, %v2621_v52, %v2620_v16 }
0x2656   :  { %v2624_v0 = vsel %vm204_vm5, %v2623_v19, %v2622_v20 }
0x2657   :  { %v2626_v25 = vsel %vm207_vm6, %v2625_v34, %v2624_v0 }
0x2706   :  { %v4731_v61 = vpop.f32.mrb[34].mxu0 }
0x2707   :  { %v4732_v51 = vadd.f32 %v6337_v7, %v4731_v61  ;;  %v5897_v54 = vpop.f32.mrb[35].mxu0 }
0x2709   :  { %v4742_v58 = vrot.slane %v4732_v51, 6  ;;  %v4736_v56 = vrot.slane %v4732_v51, 7  ;;  %v4737_v1 = vrot.slane %v4732_v51, 1  ;;  %v4738_v27 = vrot.slane %v4732_v51, 2 }
0x270a   :  { %v4739_v32 = vrot.slane %v4732_v51, 3  ;;  %v4740_v29 = vrot.slane %v4732_v51, 4  ;;  %v4741_v30 = vrot.slane %v4732_v51, 5  ;;  %v4752_v6 = vadd.f32 %v4732_v51, %v7639_v26 }
0x270b   :  { %v4758_v46 = vadd.f32 %v4742_v58, %v7660_v38  ;;  %v4751_v33 = vadd.f32 %v4736_v56, %v7636_v44  ;;  %v4753_v45 = vadd.f32 %v4737_v1, %v7642_v5  ;;  %v4754_v50 = vadd.f32 %v4738_v27, %v7645_v47 }
0x270c   :  { %v4755_v62 = vadd.f32 %v4739_v32, %v7648_v3  ;;  %v4756_v49 = vadd.f32 %v4740_v29, %v7651_v59  ;;  %v4767_v9 = vrot.slane %v4752_v6, 7  ;;  %v4757_v39 = vadd.f32 %v4741_v30, %v7655_v10 }
0x270d   :  { %v4779_v36 = vrot.slane %v4758_v46, 1  ;;  %v4769_v40 = vrot.slane %v4753_v45, 6  ;;  %v4771_v26 = vrot.slane %v4754_v50, 5  ;;  %v2627_v38 = vrot.slane %v7832_v24, 1 }
0x270e   :  { %v4768_v44 = vsel %vm195_vm2, %v4767_v9, %v4751_v33  ;;  %v4773_v35 = vrot.slane %v4755_v62, 4  ;;  %v4775_v17 = vrot.slane %v4756_v49, 3  ;;  %v4777_v10 = vrot.slane %v4757_v39, 2 }
0x270f   :  { %v4785_v5 = vsel %vm2743_vm14, %v4779_v36, 0.0  ;;  %v4770_v47 = vsel %vm198_vm3, %v4769_v40, %v4768_v44  ;;  %v2628_v3 = vsel %vm210_vm7, %v2627_v38, %v2626_v25 }
0x2710   :  { %4786 = vadd.xlane.f32.xlu1 %v4785_v5  ;;  %v4772_v59 = vsel %vm201_vm4, %v4771_v26, %v4770_v47  ;;  %v2630_v21 = vsel %vm212_vm8, %v2628_v3, 0.0 }
0x2711   :  { %v4774_v41 = vsel %vm204_vm5, %v4773_v35, %v4772_v59 }
0x2712   :  { %v4776_v55 = vsel %vm207_vm6, %v4775_v17, %v4774_v41 }
0x2713   :  { %v4778_v57 = vsel %vm210_vm7, %v4777_v10, %v4776_v55 }
0x2714   :  { %2631 = vadd.xlane.f32.xlu1 %v2630_v21  ;;  %v4782_v13 = vsel %vm3642_vm15, %v4778_v57, 0.0 }
0x2715   :  { %4783 = vadd.xlane.f32.xlu0 %v4782_v13 }
0x279d   :  { %v4787_v31 = vpop.xlane.xlu1 %4786 }
0x279e   :  { %v4789_v42 = vmul.f32 0.03125, %v4787_v31 }
0x27a0   :  { %v4798_v16 = vrot.slane %v4789_v42, 7 }
0x27a2   :  { %v4784_v14 = vpop.xlane.xlu0 %4783  ;;  %v4814_v1 = vsub.f32 %v4758_v46, %v4798_v16 }
0x27a3   :  { %v4788_v15 = vmul.f32 0.03125, %v4784_v14 }
0x27a5   :  { %v4792_v22 = vrot.slane %v4788_v15, 1  ;;  %v4793_v60 = vrot.slane %v4788_v15, 2  ;;  %v4794_v4 = vrot.slane %v4788_v15, 3  ;;  %v4795_v23 = vrot.slane %v4788_v15, 4 }
0x27a6   :  { %v4796_v52 = vrot.slane %v4788_v15, 5  ;;  %v4797_v28 = vrot.slane %v4788_v15, 6  ;;  %v4807_v20 = vsub.f32 %v4751_v33, %v4788_v15 }
0x27a7   :  { %v4808_v61 = vsub.f32 %v4752_v6, %v4792_v22  ;;  %v4809_v19 = vsub.f32 %v4753_v45, %v4793_v60  ;;  %v4810_v7 = vsub.f32 %v4754_v50, %v4794_v4  ;;  %v4811_v51 = vsub.f32 %v4755_v62, %v4795_v23 }
0x27a8   :  { %v4812_v54 = vsub.f32 %v4756_v49, %v4796_v52  ;;  %v4813_v0 = vsub.f32 %v4757_v39, %v4797_v28  ;;  %v4815_v32 = vmul.f32 %v4807_v20, %v4807_v20  ;;  %v4822_v62 = vmul.f32 %v4814_v1, %v4814_v1 }
0x27a9   :  { %v4816_v34 = vmul.f32 %v4808_v61, %v4808_v61  ;;  %v4817_v58 = vmul.f32 %v4809_v19, %v4809_v19  ;;  %v4818_v56 = vmul.f32 %v4810_v7, %v4810_v7  ;;  %v4819_v27 = vmul.f32 %v4811_v51, %v4811_v51 }
0x27aa   :  { %v4820_v29 = vmul.f32 %v4812_v54, %v4812_v54  ;;  %v4821_v9 = vmul.f32 %v4813_v0, %v4813_v0  ;;  %v4843_v44 = vrot.slane %v4822_v62, 1 }
0x27ab   :  { %v4831_v30 = vrot.slane %v4816_v34, 7  ;;  %v4833_v25 = vrot.slane %v4817_v58, 6  ;;  %v4835_v40 = vrot.slane %v4818_v56, 5  ;;  %v4837_v33 = vrot.slane %v4819_v27, 4 }
0x27ac   :  { %v4839_v50 = vrot.slane %v4820_v29, 3  ;;  %v4841_v39 = vrot.slane %v4821_v9, 2  ;;  %v4849_v5 = vsel %vm2743_vm14, %v4843_v44, 0.0 }
0x27ad   :  { %v4832_v36 = vsel %vm195_vm2, %v4831_v30, %v4815_v32 }
0x27ae   :  { %v4834_v6 = vsel %vm198_vm3, %v4833_v25, %v4832_v36 }
0x27af   :  { %v4836_v45 = vsel %vm201_vm4, %v4835_v40, %v4834_v6 }
0x27b0   :  { %v4838_v49 = vsel %vm204_vm5, %v4837_v33, %v4836_v45 }
0x27b1   :  { %v4840_v46 = vsel %vm207_vm6, %v4839_v50, %v4838_v49 }
0x27b2   :  { %v4842_v26 = vsel %vm210_vm7, %v4841_v39, %v4840_v46 }
0x27b3   :  { %v4846_v38 = vsel %vm3642_vm15, %v4842_v26, 0.0 }
0x27b4   :  { %4847 = vadd.xlane.f32.xlu0 %v4846_v38 }
0x27b8   :  { %4850 = vadd.xlane.f32.xlu0 %v4849_v5  ;;  %v6338_v5 = vld [vmem:[%s8138_s13] ss:$0 sm:$0xff] }
0x2841   :  { %v4848_v47 = vpop.xlane.xlu0 %4847 }
0x2842   :  { %v4852_v35 = vmul.f32 0.03125, %v4848_v47 }
0x2844   :  { %v4854_v3 = vadd.f32 1e-05, %v4852_v35 }
0x2845   :  { %v4851_v59 = vpop.xlane.xlu0 %4850 }
0x2846   :  { %6295 = vrsqrt.f32 %v4854_v3  ;;  %v4853_v17 = vmul.f32 0.03125, %v4851_v59 }
0x2848   :  { %v4855_v41 = vadd.f32 1e-05, %v4853_v17 }
0x284a   :  { %6297 = vrsqrt.f32 %v4855_v41 }
0x2850   :  { %v6296_v10 = vpop.eup %6295 }
0x2851   :  { %v4860_v55 = vrot.slane %v6296_v10, 1  ;;  %v4861_v21 = vrot.slane %v6296_v10, 2  ;;  %v4862_v57 = vrot.slane %v6296_v10, 3  ;;  %v4863_v13 = vrot.slane %v6296_v10, 4 }
0x2852   :  { %v4864_v31 = vrot.slane %v6296_v10, 5  ;;  %v4865_v42 = vrot.slane %v6296_v10, 6  ;;  %v4875_v14 = vmul.f32 %v6296_v10, %v4807_v20 }
0x2853   :  { %v4876_v15 = vmul.f32 %v4860_v55, %v4808_v61  ;;  %v4877_v22 = vmul.f32 %v4861_v21, %v4809_v19  ;;  %v4878_v60 = vmul.f32 %v4862_v57, %v4810_v7  ;;  %v4879_v4 = vmul.f32 %v4863_v13, %v4811_v51 }
0x2854   :  { %v6298_v23 = vpop.eup %6297  ;;  %v4880_v16 = vmul.f32 %v4864_v31, %v4812_v54  ;;  %v4881_v52 = vmul.f32 %v4865_v42, %v4813_v0  ;;  %v4883_v28 = vmul.f32 %v4875_v14, %v7208_v48 }
0x2855   :  { %v4866_v34 = vrot.slane %v6298_v23, 7  ;;  %v4884_v58 = vmul.f32 %v4876_v15, %v7208_v48  ;;  %v4885_v56 = vmul.f32 %v4877_v22, %v7208_v48  ;;  %v4886_v27 = vmul.f32 %v4878_v60, %v7208_v48 }
0x2856   :  { %v4887_v32 = vmul.f32 %v4879_v4, %v7208_v48  ;;  %v4888_v20 = vmul.f32 %v4880_v16, %v7208_v48  ;;  %v4889_v61 = vmul.f32 %v4881_v52, %v7208_v48  ;;  %v7872_v19 = vadd.f32 %v4883_v28, %v7211_v2 }
0x2857   :  { %v4882_v7 = vmul.f32 %v4866_v34, %v4814_v1  ;;  %v7875_v51 = vadd.f32 %v4884_v58, %v7211_v2  ;;  %v7878_v54 = vadd.f32 %v4885_v56, %v7211_v2  ;;  %v7881_v0 = vadd.f32 %v4886_v27, %v7211_v2 }
0x2858   :  { %v7884_v29 = vadd.f32 %v4887_v32, %v7211_v2  ;;  %v7887_v30 = vadd.f32 %v4888_v20, %v7211_v2  ;;  %v4907_v25 = vrot.slane %v7872_v19, 1  ;;  %v7892_v1 = vadd.f32 %v4889_v61, %v7211_v2  ;;  %v2632_v20 = vpop.xlane.xlu1 %2631 }
0x2859   :  { %v4890_v9 = vmul.f32 %v4882_v7, %v7208_v48  ;;  %v4909_v36 = vrot.slane %v7878_v54, 7  ;;  %v4911_v40 = vrot.slane %v7881_v0, 6  ;;  %v2633_v61 = vmul.f32 0.03125, %v2632_v20 }
0x285a   :  { %v4908_v6 = vsel %vm192_vm1, %v7875_v51, %v4907_v25  ;;  %v4913_v50 = vrot.slane %v7884_v29, 5  ;;  %v4915_v48 = vrot.slane %v7887_v30, 4  ;;  %v4917_v39 = vrot.slane %v7892_v1, 3 }
0x285b   :  { %v7899_v33 = vadd.f32 %v4890_v9, %v7211_v2  ;;  %v4910_v45 = vsel %vm195_vm2, %v4909_v36, %v4908_v6  ;;  %v2635_v7 = vrot.slane %v2633_v61, 1  ;;  %v2636_v25 = vrot.slane %v2633_v61, 2 }
0x285c   :  { %v4912_v62 = vsel %vm198_vm3, %v4911_v40, %v4910_v45  ;;  %v2637_v40 = vrot.slane %v2633_v61, 3  ;;  %v2638_v45 = vrot.slane %v2633_v61, 4 }
0x285d   :  { %v4914_v49 = vsel %vm201_vm4, %v4913_v50, %v4912_v62  ;;  %v4919_v46 = vrot.slane %v7899_v33, 2  ;;  %v7916_v9 = vsub.f32 %v7798_v53, %v2635_v7  ;;  %v7919_v36 = vsub.f32 %v7801_v8, %v2636_v25 }
0x285e   :  { %v4916_v26 = vsel %vm204_vm5, %v4915_v48, %v4914_v49  ;;  %v2639_v50 = vrot.slane %v2633_v61, 5  ;;  %v7924_v62 = vsub.f32 %v7805_v37, %v2633_v61  ;;  %v7929_v49 = vsub.f32 %v7809_v12, %v2637_v40 }
0x285f   :  { %v4918_v38 = vsel %vm207_vm6, %v4917_v39, %v4916_v26  ;;  %v2659_v6 = vmul.f32 %v7916_v9, %v7916_v9  ;;  %v2660_v48 = vmul.f32 %v7919_v36, %v7919_v36  ;;  %v2640_v39 = vrot.slane %v2633_v61, 6 }
0x2860   :  { %v4920_v2 = vsel %vm210_vm7, %v4919_v46, %v4918_v38  ;;  %v7932_v8 = vsub.f32 %v7814_v11, %v2638_v45  ;;  %v7935_v46 = vsub.f32 %v7819_v63, %v2639_v50  ;;  %v2658_v26 = vmul.f32 %v7924_v62, %v7924_v62 }
0x2861   :  { %5907 = vmatmul.mubr.msk.f32.vlgmr.msra.gmra.mrb[52].mxu1 %vm212_vm8, %v4920_v2  ;;  %v2674_v53 = vrot.slane %v2659_v6, 7  ;;  %v2676_v38 = vrot.slane %v2660_v48, 6  ;;  %v2661_v37 = vmul.f32 %v7929_v49, %v7929_v49  ;;  %v7943_v12 = vsub.f32 %v7824_v18, %v2640_v39 }
0x2862   :  { %v2662_v11 = vmul.f32 %v7932_v8, %v7932_v8  ;;  %v2663_v63 = vmul.f32 %v7935_v46, %v7935_v46 }
0x2863   :  { %v2675_v2 = vsel %vm192_vm1, %v2674_v53, %v2658_v26  ;;  %v2664_v18 = vmul.f32 %v7943_v12, %v7943_v12 }
0x2865   :  { %v2684_v20 = vrot.slane %v2664_v18, 2 }
0x2934   :  { %v4989_v44 = vpop.f32.mrb[52].mxu1 }
0x2935   :  { %v4990_v47 = vadd.f32 %v6338_v5, %v4989_v44  ;;  %v5908_v35 = vpop.f32.mrb[53].mxu1  ;;  %v2641_v44 = vrot.slane %v2633_v61, 7  ;;  %v2677_v5 = vsel %vm195_vm2, %v2676_v38, %v2675_v2 }
0x2936   :  { %v2678_v35 = vrot.slane %v2661_v37, 5 }
0x2937   :  { %v4994_v3 = vmul.f32 0.70710677, %v4990_v47  ;;  %v4993_v56 = vmul.f32 0.5, %v4990_v47 }
0x2939   :  { %v4995_v59 = vand.u32 2147483647, %v4994_v3  ;;  %vm5015_vm0 = vcmp.ge.f32.partialorder %v4994_v3, 0.0 }
0x293b   :  { %v4996_v17 = vmul.f32 0.3275911, %v4995_v59  ;;  %v5009_v10 = vsub.f32 0.0, %v4995_v59 }
0x293d   :  { %v4997_v41 = vadd.f32 1.0, %v4996_v17  ;;  %v5010_v21 = vmul.f32 %v5009_v10, %v4995_v59  ;;  %v7952_v17 = vsub.f32 %v7832_v24, %v2641_v44  ;;  %v2680_v10 = vrot.slane %v2662_v11, 4 }
0x293f   :  { %6299 = vrcp.f32 %v4997_v41  ;;  %v5011_v31 = vmul.f32 1.442695, %v5010_v21  ;;  %v2679_v41 = vsel %vm198_vm3, %v2678_v35, %v2677_v5 }
0x2941   :  { %6301 = vpow2.f32 %v5011_v31 }
0x2949   :  { %v6300_v55 = vpop.eup %6299 }
0x294a   :  { %v5000_v57 = vmul.f32 1.0614054, %v6300_v55 }
0x294b   :  { %v6302_v16 = vpop.eup %6301 }
0x294c   :  { %v5001_v13 = vadd.f32 -1.4531521, %v5000_v57 }
0x294e   :  { %v5002_v42 = vmul.f32 %v6300_v55, %v5001_v13 }
0x2950   :  { %v5003_v14 = vadd.f32 1.4214138, %v5002_v42 }
0x2952   :  { %v5004_v15 = vmul.f32 %v6300_v55, %v5003_v14 }
0x2954   :  { %v5005_v22 = vadd.f32 -0.28449672, %v5004_v15 }
0x2956   :  { %v5006_v60 = vmul.f32 %v6300_v55, %v5005_v22 }
0x2958   :  { %v5007_v4 = vadd.f32 0.2548296, %v5006_v60 }
0x295a   :  { %v5008_v23 = vmul.f32 %v6300_v55, %v5007_v4  ;;  %v2682_v55 = vrot.slane %v2663_v63, 3 }
0x295c   :  { %v5013_v52 = vmul.f32 %v6302_v16, %v5008_v23 }
0x295e   :  { %v5014_v28 = vsub.f32 1.0, %v5013_v52 }
0x2960   :  { %v5016_v34 = vsub.f32 0.0, %v5014_v28 }
0x2962   :  { %v5017_v58 = vsel %vm5015_vm0, %v5014_v28, %v5016_v34  ;;  %v2681_v28 = vsel %vm201_vm4, %v2680_v10, %v2679_v41 }
0x2963   :  { %v5018_v27 = vadd.f32 1.0, %v5017_v58 }
0x2965   :  { %v5019_v32 = vmul.f32 %v5018_v27, %v4993_v56 }
0x2967   :  { %5942 = vmatmul.mubr.f32.vlgmr.msra.gmra.mrb[36].mxu0 %v5019_v32 }
0x2a3a   :  { %v5086_v47 = vpop.f32.mrb[36].mxu0 }
0x2a3b   :  { %v5087_v3 = vadd.f32 %v7793_v43, %v5086_v47  ;;  %v5943_v59 = vpop.f32.mrb[37].mxu0 }
0x2a3d   :  { %v5097_v21 = vrot.slane %v5087_v3, 6  ;;  %v5091_v57 = vrot.slane %v5087_v3, 7  ;;  %v5092_v13 = vrot.slane %v5087_v3, 1  ;;  %v5093_v31 = vrot.slane %v5087_v3, 2 }
0x2a3e   :  { %v5094_v42 = vrot.slane %v5087_v3, 3  ;;  %v5095_v14 = vrot.slane %v5087_v3, 4  ;;  %v5096_v15 = vrot.slane %v5087_v3, 5  ;;  %v5107_v43 = vadd.f32 %v5087_v3, %v7875_v51 }
0x2a3f   :  { %v5113_v22 = vadd.f32 %v5097_v21, %v7899_v33  ;;  %v5106_v24 = vadd.f32 %v5091_v57, %v7872_v19  ;;  %v5108_v60 = vadd.f32 %v5092_v13, %v7878_v54  ;;  %v5109_v4 = vadd.f32 %v5093_v31, %v7881_v0 }
0x2a40   :  { %v5110_v23 = vadd.f32 %v5094_v42, %v7884_v29  ;;  %v5111_v16 = vadd.f32 %v5095_v14, %v7887_v30  ;;  %v5122_v52 = vrot.slane %v5107_v43, 7  ;;  %v5112_v58 = vadd.f32 %v5096_v15, %v7892_v1 }
0x2a41   :  { %v5134_v34 = vrot.slane %v5113_v22, 1  ;;  %v5124_v56 = vrot.slane %v5108_v60, 6  ;;  %v5126_v51 = vrot.slane %v5109_v4, 5  ;;  %v2665_v19 = vmul.f32 %v7952_v17, %v7952_v17 }
0x2a42   :  { %v5123_v33 = vsel %vm195_vm2, %v5122_v52, %v5106_v24  ;;  %v5128_v29 = vrot.slane %v5110_v23, 4  ;;  %v2683_v30 = vsel %vm204_vm5, %v2682_v55, %v2681_v28  ;;  %v5130_v32 = vrot.slane %v5111_v16, 3 }
0x2a43   :  { %v5140_v54 = vsel %vm2743_vm14, %v5134_v34, 0.0  ;;  %v5125_v0 = vsel %vm198_vm3, %v5124_v56, %v5123_v33  ;;  %v5132_v61 = vrot.slane %v5112_v58, 2  ;;  %v2685_v25 = vsel %vm207_vm6, %v2684_v20, %v2683_v30  ;;  %v8194_v30 = vld [vmem:[#allocation15_spill] sm:$0xff] }
0x2a44   :  { %5141 = vadd.xlane.f32.xlu1 %v5140_v54  ;;  %v5127_v27 = vsel %vm201_vm4, %v5126_v51, %v5125_v0  ;;  %v2686_v6 = vrot.slane %v2665_v19, 1 }
0x2a45   :  { %v5129_v1 = vsel %vm204_vm5, %v5128_v29, %v5127_v27  ;;  %v2721_v27 = vsub.s32 2, %v8194_v30 }
0x2a46   :  { %v5131_v7 = vsel %vm207_vm6, %v5130_v32, %v5129_v1  ;;  %v2687_v50 = vsel %vm210_vm7, %v2686_v6, %v2685_v25  ;;  %v6340_v25 = vld [vmem:[%s8142_s17] sm:$0x7] }
0x2a47   :  { %v5133_v40 = vsel %vm210_vm7, %v5132_v61, %v5131_v7  ;;  %v2689_v48 = vsel %vm212_vm8, %v2687_v50, 0.0  ;;  %v6339_v61 = vld [vmem:[%s8141_s16] sm:$0x7]  ;;  %s6482_s16 = smov [#allocation9]  }
0x2a48   :  { %v5137_v45 = vsel %vm3642_vm15, %v5133_v40, 0.0  ;;  %v8024_v7 = vrot.slane %v6339_v61, %v2721_v27  ;;  %v8029_v40 = vrot.slane %v6340_v25, %v2721_v27  ;;  %s5280_s17 = sshll.u32 %s6482_s16, 4  ;;  %s5281_s17 = int_to_ptr.vmem [resolvable:$true] %s5280_s17 }
0x2a49   :  { %5138 = vadd.xlane.f32.xlu0 %v5137_v45  ;;  %s6407_s24 = scalar_lea.vmem %s5281_s17, 1024  ;;  %p6412_p11 = scmp.lt.s32.totalorder %s5281_s17, %s5281_s17 }
0x2a4a   :  { %p6408_p10 = scmp.ne.s32.totalorder %s5281_s17, %s6407_s24  ;;  %p6413_p12 = scmp.lt.s32.totalorder %s6407_s24, %s6407_s24 }
0x2a4c   :  { %p6414_p13 = por %p6413_p12, %p6412_p11 }
0x2a4d   :  { %2690 = vadd.xlane.f32.xlu0 %v2689_v48 }
0x2a4e   :  { %p6415_p0 = pnand %p6414_p13, %p6408_p10 }
0x2ad1   :  { %v5142_v53 = vpop.xlane.xlu1 %5141 }
0x2ad2   :  { %v5144_v39 = vmul.f32 0.03125, %v5142_v53 }
0x2ad4   :  { %v5153_v26 = vrot.slane %v5144_v39, 7 }
0x2ad6   :  { %v7980_v38 = vsub.f32 %v5113_v22, %v5153_v26  ;;  %v5139_v37 = vpop.xlane.xlu0 %5138 }
0x2ad7   :  { %v5143_v2 = vmul.f32 0.03125, %v5139_v37 }
0x2ad8   :  { %v5177_v44 = vmul.f32 %v7980_v38, %v7980_v38 }
0x2ad9   :  { %v5147_v11 = vrot.slane %v5143_v2, 1  ;;  %v5148_v63 = vrot.slane %v5143_v2, 2  ;;  %v5149_v5 = vrot.slane %v5143_v2, 3  ;;  %v5150_v47 = vrot.slane %v5143_v2, 4 }
0x2ada   :  { %v2691_v35 = vpop.xlane.xlu0 %2690  ;;  %v5198_v3 = vrot.slane %v5177_v44, 1  ;;  %v5151_v59 = vrot.slane %v5143_v2, 5  ;;  %v5152_v18 = vrot.slane %v5143_v2, 6  ;;  %v7984_v41 = vsub.f32 %v5106_v24, %v5143_v2 }
0x2adb   :  { %v2692_v10 = vmul.f32 0.03125, %v2691_v35  ;;  %v7986_v55 = vsub.f32 %v5107_v43, %v5147_v11  ;;  %v7988_v21 = vsub.f32 %v5108_v60, %v5148_v63  ;;  %v7990_v57 = vsub.f32 %v5109_v4, %v5149_v5 }
0x2adc   :  { %v5204_v13 = vsel %vm2743_vm14, %v5198_v3, 0.0  ;;  %v7993_v31 = vsub.f32 %v5110_v23, %v5150_v47  ;;  %v7995_v42 = vsub.f32 %v5111_v16, %v5151_v59  ;;  %v7997_v14 = vsub.f32 %v5112_v58, %v5152_v18 }
0x2add   :  { %v2693_v15 = vadd.f32 1e-05, %v2692_v10  ;;  %5205 = vadd.xlane.f32.xlu0 %v5204_v13  ;;  %v5171_v22 = vmul.f32 %v7986_v55, %v7986_v55  ;;  %v5172_v43 = vmul.f32 %v7988_v21, %v7988_v21  ;;  %v5170_v24 = vmul.f32 %v7984_v41, %v7984_v41 }
0x2ade   :  { %v5173_v60 = vmul.f32 %v7990_v57, %v7990_v57  ;;  %v5174_v4 = vmul.f32 %v7993_v31, %v7993_v31  ;;  %v5175_v23 = vmul.f32 %v7995_v42, %v7995_v42  ;;  %v5176_v28 = vmul.f32 %v7997_v14, %v7997_v14 }
0x2adf   :  { %6303 = vrsqrt.f32 %v2693_v15  ;;  %v5186_v16 = vrot.slane %v5171_v22, 7  ;;  %v5188_v52 = vrot.slane %v5172_v43, 6 }
0x2ae0   :  { %v5190_v58 = vrot.slane %v5173_v60, 5  ;;  %v5192_v51 = vrot.slane %v5174_v4, 4  ;;  %v5194_v19 = vrot.slane %v5175_v23, 3  ;;  %v5196_v0 = vrot.slane %v5176_v28, 2 }
0x2ae1   :  { %v5187_v34 = vsel %vm195_vm2, %v5186_v16, %v5170_v24 }
0x2ae2   :  { %v5189_v56 = vsel %vm198_vm3, %v5188_v52, %v5187_v34 }
0x2ae3   :  { %v5191_v33 = vsel %vm201_vm4, %v5190_v58, %v5189_v56 }
0x2ae4   :  { %v5193_v54 = vsel %vm204_vm5, %v5192_v51, %v5191_v33 }
0x2ae5   :  { %v5195_v29 = vsel %vm207_vm6, %v5194_v19, %v5193_v54 }
0x2ae6   :  { %v5197_v32 = vsel %vm210_vm7, %v5196_v0, %v5195_v29 }
0x2ae7   :  { %v5201_v20 = vsel %vm3642_vm15, %v5197_v32, 0.0 }
0x2ae8   :  { %5202 = vadd.xlane.f32.xlu1 %v5201_v20 }
0x2ae9   :  { %v6304_v1 = vpop.eup %6303 }
0x2aea   :  { %v2696_v6 = vrot.slane %v6304_v1, 1  ;;  %v2697_v45 = vrot.slane %v6304_v1, 2  ;;  %v2698_v50 = vrot.slane %v6304_v1, 3  ;;  %v2699_v48 = vrot.slane %v6304_v1, 4 }
0x2aeb   :  { %v2700_v53 = vrot.slane %v6304_v1, 5  ;;  %v2701_v39 = vrot.slane %v6304_v1, 6  ;;  %v2702_v26 = vrot.slane %v6304_v1, 7  ;;  %v2711_v37 = vmul.f32 %v6304_v1, %v7924_v62 }
0x2aec   :  { %v2712_v2 = vmul.f32 %v2696_v6, %v7916_v9  ;;  %v2713_v44 = vmul.f32 %v2697_v45, %v7919_v36  ;;  %v2714_v11 = vmul.f32 %v2698_v50, %v7929_v49  ;;  %v2715_v63 = vmul.f32 %v2699_v48, %v7932_v8 }
0x2aed   :  { %v2716_v5 = vmul.f32 %v2700_v53, %v7935_v46  ;;  %v2717_v47 = vmul.f32 %v2701_v39, %v7943_v12  ;;  %v2718_v35 = vmul.f32 %v2702_v26, %v7952_v17  ;;  %v2723_v3 = vmul.f32 %v8024_v7, %v2711_v37 }
0x2aee   :  { %v2724_v59 = vmul.f32 %v8024_v7, %v2712_v2  ;;  %v2725_v62 = vmul.f32 %v8024_v7, %v2713_v44  ;;  %v2726_v9 = vmul.f32 %v8024_v7, %v2714_v11  ;;  %v2727_v36 = vmul.f32 %v8024_v7, %v2715_v63 }
0x2aef   :  { %v2728_v49 = vmul.f32 %v8024_v7, %v2716_v5  ;;  %v2729_v8 = vmul.f32 %v8024_v7, %v2717_v47  ;;  %v2730_v46 = vmul.f32 %v8024_v7, %v2718_v35  ;;  %v2735_v12 = vadd.f32 %v8029_v40, %v2723_v3 }
0x2af0   :  { %v2736_v17 = vadd.f32 %v8029_v40, %v2724_v59  ;;  %v2737_v18 = vadd.f32 %v8029_v40, %v2725_v62  ;;  %v2738_v10 = vadd.f32 %v8029_v40, %v2726_v9  ;;  %v2739_v13 = vadd.f32 %v8029_v40, %v2727_v36 }
0x2af1   :  { %v2740_v15 = vadd.f32 %v8029_v40, %v2728_v49  ;;  %v2741_v22 = vadd.f32 %v8029_v40, %v2729_v8  ;;  %v2742_v43 = vadd.f32 %v8029_v40, %v2730_v46  ;;  %2744 = vst.msk [vmem:[#allocation8] sm:$0x1] %vm2743_vm14, %v2735_v12 }
0x2af2   :  { %2745 = vst.msk [vmem:[#allocation8 + $0x2] sm:$0x1] %vm2743_vm14, %v2736_v17  ;;  %2746 = vst.msk [vmem:[#allocation8 + $0x4] sm:$0x1] %vm2743_vm14, %v2737_v18 }
0x2af3   :  { %2747 = vst.msk [vmem:[#allocation8 + $0x6] sm:$0x1] %vm2743_vm14, %v2738_v10  ;;  %2748 = vst.msk [vmem:[#allocation8 + $0x8] sm:$0x1] %vm2743_vm14, %v2739_v13 }
0x2af4   :  { %2749 = vst.msk [vmem:[#allocation8 + $0xa] sm:$0x1] %vm2743_vm14, %v2740_v15  ;;  %2750 = vst.msk [vmem:[#allocation8 + $0xc] sm:$0x1] %vm2743_vm14, %v2741_v22 }
0x2af5   :  { %2751 = vst.msk [vmem:[#allocation8 + $0xe] sm:$0x1] %vm2743_vm14, %v2742_v43 }
0x2af6   :  { %6418 = shalt.err (!%p6415_p0)
}
0x2af7   :  { %s6419_s8 = scalar_lea.hbm %s8144_s19, 1024 }
0x2af8   :  { %p6420_p1 = scmp.ne.s32.totalorder %s8144_s19, %s6419_s8  ;;  %p6423_p2 = scmp.lt.u32.totalorder %s6419_s8, %s8144_s19 }
0x2afa   :  { %p6425_p3 = pnand %p6423_p2, %p6420_p1 }
0x2afc   :  { %6428 = shalt.err (!%p6425_p3)
}
0x2afd   :  { %5286 = dma.vmem_to_hbm [thread:$0]  %s5281_s17, 1024, %s8144_s19, [#allocation10], %s8177_s0, %s8177_s0, %s8184_s23   ;;  %vm5254_vm1 = vcmask 254977  }
0x2afe   :  { %s6483_s19 = smov [#allocation8]  }
0x2aff   :  { %s5268_s0 = sshll.u32 %s6483_s19, 4  ;;  %s5269_s0 = int_to_ptr.vmem [resolvable:$true] %s5268_s0 }
0x2b00   :  { %s6429_s23 = scalar_lea.vmem %s5269_s0, 256  ;;  %p6434_p5 = scmp.lt.s32.totalorder %s5269_s0, %s5269_s0 }
0x2b01   :  { %p6430_p4 = scmp.ne.s32.totalorder %s5269_s0, %s6429_s23  ;;  %p6435_p6 = scmp.lt.s32.totalorder %s6429_s23, %s6429_s23 }
0x2b03   :  { %p6436_p7 = por %p6435_p6, %p6434_p5 }
0x2b05   :  { %p6437_p8 = pnand %p6436_p7, %p6430_p4 }
0x2b6a   :  { %v5206_v24 = vpop.xlane.xlu0 %5205 }
0x2b6b   :  { %v5208_v60 = vmul.f32 0.03125, %v5206_v24 }
0x2b6d   :  { %v5210_v4 = vadd.f32 1e-05, %v5208_v60 }
0x2b6f   :  { %6305 = vrsqrt.f32 %v5210_v4 }
0x2b75   :  { %v5203_v23 = vpop.xlane.xlu1 %5202 }
0x2b76   :  { %v5207_v16 = vmul.f32 0.03125, %v5203_v23 }
0x2b78   :  { %v5209_v52 = vadd.f32 1e-05, %v5207_v16 }
0x2b79   :  { %v6306_v28 = vpop.eup %6305 }
0x2b7a   :  { %v5221_v34 = vrot.slane %v6306_v28, 7  ;;  %6307 = vrsqrt.f32 %v5209_v52 }
0x2b7c   :  { %v5237_v58 = vmul.f32 %v5221_v34, %v7980_v38 }
0x2b7e   :  { %v5245_v56 = vmul.f32 %v5237_v58, %v8024_v7 }
0x2b80   :  { %v5253_v51 = vadd.f32 %v5245_v56, %v8029_v40 }
0x2b82   :  { %5262 = vst.msk [vmem:[#allocation8 + $0xe] sm:$0x2] %vm5254_vm1, %v5253_v51 }
0x2b84   :  { %v6308_v33 = vpop.eup %6307 }
0x2b85   :  { %v5215_v19 = vrot.slane %v6308_v33, 1  ;;  %v5216_v54 = vrot.slane %v6308_v33, 2  ;;  %v5217_v0 = vrot.slane %v6308_v33, 3  ;;  %v5218_v29 = vrot.slane %v6308_v33, 4 }
0x2b86   :  { %v5219_v30 = vrot.slane %v6308_v33, 5  ;;  %v5220_v27 = vrot.slane %v6308_v33, 6  ;;  %v5230_v32 = vmul.f32 %v6308_v33, %v7984_v41 }
0x2b87   :  { %v5231_v20 = vmul.f32 %v5215_v19, %v7986_v55  ;;  %v5232_v38 = vmul.f32 %v5216_v54, %v7988_v21  ;;  %v5233_v1 = vmul.f32 %v5217_v0, %v7990_v57  ;;  %v5234_v61 = vmul.f32 %v5218_v29, %v7993_v31 }
0x2b88   :  { %v5235_v25 = vmul.f32 %v5219_v30, %v7995_v42  ;;  %v5236_v6 = vmul.f32 %v5220_v27, %v7997_v14  ;;  %v5238_v45 = vmul.f32 %v5230_v32, %v8024_v7 }
0x2b89   :  { %v5239_v50 = vmul.f32 %v5231_v20, %v8024_v7  ;;  %v5240_v48 = vmul.f32 %v5232_v38, %v8024_v7  ;;  %v5241_v41 = vmul.f32 %v5233_v1, %v8024_v7  ;;  %v5242_v55 = vmul.f32 %v5234_v61, %v8024_v7 }
0x2b8a   :  { %v5243_v21 = vmul.f32 %v5235_v25, %v8024_v7  ;;  %v5244_v57 = vmul.f32 %v5236_v6, %v8024_v7  ;;  %v5246_v31 = vadd.f32 %v5238_v45, %v8029_v40 }
0x2b8b   :  { %v5247_v42 = vadd.f32 %v5239_v50, %v8029_v40  ;;  %v5248_v14 = vadd.f32 %v5240_v48, %v8029_v40  ;;  %v5249_v53 = vadd.f32 %v5241_v41, %v8029_v40  ;;  %v5250_v39 = vadd.f32 %v5242_v55, %v8029_v40 }
0x2b8c   :  { %v5251_v26 = vadd.f32 %v5243_v21, %v8029_v40  ;;  %v5252_v37 = vadd.f32 %v5244_v57, %v8029_v40  ;;  %5255 = vst.msk [vmem:[#allocation8] sm:$0x2] %vm5254_vm1, %v5246_v31 }
0x2b8d   :  { %5256 = vst.msk [vmem:[#allocation8 + $0x2] sm:$0x2] %vm5254_vm1, %v5247_v42  ;;  %5257 = vst.msk [vmem:[#allocation8 + $0x4] sm:$0x2] %vm5254_vm1, %v5248_v14 }
0x2b8e   :  { %5258 = vst.msk [vmem:[#allocation8 + $0x6] sm:$0x2] %vm5254_vm1, %v5249_v53  ;;  %5259 = vst.msk [vmem:[#allocation8 + $0x8] sm:$0x2] %vm5254_vm1, %v5250_v39 }
0x2b8f   :  { %5260 = vst.msk [vmem:[#allocation8 + $0xa] sm:$0x2] %vm5254_vm1, %v5251_v26  ;;  %5261 = vst.msk [vmem:[#allocation8 + $0xc] sm:$0x2] %vm5254_vm1, %v5252_v37 }
0x2b90   :  { %6440 = shalt.err (!%p6437_p8)
}
0x2b91   :  { %s8195_s26 = sld [smem:[#allocation20_spill]] }
0x2b97   :  { %s6441_s2 = scalar_lea.hbm %s8195_s26, 256 }
0x2b98   :  { %p6442_p9 = scmp.ne.s32.totalorder %s8195_s26, %s6441_s2  ;;  %p6445_p10 = scmp.lt.u32.totalorder %s6441_s2, %s8195_s26 }
0x2b9a   :  { %p6447_p11 = pnand %p6445_p10, %p6442_p9 }
0x2b9c   :  { %6450 = shalt.err (!%p6447_p11)
}
0x2b9d   :  { %s8196_s15 = smov 2   ;;  %s8197_s27 = smov 32  }
0x2b9e   :  { %5274 = dma.vmem_to_hbm [thread:$0]  %s5269_s0, 256, %s8195_s26, [#allocation4], %s8197_s27, %s8197_s27, %s8196_s15  }
0x2b9f   :  { %6455 = dma.done.wait [#allocation4], 256  }
0x2ba0   :  { %6456 = vsyncadd [#allocation4], 4294967040 }
0x2ba1   :  { %6457 = dma.done.wait [#allocation10], 1024  }
0x2ba2   :  { %6458 = vsyncadd [#allocation10], 4294966272 }
0x2ba3   :  { %5293 = vsyncpa [#allocation3], 1 }
0x2ba4   :  { %5294 = vsyncpa [#allocation6], 1 }
0x2ba5   :  { %5295 = vsyncpa [#allocation4], 1 }
0x2ba6   :  { %5296 = vsyncpa [#allocation10], 1 }

</bundles_post_ra>
